<compile_context>
chip_gen: v6e
topology: v6e:2x2x1
jax: 0.10.0
libtpu: 0.0.40
codegen_flags: <defaults>
</compile_context>

<pallas_src>
import functools
import math

import numpy as np

import jax
import jax.numpy as jnp
from jax.experimental import pallas as pl
from jax.experimental.pallas import tpu as pltpu


PADW = 128        # lane-dense output width (avoid masked vst on 1..4-wide outputs)
GINE_EPS = 0.1    # GINE epsilon (matches previous implementation)


PARAM_RANGE = {
    "Charge": [-2.0, 2.0],
    "Sigma": [0.05, 1.0],
    "Epsilon": [1e-4, 5.0],
    "Bond_k": [0.0, 4000.0],
    "Bond_length": [0.05, 3.0],
    "Angle_k": [0.0, 1000.0],
    "Angle_theta": [0.0, math.pi],
    "ProperTorsion_k": [-20.0, 20.0],
    "ImproperTorsion_k": [None, 50.0],
}


# Fixed positional order of the fused kernel's inputs (shared by kernel & wrapper).
_INPUT_NAMES = (
    # graph data / one-hot gather selectors / clamp bound vectors
    "node_feat", "edge_feat", "adj", "inc",
    "sel_bond", "sel_angle", "sel_prop", "sel_impr", "tmask",
    "atom_lo", "atom_hi", "bond_lo", "bond_hi", "ang_lo", "ang_hi",
    # feature layer
    "feat_node_w", "feat_node_b", "feat_edge_w", "feat_edge_b",
    # gnn layer 0 (GINE)
    "g0_wn1", "g0_bn1", "g0_wn2", "g0_bn2", "g0_we1", "g0_be1", "g0_we2", "g0_be2",
    # gnn layer 1 (GINE)
    "g1_wn1", "g1_bn1", "g1_wn2", "g1_bn2", "g1_we1", "g1_be1", "g1_we2", "g1_be2",
    # output heads (w2 / b2 are lane-padded to PADW columns by the wrapper)
    "atom_w1", "atom_b1", "atom_w2", "atom_b2",
    "bond_w1", "bond_b1", "bond_w2", "bond_b2",
    "ang_w1", "ang_b1", "ang_w2", "ang_b2",
    "prop_w1", "prop_b1", "prop_w2", "prop_b2",
    "impr_w1", "impr_b1", "impr_w2", "impr_b2",
)


# ---------------------------------------------------------------------------
# single fused kernel
# ---------------------------------------------------------------------------
def _mlparams_fused_kernel(*refs, gine_eps, prop_range, impr_range):
    n_in = len(_INPUT_NAMES)
    r = dict(zip(_INPUT_NAMES, refs[:n_in]))
    atom_o, bond_o, ang_o, prop_o, impr_o = refs[n_in:]

    def mlp2(x, w1, b1, w2, b2):
        t = jnp.maximum(
            jnp.dot(x, w1, preferred_element_type=jnp.float32) + b1, 0.0)
        return jnp.dot(t, w2, preferred_element_type=jnp.float32) + b2

    def clamp(x, lo, hi):
        # CustomClamp.forward == clamp (min/max may be None)
        if lo is not None:
            x = jnp.maximum(x, lo)
        if hi is not None:
            x = jnp.minimum(x, hi)
        return x

    # ---- 1. feature layer ------------------------------------------------
    h = jnp.maximum(
        jnp.dot(r["node_feat"][...], r["feat_node_w"][...],
                preferred_element_type=jnp.float32) + r["feat_node_b"][...], 0.0)
    e = jnp.maximum(
        jnp.dot(r["edge_feat"][...], r["feat_edge_w"][...],
                preferred_element_type=jnp.float32) + r["feat_edge_b"][...], 0.0)

    adj = r["adj"][...]   # loaded once, reused by both GINE layers
    inc = r["inc"][...]

    # ---- 2. gnn layer: 2x GINE message passing, h / e stay on-chip --------
    for g in ("g0", "g1"):
        agg = (jnp.dot(adj, h, preferred_element_type=jnp.float32)
               + jnp.dot(inc, e, preferred_element_type=jnp.float32))
        z = (1.0 + gine_eps) * h + agg
        h_new = mlp2(z, r[g + "_wn1"][...], r[g + "_bn1"][...],
                     r[g + "_wn2"][...], r[g + "_bn2"][...])
        # edge update: inc^T @ h via transposed contraction (no HBM transpose)
        ez = e + jax.lax.dot_general(inc, h, (((0,), (0,)), ((), ())),
                                     preferred_element_type=jnp.float32)
        e = mlp2(ez, r[g + "_we1"][...], r[g + "_be1"][...],
                 r[g + "_we2"][...], r[g + "_be2"][...])
        h = h_new
    x_h = h  # edge embeddings not consumed by the simplified output heads

    # ---- 3. atom head, clamp fused, lane-dense PADW-wide store ------------
    atom_out = mlp2(x_h, r["atom_w1"][...], r["atom_b1"][...],
                    r["atom_w2"][...], r["atom_b2"][...])          # (N, PADW)
    atom_o[...] = jnp.minimum(jnp.maximum(atom_out, r["atom_lo"][...]),
                              r["atom_hi"][...])

    # ---- Janossy heads: in-kernel one-hot gather matmuls against x_h ------
    def janossy_head(sel_ref, fwd, rev, w1, b1, w2, b2):
        g = [jnp.dot(sel_ref[o], x_h, preferred_element_type=jnp.float32)
             for o in range(len(fwd))]
        x_fwd = jnp.concatenate([g[o] for o in fwd], axis=-1)
        x_rev = jnp.concatenate([g[o] for o in rev], axis=-1)
        n = x_fwd.shape[0]                        # padded to a multiple of 8
        # one packed MXU pass over both atom orders, then split & sum
        y = mlp2(jnp.concatenate([x_fwd, x_rev], axis=0), w1, b1, w2, b2)
        return y[:n] + y[n:]

    bond_out = janossy_head(r["sel_bond"], (0, 1), (1, 0),
                            r["bond_w1"][...], r["bond_b1"][...],
                            r["bond_w2"][...], r["bond_b2"][...])
    bond_o[...] = jnp.minimum(jnp.maximum(bond_out, r["bond_lo"][...]),
                              r["bond_hi"][...])

    ang_out = janossy_head(r["sel_angle"], (0, 1, 2), (2, 1, 0),
                           r["ang_w1"][...], r["ang_b1"][...],
                           r["ang_w2"][...], r["ang_b2"][...])
    ang_o[...] = jnp.minimum(jnp.maximum(ang_out, r["ang_lo"][...]),
                             r["ang_hi"][...])

    prop_out = janossy_head(r["sel_prop"], (0, 1, 2, 3), (3, 2, 1, 0),
                            r["prop_w1"][...], r["prop_b1"][...],
                            r["prop_w2"][...], r["prop_b2"][...])
    # clamp then ProperTorsion_linear_mask multiply (same order as reference)
    prop_o[...] = clamp(prop_out, *prop_range) * r["tmask"][...]

    # TODO(synk): byteff improper Janossy pools over the 3 permutations of the
    # outer atoms around the central atom; approximated with fwd/rev here.
    impr_out = janossy_head(r["sel_impr"], (0, 1, 2, 3), (0, 3, 2, 1),
                            r["impr_w1"][...], r["impr_b1"][...],
                            r["impr_w2"][...], r["impr_b2"][...])
    impr_o[...] = clamp(impr_out, *impr_range)


# ---------------------------------------------------------------------------
# parameter init (deterministic, torch.nn.Linear-style uniform)
# ---------------------------------------------------------------------------
def _linear_init(key, din, dout):
    kw, kb = jax.random.split(key)
    s = 1.0 / math.sqrt(din)
    w = jax.random.uniform(kw, (din, dout), minval=-s, maxval=s, dtype=jnp.float32)
    b = jax.random.uniform(kb, (1, dout), minval=-s, maxval=s, dtype=jnp.float32)
    return w, b


def init_mlparams(key, f_node, f_edge, hidden):
    keys = iter(jax.random.split(key, 32))
    p = {}
    p["feat_node_w"], p["feat_node_b"] = _linear_init(next(keys), f_node, hidden)
    p["feat_edge_w"], p["feat_edge_b"] = _linear_init(next(keys), f_edge, hidden)
    p["gnn"] = []
    for _ in range(2):
        lp = {}
        lp["wn1"], lp["bn1"] = _linear_init(next(keys), hidden, hidden)
        lp["wn2"], lp["bn2"] = _linear_init(next(keys), hidden, hidden)
        lp["we1"], lp["be1"] = _linear_init(next(keys), hidden, hidden)
        lp["we2"], lp["be2"] = _linear_init(next(keys), hidden, hidden)
        p["gnn"].append(lp)
    p["atom_w1"], p["atom_b1"] = _linear_init(next(keys), hidden, hidden)
    p["atom_w2"], p["atom_b2"] = _linear_init(next(keys), hidden, 3)         # Charge, Sigma, Epsilon
    p["bond_w1"], p["bond_b1"] = _linear_init(next(keys), 2 * hidden, hidden)
    p["bond_w2"], p["bond_b2"] = _linear_init(next(keys), hidden, 2)         # Bond_k, Bond_length
    p["ang_w1"], p["ang_b1"] = _linear_init(next(keys), 3 * hidden, hidden)
    p["ang_w2"], p["ang_b2"] = _linear_init(next(keys), hidden, 2)           # Angle_k, Angle_theta
    p["prop_w1"], p["prop_b1"] = _linear_init(next(keys), 4 * hidden, hidden)
    p["prop_w2"], p["prop_b2"] = _linear_init(next(keys), hidden, 4)         # ProperTorsion_k (4 periodicities)
    p["impr_w1"], p["impr_b1"] = _linear_init(next(keys), 4 * hidden, hidden)
    p["impr_w2"], p["impr_b2"] = _linear_init(next(keys), hidden, 1)         # ImproperTorsion_k
    return p


# ---------------------------------------------------------------------------
# MLParams forward (one fused pallas_call + plain-JAX dict plumbing)
# ---------------------------------------------------------------------------
def _round_up8(n):
    return ((n + 7) // 8) * 8


def mlparams_forward(p, graph, gine_eps=GINE_EPS):
    node_feat = graph["node_feat"].astype(jnp.float32)
    edge_feat = graph["edge_feat"].astype(jnp.float32)
    adj = graph["adj"].astype(jnp.float32)
    inc = graph["inc"].astype(jnp.float32)
    bonds = graph["Bond_index"]
    angles = graph["Angle_index"]
    propers = graph["ProperTorsion_index"]
    impropers = graph["ImproperTorsion_index"]

    n_nodes = node_feat.shape[0]
    nb, na = bonds.shape[0], angles.shape[0]
    nt, ni = propers.shape[0], impropers.shape[0]
    nb_p, na_p, nt_p, ni_p = map(_round_up8, (nb, na, nt, ni))

    # one-hot gather selectors; rows padded to multiples of 8 so all in-kernel
    # row concats / splits are sublane aligned (padded rows are sliced off after)
    def sel(idx, arity, n_pad):
        s = jnp.stack([jax.nn.one_hot(idx[:, o], n_nodes, dtype=jnp.float32)
                       for o in range(arity)], axis=0)
        return jnp.pad(s, ((0, 0), (0, n_pad - idx.shape[0]), (0, 0)))

    tmask = jnp.pad(graph["ProperTorsion_linear_mask"].astype(jnp.float32),
                    (0, nt_p - nt))[:, None]

    # per-column clamp bounds as (1, PADW) vectors (pad columns left unclamped)
    def bound_vecs(names):
        lo = np.full((1, PADW), -1e30, np.float32)
        hi = np.full((1, PADW), 1e30, np.float32)
        for i, name in enumerate(names):
            l, h = PARAM_RANGE[name]
            if l is not None:
                lo[0, i] = l
            if h is not None:
                hi[0, i] = h
        return jnp.asarray(lo), jnp.asarray(hi)

    atom_lo, atom_hi = bound_vecs(("Charge", "Sigma", "Epsilon"))
    bond_lo, bond_hi = bound_vecs(("Bond_k", "Bond_length"))
    ang_lo, ang_hi = bound_vecs(("Angle_k", "Angle_theta"))

    def pad_head(w2, b2):
        # lane-dense outputs: zero-pad the final projection to PADW columns
        return (jnp.pad(w2, ((0, 0), (0, PADW - w2.shape[1]))),
                jnp.pad(b2, ((0, 0), (0, PADW - b2.shape[1]))))

    inputs = {
        "node_feat": node_feat, "edge_feat": edge_feat, "adj": adj, "inc": inc,
        "sel_bond": sel(bonds, 2, nb_p), "sel_angle": sel(angles, 3, na_p),
        "sel_prop": sel(propers, 4, nt_p), "sel_impr": sel(impropers, 4, ni_p),
        "tmask": tmask,
        "atom_lo": atom_lo, "atom_hi": atom_hi,
        "bond_lo": bond_lo, "bond_hi": bond_hi,
        "ang_lo": ang_lo, "ang_hi": ang_hi,
    }
    for k in ("feat_node_w", "feat_node_b", "feat_edge_w", "feat_edge_b",
              "atom_w1", "atom_b1", "bond_w1", "bond_b1", "ang_w1", "ang_b1",
              "prop_w1", "prop_b1", "impr_w1", "impr_b1"):
        inputs[k] = p[k]
    for head in ("atom", "bond", "ang", "prop", "impr"):
        inputs[head + "_w2"], inputs[head + "_b2"] = pad_head(p[head + "_w2"],
                                                              p[head + "_b2"])
    for li, lp in enumerate(p["gnn"]):
        for k, v in lp.items():
            inputs[f"g{li}_{k}"] = v

    out_shape = tuple(jax.ShapeDtypeStruct((rows, PADW), jnp.float32)
                      for rows in (n_nodes, nb_p, na_p, nt_p, ni_p))

    kernel = functools.partial(
        _mlparams_fused_kernel, gine_eps=gine_eps,
        prop_range=tuple(PARAM_RANGE["ProperTorsion_k"]),
        impr_range=tuple(PARAM_RANGE["ImproperTorsion_k"]))

    # single fused pallas_call, no grid: every operand is one full-array block
    # resident in VMEM for the whole forward pass.
    atom_s, bond_s, ang_s, prop_s, impr_s = pl.pallas_call(
        kernel,
        out_shape=out_shape,
        compiler_params=pltpu.CompilerParams(vmem_limit_bytes=32 * 1024 * 1024),
    )(*[inputs[name] for name in _INPUT_NAMES])

    # slice the lane-dense slabs back to natural parameter widths (plain JAX)
    params = {
        "Charge": atom_s[:, 0:1],
        "Sigma": atom_s[:, 1:2],
        "Epsilon": atom_s[:, 2:3],
        "Bond_k": bond_s[:nb, 0:1],
        "Bond_length": bond_s[:nb, 1:2],
        "Angle_k": ang_s[:na, 0:1],
        "Angle_theta": ang_s[:na, 1:2],
        "ProperTorsion_k": prop_s[:nt, 0:4],
        "ImproperTorsion_k": impr_s[:ni, 0:1],
    }

    topo_params = {
        "topology": {
            "Atom": jnp.arange(n_nodes, dtype=jnp.int32)[:, None],
            "Bond": bonds, "Angle": angles,
            "ProperTorsion": propers, "ImproperTorsion": impropers,
        },
        "counts": {
            "Atom": n_nodes, "Bond": nb, "Angle": na,
            "ProperTorsion": nt, "ImproperTorsion": ni,
        },
        "params": params,
    }
    return topo_params


# ---------------------------------------------------------------------------
# main
# ---------------------------------------------------------------------------
if __name__ == "__main__":
    N, F_NODE, F_EDGE, H = 16, 16, 8, 32
    key = jax.random.PRNGKey(0)
    k_feat_n, k_feat_e, k_model = jax.random.split(key, 3)

    # chain "molecule" topology
    bonds = jnp.stack([jnp.arange(N - 1), jnp.arange(1, N)], axis=1).astype(jnp.int32)                     # (15, 2)
    angles = jnp.stack([jnp.arange(N - 2), jnp.arange(1, N - 1), jnp.arange(2, N)], 1).astype(jnp.int32)   # (14, 3)
    propers = jnp.stack([jnp.arange(N - 3), jnp.arange(1, N - 2),
                         jnp.arange(2, N - 1), jnp.arange(3, N)], 1).astype(jnp.int32)                     # (13, 4)
    impropers = jnp.array([[2, 1, 3, 4], [6, 5, 7, 8], [10, 9, 11, 12]], dtype=jnp.int32)                  # (3, 4)
    nb, nt = bonds.shape[0], propers.shape[0]

    adj = jnp.zeros((N, N), jnp.float32)
    adj = adj.at[bonds[:, 0], bonds[:, 1]].set(1.0).at[bonds[:, 1], bonds[:, 0]].set(1.0)
    inc = jnp.zeros((N, nb), jnp.float32)
    inc = inc.at[bonds[:, 0], jnp.arange(nb)].set(1.0).at[bonds[:, 1], jnp.arange(nb)].set(1.0)

    graph = {
        "node_feat": jax.random.normal(k_feat_n, (N, F_NODE), jnp.float32),
        "edge_feat": jax.random.normal(k_feat_e, (nb, F_EDGE), jnp.float32),
        "adj": adj, "inc": inc,
        "Bond_index": bonds, "Angle_index": angles,
        "ProperTorsion_index": propers, "ImproperTorsion_index": impropers,
        "ProperTorsion_linear_mask": jnp.where(jnp.arange(nt) % 4 == 0, 0.0, 1.0).astype(jnp.float32),
    }

    model_params = init_mlparams(k_model, F_NODE, F_EDGE, H)
    topo_params = mlparams_forward(model_params, graph)
    jax.block_until_ready(topo_params)

    # light sanity checks
    assert topo_params["params"]["Charge"].shape == (N, 1)
    assert topo_params["params"]["Bond_k"].shape == (nb, 1)
    assert topo_params["params"]["ProperTorsion_k"].shape == (nt, 4)
    assert bool(jnp.all(topo_params["params"]["Sigma"] >= 0.05))
    assert bool(jnp.all(topo_params["params"]["Sigma"] <= 1.0))
    assert bool(jnp.all(topo_params["params"]["ProperTorsion_k"][::4] == 0.0))  # masked rows

    print("KERNEL_OK")
</pallas_src>

<mosaic_0001>
module attributes {stable_mosaic.version = 11 : i64} {
  func.func @_mlparams_fused_kernel(%arg0: memref<16x16xf32, #tpu.memory_space<vmem>>, %arg1: memref<15x8xf32, #tpu.memory_space<vmem>>, %arg2: memref<16x16xf32, #tpu.memory_space<vmem>>, %arg3: memref<16x15xf32, #tpu.memory_space<vmem>>, %arg4: memref<2x16x16xf32, #tpu.memory_space<vmem>>, %arg5: memref<3x16x16xf32, #tpu.memory_space<vmem>>, %arg6: memref<4x16x16xf32, #tpu.memory_space<vmem>>, %arg7: memref<4x8x16xf32, #tpu.memory_space<vmem>>, %arg8: memref<16x1xf32, #tpu.memory_space<vmem>>, %arg9: memref<1x128xf32, #tpu.memory_space<vmem>>, %arg10: memref<1x128xf32, #tpu.memory_space<vmem>>, %arg11: memref<1x128xf32, #tpu.memory_space<vmem>>, %arg12: memref<1x128xf32, #tpu.memory_space<vmem>>, %arg13: memref<1x128xf32, #tpu.memory_space<vmem>>, %arg14: memref<1x128xf32, #tpu.memory_space<vmem>>, %arg15: memref<16x32xf32, #tpu.memory_space<vmem>>, %arg16: memref<1x32xf32, #tpu.memory_space<vmem>>, %arg17: memref<8x32xf32, #tpu.memory_space<vmem>>, %arg18: memref<1x32xf32, #tpu.memory_space<vmem>>, %arg19: memref<32x32xf32, #tpu.memory_space<vmem>>, %arg20: memref<1x32xf32, #tpu.memory_space<vmem>>, %arg21: memref<32x32xf32, #tpu.memory_space<vmem>>, %arg22: memref<1x32xf32, #tpu.memory_space<vmem>>, %arg23: memref<32x32xf32, #tpu.memory_space<vmem>>, %arg24: memref<1x32xf32, #tpu.memory_space<vmem>>, %arg25: memref<32x32xf32, #tpu.memory_space<vmem>>, %arg26: memref<1x32xf32, #tpu.memory_space<vmem>>, %arg27: memref<32x32xf32, #tpu.memory_space<vmem>>, %arg28: memref<1x32xf32, #tpu.memory_space<vmem>>, %arg29: memref<32x32xf32, #tpu.memory_space<vmem>>, %arg30: memref<1x32xf32, #tpu.memory_space<vmem>>, %arg31: memref<32x32xf32, #tpu.memory_space<vmem>>, %arg32: memref<1x32xf32, #tpu.memory_space<vmem>>, %arg33: memref<32x32xf32, #tpu.memory_space<vmem>>, %arg34: memref<1x32xf32, #tpu.memory_space<vmem>>, %arg35: memref<32x32xf32, #tpu.memory_space<vmem>>, %arg36: memref<1x32xf32, #tpu.memory_space<vmem>>, %arg37: memref<32x128xf32, #tpu.memory_space<vmem>>, %arg38: memref<1x128xf32, #tpu.memory_space<vmem>>, %arg39: memref<64x32xf32, #tpu.memory_space<vmem>>, %arg40: memref<1x32xf32, #tpu.memory_space<vmem>>, %arg41: memref<32x128xf32, #tpu.memory_space<vmem>>, %arg42: memref<1x128xf32, #tpu.memory_space<vmem>>, %arg43: memref<96x32xf32, #tpu.memory_space<vmem>>, %arg44: memref<1x32xf32, #tpu.memory_space<vmem>>, %arg45: memref<32x128xf32, #tpu.memory_space<vmem>>, %arg46: memref<1x128xf32, #tpu.memory_space<vmem>>, %arg47: memref<128x32xf32, #tpu.memory_space<vmem>>, %arg48: memref<1x32xf32, #tpu.memory_space<vmem>>, %arg49: memref<32x128xf32, #tpu.memory_space<vmem>>, %arg50: memref<1x128xf32, #tpu.memory_space<vmem>>, %arg51: memref<128x32xf32, #tpu.memory_space<vmem>>, %arg52: memref<1x32xf32, #tpu.memory_space<vmem>>, %arg53: memref<32x128xf32, #tpu.memory_space<vmem>>, %arg54: memref<1x128xf32, #tpu.memory_space<vmem>>, %arg55: memref<16x128xf32, #tpu.memory_space<vmem>>, %arg56: memref<16x128xf32, #tpu.memory_space<vmem>>, %arg57: memref<16x128xf32, #tpu.memory_space<vmem>>, %arg58: memref<16x128xf32, #tpu.memory_space<vmem>>, %arg59: memref<8x128xf32, #tpu.memory_space<vmem>>) attributes {dimension_semantics = [], scalar_prefetch = 0 : i64, scratch_operands = 0 : i64, tpu.core_type = #tpu.core_type<tc>} {
    %c0 = arith.constant 0 : index
    %c0_0 = arith.constant 0 : index
    %0 = vector.load %arg0[%c0, %c0_0] : memref<16x16xf32, #tpu.memory_space<vmem>>, vector<16x16xf32>
    %c0_1 = arith.constant 0 : index
    %c0_2 = arith.constant 0 : index
    %1 = vector.load %arg15[%c0_1, %c0_2] : memref<16x32xf32, #tpu.memory_space<vmem>>, vector<16x32xf32>
    %cst = arith.constant dense<0.000000e+00> : vector<16x32xf32>
    %2 = tpu.matmul %0, %1, %cst {dimension_numbers = #tpu.dot_dimension_numbers<[1], [0], [0], [1], [0, 0, 1, 1], [], []>} : vector<16x16xf32>, vector<16x32xf32>, vector<16x32xf32> -> vector<16x32xf32>
    %c0_3 = arith.constant 0 : index
    %c0_4 = arith.constant 0 : index
    %3 = vector.load %arg16[%c0_3, %c0_4] : memref<1x32xf32, #tpu.memory_space<vmem>>, vector<1x32xf32>
    %4 = vector.broadcast %3 : vector<1x32xf32> to vector<16x32xf32>
    %5 = arith.addf %2, %4 : vector<16x32xf32>
    %cst_5 = arith.constant 0.000000e+00 : f32
    %6 = vector.broadcast %cst_5 : f32 to vector<16x32xf32>
    %7 = arith.maximumf %5, %6 : vector<16x32xf32>
    %c0_6 = arith.constant 0 : index
    %c0_7 = arith.constant 0 : index
    %8 = vector.load %arg1[%c0_6, %c0_7] : memref<15x8xf32, #tpu.memory_space<vmem>>, vector<15x8xf32>
    %c0_8 = arith.constant 0 : index
    %c0_9 = arith.constant 0 : index
    %9 = vector.load %arg17[%c0_8, %c0_9] : memref<8x32xf32, #tpu.memory_space<vmem>>, vector<8x32xf32>
    %cst_10 = arith.constant dense<0.000000e+00> : vector<15x32xf32>
    %10 = tpu.matmul %8, %9, %cst_10 {dimension_numbers = #tpu.dot_dimension_numbers<[1], [0], [0], [1], [0, 0, 1, 1], [], []>} : vector<15x8xf32>, vector<8x32xf32>, vector<15x32xf32> -> vector<15x32xf32>
    %c0_11 = arith.constant 0 : index
    %c0_12 = arith.constant 0 : index
    %11 = vector.load %arg18[%c0_11, %c0_12] : memref<1x32xf32, #tpu.memory_space<vmem>>, vector<1x32xf32>
    %12 = vector.broadcast %11 : vector<1x32xf32> to vector<15x32xf32>
    %13 = arith.addf %10, %12 : vector<15x32xf32>
    %cst_13 = arith.constant 0.000000e+00 : f32
    %14 = vector.broadcast %cst_13 : f32 to vector<15x32xf32>
    %15 = arith.maximumf %13, %14 : vector<15x32xf32>
    %c0_14 = arith.constant 0 : index
    %c0_15 = arith.constant 0 : index
    %16 = vector.load %arg2[%c0_14, %c0_15] : memref<16x16xf32, #tpu.memory_space<vmem>>, vector<16x16xf32>
    %c0_16 = arith.constant 0 : index
    %c0_17 = arith.constant 0 : index
    %17 = vector.load %arg3[%c0_16, %c0_17] : memref<16x15xf32, #tpu.memory_space<vmem>>, vector<16x15xf32>
    %cst_18 = arith.constant dense<0.000000e+00> : vector<16x32xf32>
    %18 = tpu.matmul %16, %7, %cst_18 {dimension_numbers = #tpu.dot_dimension_numbers<[1], [0], [0], [1], [0, 0, 1, 1], [], []>} : vector<16x16xf32>, vector<16x32xf32>, vector<16x32xf32> -> vector<16x32xf32>
    %cst_19 = arith.constant dense<0.000000e+00> : vector<16x32xf32>
    %19 = tpu.matmul %17, %15, %cst_19 {dimension_numbers = #tpu.dot_dimension_numbers<[1], [0], [0], [1], [0, 0, 1, 1], [], []>} : vector<16x15xf32>, vector<15x32xf32>, vector<16x32xf32> -> vector<16x32xf32>
    %20 = arith.addf %18, %19 : vector<16x32xf32>
    %cst_20 = arith.constant 1.100000e+00 : f32
    %21 = vector.broadcast %cst_20 : f32 to vector<16x32xf32>
    %22 = arith.mulf %21, %7 : vector<16x32xf32>
    %23 = arith.addf %22, %20 : vector<16x32xf32>
    %c0_21 = arith.constant 0 : index
    %c0_22 = arith.constant 0 : index
    %24 = vector.load %arg19[%c0_21, %c0_22] : memref<32x32xf32, #tpu.memory_space<vmem>>, vector<32x32xf32>
    %c0_23 = arith.constant 0 : index
    %c0_24 = arith.constant 0 : index
    %25 = vector.load %arg20[%c0_23, %c0_24] : memref<1x32xf32, #tpu.memory_space<vmem>>, vector<1x32xf32>
    %c0_25 = arith.constant 0 : index
    %c0_26 = arith.constant 0 : index
    %26 = vector.load %arg21[%c0_25, %c0_26] : memref<32x32xf32, #tpu.memory_space<vmem>>, vector<32x32xf32>
    %c0_27 = arith.constant 0 : index
    %c0_28 = arith.constant 0 : index
    %27 = vector.load %arg22[%c0_27, %c0_28] : memref<1x32xf32, #tpu.memory_space<vmem>>, vector<1x32xf32>
    %cst_29 = arith.constant dense<0.000000e+00> : vector<16x32xf32>
    %28 = tpu.matmul %23, %24, %cst_29 {dimension_numbers = #tpu.dot_dimension_numbers<[1], [0], [0], [1], [0, 0, 1, 1], [], []>} : vector<16x32xf32>, vector<32x32xf32>, vector<16x32xf32> -> vector<16x32xf32>
    %29 = vector.broadcast %25 : vector<1x32xf32> to vector<16x32xf32>
    %30 = arith.addf %28, %29 : vector<16x32xf32>
    %cst_30 = arith.constant 0.000000e+00 : f32
    %31 = vector.broadcast %cst_30 : f32 to vector<16x32xf32>
    %32 = arith.maximumf %30, %31 : vector<16x32xf32>
    %cst_31 = arith.constant dense<0.000000e+00> : vector<16x32xf32>
    %33 = tpu.matmul %32, %26, %cst_31 {dimension_numbers = #tpu.dot_dimension_numbers<[1], [0], [0], [1], [0, 0, 1, 1], [], []>} : vector<16x32xf32>, vector<32x32xf32>, vector<16x32xf32> -> vector<16x32xf32>
    %34 = vector.broadcast %27 : vector<1x32xf32> to vector<16x32xf32>
    %35 = arith.addf %33, %34 : vector<16x32xf32>
    %cst_32 = arith.constant dense<0.000000e+00> : vector<15x32xf32>
    %36 = tpu.matmul %17, %7, %cst_32 {dimension_numbers = #tpu.dot_dimension_numbers<[0], [0], [1], [1], [0, 1, 1, 1], [], []>} : vector<16x15xf32>, vector<16x32xf32>, vector<15x32xf32> -> vector<15x32xf32>
    %37 = arith.addf %15, %36 : vector<15x32xf32>
    %c0_33 = arith.constant 0 : index
    %c0_34 = arith.constant 0 : index
    %38 = vector.load %arg23[%c0_33, %c0_34] : memref<32x32xf32, #tpu.memory_space<vmem>>, vector<32x32xf32>
    %c0_35 = arith.constant 0 : index
    %c0_36 = arith.constant 0 : index
    %39 = vector.load %arg24[%c0_35, %c0_36] : memref<1x32xf32, #tpu.memory_space<vmem>>, vector<1x32xf32>
    %c0_37 = arith.constant 0 : index
    %c0_38 = arith.constant 0 : index
    %40 = vector.load %arg25[%c0_37, %c0_38] : memref<32x32xf32, #tpu.memory_space<vmem>>, vector<32x32xf32>
    %c0_39 = arith.constant 0 : index
    %c0_40 = arith.constant 0 : index
    %41 = vector.load %arg26[%c0_39, %c0_40] : memref<1x32xf32, #tpu.memory_space<vmem>>, vector<1x32xf32>
    %cst_41 = arith.constant dense<0.000000e+00> : vector<15x32xf32>
    %42 = tpu.matmul %37, %38, %cst_41 {dimension_numbers = #tpu.dot_dimension_numbers<[1], [0], [0], [1], [0, 0, 1, 1], [], []>} : vector<15x32xf32>, vector<32x32xf32>, vector<15x32xf32> -> vector<15x32xf32>
    %43 = vector.broadcast %39 : vector<1x32xf32> to vector<15x32xf32>
    %44 = arith.addf %42, %43 : vector<15x32xf32>
    %cst_42 = arith.constant 0.000000e+00 : f32
    %45 = vector.broadcast %cst_42 : f32 to vector<15x32xf32>
    %46 = arith.maximumf %44, %45 : vector<15x32xf32>
    %cst_43 = arith.constant dense<0.000000e+00> : vector<15x32xf32>
    %47 = tpu.matmul %46, %40, %cst_43 {dimension_numbers = #tpu.dot_dimension_numbers<[1], [0], [0], [1], [0, 0, 1, 1], [], []>} : vector<15x32xf32>, vector<32x32xf32>, vector<15x32xf32> -> vector<15x32xf32>
    %48 = vector.broadcast %41 : vector<1x32xf32> to vector<15x32xf32>
    %49 = arith.addf %47, %48 : vector<15x32xf32>
    %cst_44 = arith.constant dense<0.000000e+00> : vector<16x32xf32>
    %50 = tpu.matmul %16, %35, %cst_44 {dimension_numbers = #tpu.dot_dimension_numbers<[1], [0], [0], [1], [0, 0, 1, 1], [], []>} : vector<16x16xf32>, vector<16x32xf32>, vector<16x32xf32> -> vector<16x32xf32>
    %cst_45 = arith.constant dense<0.000000e+00> : vector<16x32xf32>
    %51 = tpu.matmul %17, %49, %cst_45 {dimension_numbers = #tpu.dot_dimension_numbers<[1], [0], [0], [1], [0, 0, 1, 1], [], []>} : vector<16x15xf32>, vector<15x32xf32>, vector<16x32xf32> -> vector<16x32xf32>
    %52 = arith.addf %50, %51 : vector<16x32xf32>
    %cst_46 = arith.constant 1.100000e+00 : f32
    %53 = vector.broadcast %cst_46 : f32 to vector<16x32xf32>
    %54 = arith.mulf %53, %35 : vector<16x32xf32>
    %55 = arith.addf %54, %52 : vector<16x32xf32>
    %c0_47 = arith.constant 0 : index
    %c0_48 = arith.constant 0 : index
    %56 = vector.load %arg27[%c0_47, %c0_48] : memref<32x32xf32, #tpu.memory_space<vmem>>, vector<32x32xf32>
    %c0_49 = arith.constant 0 : index
    %c0_50 = arith.constant 0 : index
    %57 = vector.load %arg28[%c0_49, %c0_50] : memref<1x32xf32, #tpu.memory_space<vmem>>, vector<1x32xf32>
    %c0_51 = arith.constant 0 : index
    %c0_52 = arith.constant 0 : index
    %58 = vector.load %arg29[%c0_51, %c0_52] : memref<32x32xf32, #tpu.memory_space<vmem>>, vector<32x32xf32>
    %c0_53 = arith.constant 0 : index
    %c0_54 = arith.constant 0 : index
    %59 = vector.load %arg30[%c0_53, %c0_54] : memref<1x32xf32, #tpu.memory_space<vmem>>, vector<1x32xf32>
    %cst_55 = arith.constant dense<0.000000e+00> : vector<16x32xf32>
    %60 = tpu.matmul %55, %56, %cst_55 {dimension_numbers = #tpu.dot_dimension_numbers<[1], [0], [0], [1], [0, 0, 1, 1], [], []>} : vector<16x32xf32>, vector<32x32xf32>, vector<16x32xf32> -> vector<16x32xf32>
    %61 = vector.broadcast %57 : vector<1x32xf32> to vector<16x32xf32>
    %62 = arith.addf %60, %61 : vector<16x32xf32>
    %cst_56 = arith.constant 0.000000e+00 : f32
    %63 = vector.broadcast %cst_56 : f32 to vector<16x32xf32>
    %64 = arith.maximumf %62, %63 : vector<16x32xf32>
    %cst_57 = arith.constant dense<0.000000e+00> : vector<16x32xf32>
    %65 = tpu.matmul %64, %58, %cst_57 {dimension_numbers = #tpu.dot_dimension_numbers<[1], [0], [0], [1], [0, 0, 1, 1], [], []>} : vector<16x32xf32>, vector<32x32xf32>, vector<16x32xf32> -> vector<16x32xf32>
    %66 = vector.broadcast %59 : vector<1x32xf32> to vector<16x32xf32>
    %67 = arith.addf %65, %66 : vector<16x32xf32>
    %c0_58 = arith.constant 0 : index
    %c0_59 = arith.constant 0 : index
    %68 = vector.load %arg35[%c0_58, %c0_59] : memref<32x32xf32, #tpu.memory_space<vmem>>, vector<32x32xf32>
    %c0_60 = arith.constant 0 : index
    %c0_61 = arith.constant 0 : index
    %69 = vector.load %arg36[%c0_60, %c0_61] : memref<1x32xf32, #tpu.memory_space<vmem>>, vector<1x32xf32>
    %c0_62 = arith.constant 0 : index
    %c0_63 = arith.constant 0 : index
    %70 = vector.load %arg37[%c0_62, %c0_63] : memref<32x128xf32, #tpu.memory_space<vmem>>, vector<32x128xf32>
    %c0_64 = arith.constant 0 : index
    %c0_65 = arith.constant 0 : index
    %71 = vector.load %arg38[%c0_64, %c0_65] : memref<1x128xf32, #tpu.memory_space<vmem>>, vector<1x128xf32>
    %cst_66 = arith.constant dense<0.000000e+00> : vector<16x32xf32>
    %72 = tpu.matmul %67, %68, %cst_66 {dimension_numbers = #tpu.dot_dimension_numbers<[1], [0], [0], [1], [0, 0, 1, 1], [], []>} : vector<16x32xf32>, vector<32x32xf32>, vector<16x32xf32> -> vector<16x32xf32>
    %73 = vector.broadcast %69 : vector<1x32xf32> to vector<16x32xf32>
    %74 = arith.addf %72, %73 : vector<16x32xf32>
    %cst_67 = arith.constant 0.000000e+00 : f32
    %75 = vector.broadcast %cst_67 : f32 to vector<16x32xf32>
    %76 = arith.maximumf %74, %75 : vector<16x32xf32>
    %cst_68 = arith.constant dense<0.000000e+00> : vector<16x128xf32>
    %77 = tpu.matmul %76, %70, %cst_68 {dimension_numbers = #tpu.dot_dimension_numbers<[1], [0], [0], [1], [0, 0, 1, 1], [], []>} : vector<16x32xf32>, vector<32x128xf32>, vector<16x128xf32> -> vector<16x128xf32>
    %78 = vector.broadcast %71 : vector<1x128xf32> to vector<16x128xf32>
    %79 = arith.addf %77, %78 : vector<16x128xf32>
    %c0_69 = arith.constant 0 : index
    %c0_70 = arith.constant 0 : index
    %80 = vector.load %arg9[%c0_69, %c0_70] : memref<1x128xf32, #tpu.memory_space<vmem>>, vector<1x128xf32>
    %81 = vector.broadcast %80 : vector<1x128xf32> to vector<16x128xf32>
    %82 = arith.maximumf %79, %81 : vector<16x128xf32>
    %c0_71 = arith.constant 0 : index
    %c0_72 = arith.constant 0 : index
    %83 = vector.load %arg10[%c0_71, %c0_72] : memref<1x128xf32, #tpu.memory_space<vmem>>, vector<1x128xf32>
    %84 = vector.broadcast %83 : vector<1x128xf32> to vector<16x128xf32>
    %85 = arith.minimumf %82, %84 : vector<16x128xf32>
    %c0_73 = arith.constant 0 : index
    %c0_74 = arith.constant 0 : index
    %86 = vector.load %arg55[%c0_73, %c0_74] : memref<16x128xf32, #tpu.memory_space<vmem>>, vector<16x128xf32>
    tpu.vector_store %arg55[%c0_73, %c0_74], %85 {strides = array<i32>} : memref<16x128xf32, #tpu.memory_space<vmem>>, vector<16x128xf32>,
    %c0_75 = arith.constant 0 : index
    %c0_76 = arith.constant 0 : index
    %87 = vector.load %arg39[%c0_75, %c0_76] : memref<64x32xf32, #tpu.memory_space<vmem>>, vector<64x32xf32>
    %c0_77 = arith.constant 0 : index
    %c0_78 = arith.constant 0 : index
    %88 = vector.load %arg40[%c0_77, %c0_78] : memref<1x32xf32, #tpu.memory_space<vmem>>, vector<1x32xf32>
    %c0_79 = arith.constant 0 : index
    %c0_80 = arith.constant 0 : index
    %89 = vector.load %arg41[%c0_79, %c0_80] : memref<32x128xf32, #tpu.memory_space<vmem>>, vector<32x128xf32>
    %c0_81 = arith.constant 0 : index
    %c0_82 = arith.constant 0 : index
    %90 = vector.load %arg42[%c0_81, %c0_82] : memref<1x128xf32, #tpu.memory_space<vmem>>, vector<1x128xf32>
    %c0_83 = arith.constant 0 : index
    %c0_84 = arith.constant 0 : index
    %c0_85 = arith.constant 0 : index
    %91 = vector.load %arg4[%c0_83, %c0_84, %c0_85] : memref<2x16x16xf32, #tpu.memory_space<vmem>>, vector<1x16x16xf32>
    %92 = vector.shape_cast %91 : vector<1x16x16xf32> to vector<16x16xf32>
    %cst_86 = arith.constant dense<0.000000e+00> : vector<16x32xf32>
    %93 = tpu.matmul %92, %67, %cst_86 {dimension_numbers = #tpu.dot_dimension_numbers<[1], [0], [0], [1], [0, 0, 1, 1], [], []>} : vector<16x16xf32>, vector<16x32xf32>, vector<16x32xf32> -> vector<16x32xf32>
    %c1 = arith.constant 1 : index
    %c0_87 = arith.constant 0 : index
    %c0_88 = arith.constant 0 : index
    %94 = vector.load %arg4[%c1, %c0_87, %c0_88] : memref<2x16x16xf32, #tpu.memory_space<vmem>>, vector<1x16x16xf32>
    %95 = vector.shape_cast %94 : vector<1x16x16xf32> to vector<16x16xf32>
    %cst_89 = arith.constant dense<0.000000e+00> : vector<16x32xf32>
    %96 = tpu.matmul %95, %67, %cst_89 {dimension_numbers = #tpu.dot_dimension_numbers<[1], [0], [0], [1], [0, 0, 1, 1], [], []>} : vector<16x16xf32>, vector<16x32xf32>, vector<16x32xf32> -> vector<16x32xf32>
    %97 = tpu.concatenate %93, %96 in 1 : vector<16x32xf32>, vector<16x32xf32> -> vector<16x64xf32>
    %98 = tpu.concatenate %96, %93 in 1 : vector<16x32xf32>, vector<16x32xf32> -> vector<16x64xf32>
    %99 = tpu.concatenate %97, %98 in 0 : vector<16x64xf32>, vector<16x64xf32> -> vector<32x64xf32>
    %cst_90 = arith.constant dense<0.000000e+00> : vector<32x32xf32>
    %100 = tpu.matmul %99, %87, %cst_90 {dimension_numbers = #tpu.dot_dimension_numbers<[1], [0], [0], [1], [0, 0, 1, 1], [], []>} : vector<32x64xf32>, vector<64x32xf32>, vector<32x32xf32> -> vector<32x32xf32>
    %101 = vector.broadcast %88 : vector<1x32xf32> to vector<32x32xf32>
    %102 = arith.addf %100, %101 : vector<32x32xf32>
    %cst_91 = arith.constant 0.000000e+00 : f32
    %103 = vector.broadcast %cst_91 : f32 to vector<32x32xf32>
    %104 = arith.maximumf %102, %103 : vector<32x32xf32>
    %cst_92 = arith.constant dense<0.000000e+00> : vector<32x128xf32>
    %105 = tpu.matmul %104, %89, %cst_92 {dimension_numbers = #tpu.dot_dimension_numbers<[1], [0], [0], [1], [0, 0, 1, 1], [], []>} : vector<32x32xf32>, vector<32x128xf32>, vector<32x128xf32> -> vector<32x128xf32>
    %106 = vector.broadcast %90 : vector<1x128xf32> to vector<32x128xf32>
    %107 = arith.addf %105, %106 : vector<32x128xf32>
    %108 = vector.extract_strided_slice %107 {offsets = [0, 0], sizes = [16, 128], strides = [1, 1]} : vector<32x128xf32> to vector<16x128xf32>
    %109 = vector.extract_strided_slice %107 {offsets = [16, 0], sizes = [16, 128], strides = [1, 1]} : vector<32x128xf32> to vector<16x128xf32>
    %110 = arith.addf %108, %109 : vector<16x128xf32>
    %c0_93 = arith.constant 0 : index
    %c0_94 = arith.constant 0 : index
    %111 = vector.load %arg11[%c0_93, %c0_94] : memref<1x128xf32, #tpu.memory_space<vmem>>, vector<1x128xf32>
    %112 = vector.broadcast %111 : vector<1x128xf32> to vector<16x128xf32>
    %113 = arith.maximumf %110, %112 : vector<16x128xf32>
    %c0_95 = arith.constant 0 : index
    %c0_96 = arith.constant 0 : index
    %114 = vector.load %arg12[%c0_95, %c0_96] : memref<1x128xf32, #tpu.memory_space<vmem>>, vector<1x128xf32>
    %115 = vector.broadcast %114 : vector<1x128xf32> to vector<16x128xf32>
    %116 = arith.minimumf %113, %115 : vector<16x128xf32>
    %c0_97 = arith.constant 0 : index
    %c0_98 = arith.constant 0 : index
    %117 = vector.load %arg56[%c0_97, %c0_98] : memref<16x128xf32, #tpu.memory_space<vmem>>, vector<16x128xf32>
    tpu.vector_store %arg56[%c0_97, %c0_98], %116 {strides = array<i32>} : memref<16x128xf32, #tpu.memory_space<vmem>>, vector<16x128xf32>,
    %c0_99 = arith.constant 0 : index
    %c0_100 = arith.constant 0 : index
    %118 = vector.load %arg43[%c0_99, %c0_100] : memref<96x32xf32, #tpu.memory_space<vmem>>, vector<96x32xf32>
    %c0_101 = arith.constant 0 : index
    %c0_102 = arith.constant 0 : index
    %119 = vector.load %arg44[%c0_101, %c0_102] : memref<1x32xf32, #tpu.memory_space<vmem>>, vector<1x32xf32>
    %c0_103 = arith.constant 0 : index
    %c0_104 = arith.constant 0 : index
    %120 = vector.load %arg45[%c0_103, %c0_104] : memref<32x128xf32, #tpu.memory_space<vmem>>, vector<32x128xf32>
    %c0_105 = arith.constant 0 : index
    %c0_106 = arith.constant 0 : index
    %121 = vector.load %arg46[%c0_105, %c0_106] : memref<1x128xf32, #tpu.memory_space<vmem>>, vector<1x128xf32>
    %c0_107 = arith.constant 0 : index
    %c0_108 = arith.constant 0 : index
    %c0_109 = arith.constant 0 : index
    %122 = vector.load %arg5[%c0_107, %c0_108, %c0_109] : memref<3x16x16xf32, #tpu.memory_space<vmem>>, vector<1x16x16xf32>
    %123 = vector.shape_cast %122 : vector<1x16x16xf32> to vector<16x16xf32>
    %cst_110 = arith.constant dense<0.000000e+00> : vector<16x32xf32>
    %124 = tpu.matmul %123, %67, %cst_110 {dimension_numbers = #tpu.dot_dimension_numbers<[1], [0], [0], [1], [0, 0, 1, 1], [], []>} : vector<16x16xf32>, vector<16x32xf32>, vector<16x32xf32> -> vector<16x32xf32>
    %c1_111 = arith.constant 1 : index
    %c0_112 = arith.constant 0 : index
    %c0_113 = arith.constant 0 : index
    %125 = vector.load %arg5[%c1_111, %c0_112, %c0_113] : memref<3x16x16xf32, #tpu.memory_space<vmem>>, vector<1x16x16xf32>
    %126 = vector.shape_cast %125 : vector<1x16x16xf32> to vector<16x16xf32>
    %cst_114 = arith.constant dense<0.000000e+00> : vector<16x32xf32>
    %127 = tpu.matmul %126, %67, %cst_114 {dimension_numbers = #tpu.dot_dimension_numbers<[1], [0], [0], [1], [0, 0, 1, 1], [], []>} : vector<16x16xf32>, vector<16x32xf32>, vector<16x32xf32> -> vector<16x32xf32>
    %c2 = arith.constant 2 : index
    %c0_115 = arith.constant 0 : index
    %c0_116 = arith.constant 0 : index
    %128 = vector.load %arg5[%c2, %c0_115, %c0_116] : memref<3x16x16xf32, #tpu.memory_space<vmem>>, vector<1x16x16xf32>
    %129 = vector.shape_cast %128 : vector<1x16x16xf32> to vector<16x16xf32>
    %cst_117 = arith.constant dense<0.000000e+00> : vector<16x32xf32>
    %130 = tpu.matmul %129, %67, %cst_117 {dimension_numbers = #tpu.dot_dimension_numbers<[1], [0], [0], [1], [0, 0, 1, 1], [], []>} : vector<16x16xf32>, vector<16x32xf32>, vector<16x32xf32> -> vector<16x32xf32>
    %131 = tpu.concatenate %124, %127, %130 in 1 : vector<16x32xf32>, vector<16x32xf32>, vector<16x32xf32> -> vector<16x96xf32>
    %132 = tpu.concatenate %130, %127, %124 in 1 : vector<16x32xf32>, vector<16x32xf32>, vector<16x32xf32> -> vector<16x96xf32>
    %133 = tpu.concatenate %131, %132 in 0 : vector<16x96xf32>, vector<16x96xf32> -> vector<32x96xf32>
    %cst_118 = arith.constant dense<0.000000e+00> : vector<32x32xf32>
    %134 = tpu.matmul %133, %118, %cst_118 {dimension_numbers = #tpu.dot_dimension_numbers<[1], [0], [0], [1], [0, 0, 1, 1], [], []>} : vector<32x96xf32>, vector<96x32xf32>, vector<32x32xf32> -> vector<32x32xf32>
    %135 = vector.broadcast %119 : vector<1x32xf32> to vector<32x32xf32>
    %136 = arith.addf %134, %135 : vector<32x32xf32>
    %cst_119 = arith.constant 0.000000e+00 : f32
    %137 = vector.broadcast %cst_119 : f32 to vector<32x32xf32>
    %138 = arith.maximumf %136, %137 : vector<32x32xf32>
    %cst_120 = arith.constant dense<0.000000e+00> : vector<32x128xf32>
    %139 = tpu.matmul %138, %120, %cst_120 {dimension_numbers = #tpu.dot_dimension_numbers<[1], [0], [0], [1], [0, 0, 1, 1], [], []>} : vector<32x32xf32>, vector<32x128xf32>, vector<32x128xf32> -> vector<32x128xf32>
    %140 = vector.broadcast %121 : vector<1x128xf32> to vector<32x128xf32>
    %141 = arith.addf %139, %140 : vector<32x128xf32>
    %142 = vector.extract_strided_slice %141 {offsets = [0, 0], sizes = [16, 128], strides = [1, 1]} : vector<32x128xf32> to vector<16x128xf32>
    %143 = vector.extract_strided_slice %141 {offsets = [16, 0], sizes = [16, 128], strides = [1, 1]} : vector<32x128xf32> to vector<16x128xf32>
    %144 = arith.addf %142, %143 : vector<16x128xf32>
    %c0_121 = arith.constant 0 : index
    %c0_122 = arith.constant 0 : index
    %145 = vector.load %arg13[%c0_121, %c0_122] : memref<1x128xf32, #tpu.memory_space<vmem>>, vector<1x128xf32>
    %146 = vector.broadcast %145 : vector<1x128xf32> to vector<16x128xf32>
    %147 = arith.maximumf %144, %146 : vector<16x128xf32>
    %c0_123 = arith.constant 0 : index
    %c0_124 = arith.constant 0 : index
    %148 = vector.load %arg14[%c0_123, %c0_124] : memref<1x128xf32, #tpu.memory_space<vmem>>, vector<1x128xf32>
    %149 = vector.broadcast %148 : vector<1x128xf32> to vector<16x128xf32>
    %150 = arith.minimumf %147, %149 : vector<16x128xf32>
    %c0_125 = arith.constant 0 : index
    %c0_126 = arith.constant 0 : index
    %151 = vector.load %arg57[%c0_125, %c0_126] : memref<16x128xf32, #tpu.memory_space<vmem>>, vector<16x128xf32>
    tpu.vector_store %arg57[%c0_125, %c0_126], %150 {strides = array<i32>} : memref<16x128xf32, #tpu.memory_space<vmem>>, vector<16x128xf32>,
    %c0_127 = arith.constant 0 : index
    %c0_128 = arith.constant 0 : index
    %152 = vector.load %arg47[%c0_127, %c0_128] : memref<128x32xf32, #tpu.memory_space<vmem>>, vector<128x32xf32>
    %c0_129 = arith.constant 0 : index
    %c0_130 = arith.constant 0 : index
    %153 = vector.load %arg48[%c0_129, %c0_130] : memref<1x32xf32, #tpu.memory_space<vmem>>, vector<1x32xf32>
    %c0_131 = arith.constant 0 : index
    %c0_132 = arith.constant 0 : index
    %154 = vector.load %arg49[%c0_131, %c0_132] : memref<32x128xf32, #tpu.memory_space<vmem>>, vector<32x128xf32>
    %c0_133 = arith.constant 0 : index
    %c0_134 = arith.constant 0 : index
    %155 = vector.load %arg50[%c0_133, %c0_134] : memref<1x128xf32, #tpu.memory_space<vmem>>, vector<1x128xf32>
    %c0_135 = arith.constant 0 : index
    %c0_136 = arith.constant 0 : index
    %c0_137 = arith.constant 0 : index
    %156 = vector.load %arg6[%c0_135, %c0_136, %c0_137] : memref<4x16x16xf32, #tpu.memory_space<vmem>>, vector<1x16x16xf32>
    %157 = vector.shape_cast %156 : vector<1x16x16xf32> to vector<16x16xf32>
    %cst_138 = arith.constant dense<0.000000e+00> : vector<16x32xf32>
    %158 = tpu.matmul %157, %67, %cst_138 {dimension_numbers = #tpu.dot_dimension_numbers<[1], [0], [0], [1], [0, 0, 1, 1], [], []>} : vector<16x16xf32>, vector<16x32xf32>, vector<16x32xf32> -> vector<16x32xf32>
    %c1_139 = arith.constant 1 : index
    %c0_140 = arith.constant 0 : index
    %c0_141 = arith.constant 0 : index
    %159 = vector.load %arg6[%c1_139, %c0_140, %c0_141] : memref<4x16x16xf32, #tpu.memory_space<vmem>>, vector<1x16x16xf32>
    %160 = vector.shape_cast %159 : vector<1x16x16xf32> to vector<16x16xf32>
    %cst_142 = arith.constant dense<0.000000e+00> : vector<16x32xf32>
    %161 = tpu.matmul %160, %67, %cst_142 {dimension_numbers = #tpu.dot_dimension_numbers<[1], [0], [0], [1], [0, 0, 1, 1], [], []>} : vector<16x16xf32>, vector<16x32xf32>, vector<16x32xf32> -> vector<16x32xf32>
    %c2_143 = arith.constant 2 : index
    %c0_144 = arith.constant 0 : index
    %c0_145 = arith.constant 0 : index
    %162 = vector.load %arg6[%c2_143, %c0_144, %c0_145] : memref<4x16x16xf32, #tpu.memory_space<vmem>>, vector<1x16x16xf32>
    %163 = vector.shape_cast %162 : vector<1x16x16xf32> to vector<16x16xf32>
    %cst_146 = arith.constant dense<0.000000e+00> : vector<16x32xf32>
    %164 = tpu.matmul %163, %67, %cst_146 {dimension_numbers = #tpu.dot_dimension_numbers<[1], [0], [0], [1], [0, 0, 1, 1], [], []>} : vector<16x16xf32>, vector<16x32xf32>, vector<16x32xf32> -> vector<16x32xf32>
    %c3 = arith.constant 3 : index
    %c0_147 = arith.constant 0 : index
    %c0_148 = arith.constant 0 : index
    %165 = vector.load %arg6[%c3, %c0_147, %c0_148] : memref<4x16x16xf32, #tpu.memory_space<vmem>>, vector<1x16x16xf32>
    %166 = vector.shape_cast %165 : vector<1x16x16xf32> to vector<16x16xf32>
    %cst_149 = arith.constant dense<0.000000e+00> : vector<16x32xf32>
    %167 = tpu.matmul %166, %67, %cst_149 {dimension_numbers = #tpu.dot_dimension_numbers<[1], [0], [0], [1], [0, 0, 1, 1], [], []>} : vector<16x16xf32>, vector<16x32xf32>, vector<16x32xf32> -> vector<16x32xf32>
    %168 = tpu.concatenate %158, %161, %164, %167 in 1 : vector<16x32xf32>, vector<16x32xf32>, vector<16x32xf32>, vector<16x32xf32> -> vector<16x128xf32>
    %169 = tpu.concatenate %167, %164, %161, %158 in 1 : vector<16x32xf32>, vector<16x32xf32>, vector<16x32xf32>, vector<16x32xf32> -> vector<16x128xf32>
    %170 = tpu.concatenate %168, %169 in 0 : vector<16x128xf32>, vector<16x128xf32> -> vector<32x128xf32>
    %cst_150 = arith.constant dense<0.000000e+00> : vector<32x32xf32>
    %171 = tpu.matmul %170, %152, %cst_150 {dimension_numbers = #tpu.dot_dimension_numbers<[1], [0], [0], [1], [0, 0, 1, 1], [], []>} : vector<32x128xf32>, vector<128x32xf32>, vector<32x32xf32> -> vector<32x32xf32>
    %172 = vector.broadcast %153 : vector<1x32xf32> to vector<32x32xf32>
    %173 = arith.addf %171, %172 : vector<32x32xf32>
    %cst_151 = arith.constant 0.000000e+00 : f32
    %174 = vector.broadcast %cst_151 : f32 to vector<32x32xf32>
    %175 = arith.maximumf %173, %174 : vector<32x32xf32>
    %cst_152 = arith.constant dense<0.000000e+00> : vector<32x128xf32>
    %176 = tpu.matmul %175, %154, %cst_152 {dimension_numbers = #tpu.dot_dimension_numbers<[1], [0], [0], [1], [0, 0, 1, 1], [], []>} : vector<32x32xf32>, vector<32x128xf32>, vector<32x128xf32> -> vector<32x128xf32>
    %177 = vector.broadcast %155 : vector<1x128xf32> to vector<32x128xf32>
    %178 = arith.addf %176, %177 : vector<32x128xf32>
    %179 = vector.extract_strided_slice %178 {offsets = [0, 0], sizes = [16, 128], strides = [1, 1]} : vector<32x128xf32> to vector<16x128xf32>
    %180 = vector.extract_strided_slice %178 {offsets = [16, 0], sizes = [16, 128], strides = [1, 1]} : vector<32x128xf32> to vector<16x128xf32>
    %181 = arith.addf %179, %180 : vector<16x128xf32>
    %cst_153 = arith.constant -2.000000e+01 : f32
    %182 = vector.broadcast %cst_153 : f32 to vector<16x128xf32>
    %183 = arith.maximumf %181, %182 : vector<16x128xf32>
    %cst_154 = arith.constant 2.000000e+01 : f32
    %184 = vector.broadcast %cst_154 : f32 to vector<16x128xf32>
    %185 = arith.minimumf %183, %184 : vector<16x128xf32>
    %c0_155 = arith.constant 0 : index
    %c0_156 = arith.constant 0 : index
    %186 = vector.load %arg8[%c0_155, %c0_156] : memref<16x1xf32, #tpu.memory_space<vmem>>, vector<16x1xf32>
    %187 = vector.broadcast %186 : vector<16x1xf32> to vector<16x128xf32>
    %188 = arith.mulf %185, %187 : vector<16x128xf32>
    %c0_157 = arith.constant 0 : index
    %c0_158 = arith.constant 0 : index
    %189 = vector.load %arg58[%c0_157, %c0_158] : memref<16x128xf32, #tpu.memory_space<vmem>>, vector<16x128xf32>
    tpu.vector_store %arg58[%c0_157, %c0_158], %188 {strides = array<i32>} : memref<16x128xf32, #tpu.memory_space<vmem>>, vector<16x128xf32>,
    %c0_159 = arith.constant 0 : index
    %c0_160 = arith.constant 0 : index
    %190 = vector.load %arg51[%c0_159, %c0_160] : memref<128x32xf32, #tpu.memory_space<vmem>>, vector<128x32xf32>
    %c0_161 = arith.constant 0 : index
    %c0_162 = arith.constant 0 : index
    %191 = vector.load %arg52[%c0_161, %c0_162] : memref<1x32xf32, #tpu.memory_space<vmem>>, vector<1x32xf32>
    %c0_163 = arith.constant 0 : index
    %c0_164 = arith.constant 0 : index
    %192 = vector.load %arg53[%c0_163, %c0_164] : memref<32x128xf32, #tpu.memory_space<vmem>>, vector<32x128xf32>
    %c0_165 = arith.constant 0 : index
    %c0_166 = arith.constant 0 : index
    %193 = vector.load %arg54[%c0_165, %c0_166] : memref<1x128xf32, #tpu.memory_space<vmem>>, vector<1x128xf32>
    %c0_167 = arith.constant 0 : index
    %c0_168 = arith.constant 0 : index
    %c0_169 = arith.constant 0 : index
    %194 = vector.load %arg7[%c0_167, %c0_168, %c0_169] : memref<4x8x16xf32, #tpu.memory_space<vmem>>, vector<1x8x16xf32>
    %195 = vector.shape_cast %194 : vector<1x8x16xf32> to vector<8x16xf32>
    %cst_170 = arith.constant dense<0.000000e+00> : vector<8x32xf32>
    %196 = tpu.matmul %195, %67, %cst_170 {dimension_numbers = #tpu.dot_dimension_numbers<[1], [0], [0], [1], [0, 0, 1, 1], [], []>} : vector<8x16xf32>, vector<16x32xf32>, vector<8x32xf32> -> vector<8x32xf32>
    %c1_171 = arith.constant 1 : index
    %c0_172 = arith.constant 0 : index
    %c0_173 = arith.constant 0 : index
    %197 = vector.load %arg7[%c1_171, %c0_172, %c0_173] : memref<4x8x16xf32, #tpu.memory_space<vmem>>, vector<1x8x16xf32>
    %198 = vector.shape_cast %197 : vector<1x8x16xf32> to vector<8x16xf32>
    %cst_174 = arith.constant dense<0.000000e+00> : vector<8x32xf32>
    %199 = tpu.matmul %198, %67, %cst_174 {dimension_numbers = #tpu.dot_dimension_numbers<[1], [0], [0], [1], [0, 0, 1, 1], [], []>} : vector<8x16xf32>, vector<16x32xf32>, vector<8x32xf32> -> vector<8x32xf32>
    %c2_175 = arith.constant 2 : index
    %c0_176 = arith.constant 0 : index
    %c0_177 = arith.constant 0 : index
    %200 = vector.load %arg7[%c2_175, %c0_176, %c0_177] : memref<4x8x16xf32, #tpu.memory_space<vmem>>, vector<1x8x16xf32>
    %201 = vector.shape_cast %200 : vector<1x8x16xf32> to vector<8x16xf32>
    %cst_178 = arith.constant dense<0.000000e+00> : vector<8x32xf32>
    %202 = tpu.matmul %201, %67, %cst_178 {dimension_numbers = #tpu.dot_dimension_numbers<[1], [0], [0], [1], [0, 0, 1, 1], [], []>} : vector<8x16xf32>, vector<16x32xf32>, vector<8x32xf32> -> vector<8x32xf32>
    %c3_179 = arith.constant 3 : index
    %c0_180 = arith.constant 0 : index
    %c0_181 = arith.constant 0 : index
    %203 = vector.load %arg7[%c3_179, %c0_180, %c0_181] : memref<4x8x16xf32, #tpu.memory_space<vmem>>, vector<1x8x16xf32>
    %204 = vector.shape_cast %203 : vector<1x8x16xf32> to vector<8x16xf32>
    %cst_182 = arith.constant dense<0.000000e+00> : vector<8x32xf32>
    %205 = tpu.matmul %204, %67, %cst_182 {dimension_numbers = #tpu.dot_dimension_numbers<[1], [0], [0], [1], [0, 0, 1, 1], [], []>} : vector<8x16xf32>, vector<16x32xf32>, vector<8x32xf32> -> vector<8x32xf32>
    %206 = tpu.concatenate %196, %199, %202, %205 in 1 : vector<8x32xf32>, vector<8x32xf32>, vector<8x32xf32>, vector<8x32xf32> -> vector<8x128xf32>
    %207 = tpu.concatenate %196, %205, %202, %199 in 1 : vector<8x32xf32>, vector<8x32xf32>, vector<8x32xf32>, vector<8x32xf32> -> vector<8x128xf32>
    %208 = tpu.concatenate %206, %207 in 0 : vector<8x128xf32>, vector<8x128xf32> -> vector<16x128xf32>
    %cst_183 = arith.constant dense<0.000000e+00> : vector<16x32xf32>
    %209 = tpu.matmul %208, %190, %cst_183 {dimension_numbers = #tpu.dot_dimension_numbers<[1], [0], [0], [1], [0, 0, 1, 1], [], []>} : vector<16x128xf32>, vector<128x32xf32>, vector<16x32xf32> -> vector<16x32xf32>
    %210 = vector.broadcast %191 : vector<1x32xf32> to vector<16x32xf32>
    %211 = arith.addf %209, %210 : vector<16x32xf32>
    %cst_184 = arith.constant 0.000000e+00 : f32
    %212 = vector.broadcast %cst_184 : f32 to vector<16x32xf32>
    %213 = arith.maximumf %211, %212 : vector<16x32xf32>
    %cst_185 = arith.constant dense<0.000000e+00> : vector<16x128xf32>
    %214 = tpu.matmul %213, %192, %cst_185 {dimension_numbers = #tpu.dot_dimension_numbers<[1], [0], [0], [1], [0, 0, 1, 1], [], []>} : vector<16x32xf32>, vector<32x128xf32>, vector<16x128xf32> -> vector<16x128xf32>
    %215 = vector.broadcast %193 : vector<1x128xf32> to vector<16x128xf32>
    %216 = arith.addf %214, %215 : vector<16x128xf32>
    %217 = vector.extract_strided_slice %216 {offsets = [0, 0], sizes = [8, 128], strides = [1, 1]} : vector<16x128xf32> to vector<8x128xf32>
    %218 = vector.extract_strided_slice %216 {offsets = [8, 0], sizes = [8, 128], strides = [1, 1]} : vector<16x128xf32> to vector<8x128xf32>
    %219 = arith.addf %217, %218 : vector<8x128xf32>
    %cst_186 = arith.constant 5.000000e+01 : f32
    %220 = vector.broadcast %cst_186 : f32 to vector<8x128xf32>
    %221 = arith.minimumf %219, %220 : vector<8x128xf32>
    %c0_187 = arith.constant 0 : index
    %c0_188 = arith.constant 0 : index
    %222 = vector.load %arg59[%c0_187, %c0_188] : memref<8x128xf32, #tpu.memory_space<vmem>>, vector<8x128xf32>
    tpu.vector_store %arg59[%c0_187, %c0_188], %221 {strides = array<i32>} : memref<8x128xf32, #tpu.memory_space<vmem>>, vector<8x128xf32>,
    return
  }
}

</mosaic_0001>

<bundles_post_ra>
// kernel: tpu_custom_call.1
= control target key start
LH: loop header
LB: loop body
LE: loop exit
PB: predicated region body
PF: predicated region fallthrough
CT: control target
= control target key end

     0   :  { %s5751_s6 = smov 1   ;;  %s5752_s10 = smov 2   ;;  %s6551_s0 = inlined_call_operand.smem [shape: u32[60], index: -1, kind: input, shape index: {}] }
   0x1   :  { %s5855_s5 = sld [smem:[%s6551_s0]]   ;;  %s5753_s14 = smov 3  }
   0x2   :  { %s5860_s9 = sld [smem:[%s6551_s0 + %s5751_s6]]   ;;  %s5754_s18 = smov 4  }
   0x3   :  { %s5865_s13 = sld [smem:[%s6551_s0 + %s5752_s10]]   ;;  %s5755_s22 = smov 5  }
   0x4   :  { %s5870_s17 = sld [smem:[%s6551_s0 + %s5753_s14]]   ;;  %s5756_s26 = smov 6  }
   0x5   :  { %s5875_s21 = sld [smem:[%s6551_s0 + %s5754_s18]]   ;;  %s5757_s30 = smov 7  }
   0x6   :  { %s5880_s25 = sld [smem:[%s6551_s0 + %s5755_s22]]   ;;  %s5758_s4 = smov 8  }
   0x7   :  { %s5885_s29 = sld [smem:[%s6551_s0 + %s5756_s26]]   ;;  %s5759_s10 = smov 9  }
   0x8   :  { %6571 = sst [smem:[#allocation67_spill]] %s5860_s9  ;;  %s5760_s15 = smov 10  }
   0x9   :  { %s5890_s3 = sld [smem:[%s6551_s0 + %s5757_s30]]   ;;  %s5761_s20 = smov 11  }
   0xa   :  { %s5895_s8 = sld [smem:[%s6551_s0 + %s5758_s4]]   ;;  %s5762_s26 = smov 12  }
   0xb   :  { %6572 = sst [smem:[#allocation68_spill]] %s5875_s21  ;;  %s5763_s1 = smov 13  }
   0xc   :  { %6573 = sst [smem:[#allocation69_spill]] %s5880_s25  ;;  %s5764_s7 = smov 14  }
   0xd   :  { %6574 = sst [smem:[#allocation70_spill]] %s5885_s29  ;;  %s5766_s22 = smov 16  }
   0xe   :  { %s5900_s14 = sld [smem:[%s6551_s0 + %s5759_s10]]   ;;  %s5767_s28 = smov 17  }
   0xf   :  { %6575 = sst [smem:[#allocation71_spill]] %s5890_s3 }
  0x10   :  { %6576 = sst [smem:[#allocation72_spill]] %s5895_s8 }
  0x11   :  { %s5905_s19 = sld [smem:[%s6551_s0 + %s5760_s15]]   ;;  %s5765_s15 = smov 15  }
  0x12   :  { %s5910_s24 = sld [smem:[%s6551_s0 + %s5761_s20]]  }
  0x13   :  { %s5915_s30 = sld [smem:[%s6551_s0 + %s5762_s26]]  }
  0x14   :  { %6577 = sst [smem:[#allocation73_spill]] %s5900_s14 }
  0x15   :  { %s5920_s6 = sld [smem:[%s6551_s0 + %s5763_s1]]  }
  0x16   :  { %s5925_s12 = sld [smem:[%s6551_s0 + %s5764_s7]]   ;;  %s5768_s7 = smov 18  }
  0x17   :  { %6578 = sst [smem:[#allocation74_spill]] %s5905_s19 }
  0x18   :  { %s5930_s20 = sld [smem:[%s6551_s0 + %s5765_s15]]   ;;  %s5769_s15 = smov 19  }
  0x19   :  { %6579 = sst [smem:[#allocation75_spill]] %s5915_s30 }
  0x1a   :  { %s5935_s27 = sld [smem:[%s6551_s0 + %s5766_s22]]   ;;  %s5770_s22 = smov 20  }
  0x1b   :  { %s5940_s4 = sld [smem:[%s6551_s0 + %s5767_s28]]   ;;  %s5771_s28 = smov 21  }
  0x1c   :  { %6580 = sst [smem:[#allocation76_spill]] %s5925_s12 }
  0x1d   :  { %s5945_s8 = sld [smem:[%s6551_s0 + %s5768_s7]]   ;;  %s5772_s7 = smov 22  }
  0x1e   :  { %s5950_s3 = sld [smem:[%s6551_s0 + %s5769_s15]]   ;;  %s5773_s15 = smov 23  }
  0x1f   :  { %s5955_s29 = sld [smem:[%s6551_s0 + %s5770_s22]]   ;;  %s5774_s22 = smov 24  }
  0x20   :  { %6581 = sst [smem:[#allocation77_spill]] %s5935_s27 }
  0x21   :  { %s5960_s19 = sld [smem:[%s6551_s0 + %s5771_s28]]   ;;  %s5775_s28 = smov 25  }
  0x22   :  { %s5965_s14 = sld [smem:[%s6551_s0 + %s5772_s7]]   ;;  %s5776_s7 = smov 26  }
  0x23   :  { %6582 = sst [smem:[#allocation78_spill]] %s5945_s8 }
  0x24   :  { %6583 = sst [smem:[#allocation79_spill]] %s5950_s3 }
  0x25   :  { %s5970_s25 = sld [smem:[%s6551_s0 + %s5773_s15]]   ;;  %s5777_s15 = smov 27  }
  0x26   :  { %s5975_s21 = sld [smem:[%s6551_s0 + %s5774_s22]]   ;;  %s5778_s22 = smov 28  }
  0x27   :  { %6584 = sst [smem:[#allocation80_spill]] %s5960_s19 }
  0x28   :  { %6585 = sst [smem:[#allocation81_spill]] %s5965_s14 }
  0x29   :  { %s5980_s19 = sld [smem:[%s6551_s0 + %s5775_s28]]   ;;  %s5779_s28 = smov 29  }
  0x2a   :  { %s5985_s3 = sld [smem:[%s6551_s0 + %s5776_s7]]   ;;  %s5780_s7 = smov 30  }
  0x2b   :  { %6586 = sst [smem:[#allocation82_spill]] %s5970_s25 }
  0x2c   :  { %s5990_s25 = sld [smem:[%s6551_s0 + %s5777_s15]]   ;;  %s5781_s15 = smov 32  }
  0x2d   :  { %s5995_s9 = sld [smem:[%s6551_s0 + %s5778_s22]]   ;;  %s5782_s22 = smov 34  }
  0x2e   :  { %s6015_s14 = sld [smem:[%s6551_s0 + %s5782_s22]]   ;;  %s5786_s22 = smov 38  }
  0x2f   :  { %6587 = sst [smem:[#allocation83_spill]] %s5980_s19 }
  0x30   :  { %6588 = sst [smem:[#allocation84_spill]] %s5985_s3 }
  0x31   :  { %s6000_s19 = sld [smem:[%s6551_s0 + %s5779_s28]]   ;;  %s5783_s28 = smov 35  }
  0x32   :  { %6589 = sst [smem:[#allocation85_spill]] %s5990_s25 }
  0x33   :  { %s6005_s3 = sld [smem:[%s6551_s0 + %s5780_s7]]   ;;  %s5784_s7 = smov 36  }
  0x34   :  { %s6010_s25 = sld [smem:[%s6551_s0 + %s5781_s15]]   ;;  %s5785_s15 = smov 37  }
  0x35   :  { %6592 = sst [smem:[#allocation88_spill]] %s6015_s14 }
  0x36   :  { %s6030_s8 = sld [smem:[%s6551_s0 + %s5785_s15]]   ;;  %s5789_s15 = smov 41  }
  0x37   :  { %6590 = sst [smem:[#allocation86_spill]] %s6000_s19 }
  0x38   :  { %s6020_s19 = sld [smem:[%s6551_s0 + %s5783_s28]]   ;;  %s5787_s28 = smov 39  }
  0x39   :  { %6591 = sst [smem:[#allocation87_spill]] %s6005_s3 }
  0x3a   :  { %s6025_s3 = sld [smem:[%s6551_s0 + %s5784_s7]]   ;;  %s5788_s7 = smov 40  }
  0x3b   :  { %s6035_s14 = sld [smem:[%s6551_s0 + %s5786_s22]]   ;;  %s5790_s22 = smov 42  }
  0x3c   :  { %6594 = sst [smem:[#allocation90_spill]] %s6030_s8 }
  0x3d   :  { %s6045_s27 = sld [smem:[%s6551_s0 + %s5788_s7]]   ;;  %s5792_s7 = smov 44  }
  0x3e   :  { %6593 = sst [smem:[#allocation89_spill]] %s6020_s19 }
  0x3f   :  { %s6040_s19 = sld [smem:[%s6551_s0 + %s5787_s28]]   ;;  %s5791_s28 = smov 43  }
  0x40   :  { %s6050_s8 = sld [smem:[%s6551_s0 + %s5789_s15]]   ;;  %s5793_s15 = smov 45  }
  0x41   :  { %6595 = sst [smem:[#allocation91_spill]] %s6035_s14 }
  0x42   :  { %s6055_s14 = sld [smem:[%s6551_s0 + %s5790_s22]]   ;;  %s5794_s22 = smov 46  }
  0x43   :  { %s6065_s12 = sld [smem:[%s6551_s0 + %s5792_s7]]   ;;  %s5796_s7 = smov 48  }
  0x45   :  { %6596 = sst [smem:[#allocation92_spill]] %s6040_s19 }
  0x46   :  { %6597 = sst [smem:[#allocation93_spill]] %s6050_s8 }
  0x47   :  { %s6060_s19 = sld [smem:[%s6551_s0 + %s5791_s28]]   ;;  %s5795_s28 = smov 47  }
  0x48   :  { %6598 = sst [smem:[#allocation94_spill]] %s6055_s14 }
  0x49   :  { %6600 = sst [smem:[#allocation96_spill]] %s6065_s12 }
  0x4a   :  { %s6070_s8 = sld [smem:[%s6551_s0 + %s5793_s15]]   ;;  %s5797_s15 = smov 49  }
  0x4b   :  { %s6075_s14 = sld [smem:[%s6551_s0 + %s5794_s22]]   ;;  %s5798_s22 = smov 50  }
  0x4c   :  { %s6085_s12 = sld [smem:[%s6551_s0 + %s5796_s7]]   ;;  %s5800_s7 = smov 52  }
  0x4d   :  { %6599 = sst [smem:[#allocation95_spill]] %s6060_s19 }
  0x4e   :  { %s6080_s19 = sld [smem:[%s6551_s0 + %s5795_s28]]   ;;  %s5799_s28 = smov 51  }
  0x4f   :  { %s6090_s30 = sld [smem:[%s6551_s0 + %s5797_s15]]   ;;  %s5801_s15 = smov 53  }
  0x51   :  { %6601 = sst [smem:[#allocation97_spill]] %s6075_s14 }
  0x52   :  { %6603 = sst [smem:[#allocation99_spill]] %s6085_s12 }
  0x53   :  { %s6095_s14 = sld [smem:[%s6551_s0 + %s5798_s22]]   ;;  %s5802_s22 = smov 54  }
  0x54   :  { %6602 = sst [smem:[#allocation98_spill]] %s6080_s19 }
  0x55   :  { %6604 = sst [smem:[#allocation100_spill]] %s6090_s30 }
  0x56   :  { %s6100_s19 = sld [smem:[%s6551_s0 + %s5799_s28]]   ;;  %s5803_s28 = smov 55  }
  0x57   :  { %s6105_s12 = sld [smem:[%s6551_s0 + %s5800_s7]]   ;;  %s5804_s7 = smov 56  }
  0x58   :  { %s6110_s30 = sld [smem:[%s6551_s0 + %s5801_s15]]   ;;  %s5805_s15 = smov 57  }
  0x59   :  { %6605 = sst [smem:[#allocation101_spill]] %s6095_s14 }
  0x5a   :  { %s6115_s14 = sld [smem:[%s6551_s0 + %s5802_s22]]   ;;  %s5806_s22 = smov 58  }
  0x5c   :  { %6606 = sst [smem:[#allocation102_spill]] %s6100_s19 }
  0x5d   :  { %6607 = sst [smem:[#allocation103_spill]] %s6105_s12 }
  0x5e   :  { %6608 = sst [smem:[#allocation104_spill]] %s6110_s30 }
  0x5f   :  { %s6120_s19 = sld [smem:[%s6551_s0 + %s5803_s28]]   ;;  %s5807_s28 = smov 59  }
  0x60   :  { %6609 = sst [smem:[#allocation105_spill]] %s6115_s14 }
  0x61   :  { %s6125_s12 = sld [smem:[%s6551_s0 + %s5804_s7]]  }
  0x62   :  { %s6130_s30 = sld [smem:[%s6551_s0 + %s5805_s15]]  }
  0x63   :  { %s6135_s14 = sld [smem:[%s6551_s0 + %s5806_s22]]  }
  0x65   :  { %6610 = sst [smem:[#allocation106_spill]] %s6120_s19 }
  0x66   :  { %s6140_s19 = sld [smem:[%s6551_s0 + %s5807_s28]]  }
  0x67   :  { %125 = vsyncpa [#allocation3], 0 }
  0x68   :  { %126 = vsyncpa [#allocation6], 0 }
  0x69   :  { %127 = vsyncpa [#allocation9], 0 }
  0x6a   :  { %128 = vsyncpa [#allocation12], 0 }
  0x6b   :  { %129 = vsyncpa [#allocation15], 0 }
  0x6c   :  { %130 = vsyncpa [#allocation18], 0 }
  0x6d   :  { %131 = vsyncpa [#allocation21], 0 }
  0x6e   :  { %132 = vsyncpa [#allocation24], 0 }
  0x6f   :  { %133 = vsyncpa [#allocation27], 0 }
  0x70   :  { %134 = vsyncpa [#allocation30], 0 }
  0x71   :  { %135 = vsyncpa [#allocation33], 0 }
  0x72   :  { %136 = vsyncpa [#allocation36], 0 }
  0x73   :  { %137 = vsyncpa [#allocation39], 0 }
  0x74   :  { %138 = vsyncpa [#allocation42], 0 }
  0x75   :  { %139 = vsyncpa [#allocation4], 0 }
  0x76   :  { %140 = vsyncpa [#allocation45], 0 }
  0x77   :  { %141 = vsyncpa [#allocation48], 0  ;;  %s5808_s7 = smov [#allocation5]   ;;  %s5809_s10 = smov [#allocation8]  }
  0x78   :  { %s161_s0 = sshll.u32 %s5808_s7, 4  ;;  %s200_s11 = sshll.u32 %s5809_s10, 4  ;;  %s162_s0 = int_to_ptr.vmem [resolvable:$true] %s161_s0  ;;  %s201_s11 = int_to_ptr.vmem [resolvable:$true] %s200_s11 }
  0x79   :  { %s5105_s15 = scalar_lea.vmem %s162_s0, 256  ;;  %p5110_p1 = scmp.lt.s32.totalorder %s162_s0, %s162_s0 }
  0x7a   :  { %p5106_p0 = scmp.ne.s32.totalorder %s162_s0, %s5105_s15  ;;  %p5111_p2 = scmp.lt.s32.totalorder %s5105_s15, %s5105_s15 }
  0x7c   :  { %p5112_p3 = por %p5111_p2, %p5110_p1 }
  0x7e   :  { %p5113_p4 = pnand %p5112_p3, %p5106_p0 }
  0x80   :  { %5116 = shalt.err (!%p5113_p4)
}
  0x81   :  { %s5810_s16 = smov 128   ;;  %s5811_s18 = smov 8  }
  0x82   :  { %167 = dma.hbm_to_vmem [thread:$0]  %s5865_s13, 256, %s162_s0, [#allocation6], %s5810_s16, %s5810_s16, %s5811_s18  }
  0x83   :  { %s5125_s22 = scalar_lea.vmem %s201_s11, 16  ;;  %s5129_s23 = scalar_lea.vmem %s201_s11, 32 }
  0x84   :  { %p5126_p5 = scmp.ne.s32.totalorder %s201_s11, %s5125_s22  ;;  %p5130_p6 = scmp.lt.s32.totalorder %s201_s11, %s201_s11 }
  0x85   :  { %p5131_p7 = scmp.lt.s32.totalorder %s5129_s23, %s5125_s22 }
  0x87   :  { %p5132_p8 = por %p5131_p7, %p5130_p6 }
  0x89   :  { %p5133_p9 = pnand %p5132_p8, %p5126_p5 }
  0x8b   :  { %5136 = shalt.err (!%p5133_p9)
}
  0x8c   :  { %203 = dma.hbm_to_vmem [thread:$0]  %s5910_s24, 16, %s201_s11, [#allocation9]  }
  0x8d   :  { %s5812_s26 = smov [#allocation11]   ;;  %s5813_s1 = smov [#allocation14]  }
  0x8e   :  { %s220_s28 = sshll.u32 %s5812_s26, 4  ;;  %s239_s2 = sshll.u32 %s5813_s1, 4  ;;  %s221_s28 = int_to_ptr.vmem [resolvable:$true] %s220_s28  ;;  %s240_s2 = int_to_ptr.vmem [resolvable:$true] %s239_s2 }
  0x8f   :  { %s5145_s7 = scalar_lea.vmem %s221_s28, 16  ;;  %s5149_s10 = scalar_lea.vmem %s221_s28, 32 }
  0x90   :  { %p5146_p10 = scmp.ne.s32.totalorder %s221_s28, %s5145_s7  ;;  %p5150_p11 = scmp.lt.s32.totalorder %s221_s28, %s221_s28 }
  0x91   :  { %p5151_p12 = scmp.lt.s32.totalorder %s5149_s10, %s5145_s7 }
  0x93   :  { %p5152_p13 = por %p5151_p12, %p5150_p11 }
  0x95   :  { %p5153_p0 = pnand %p5152_p13, %p5146_p10 }
  0x97   :  { %5156 = shalt.err (!%p5153_p0)
}
  0x98   :  { %223 = dma.hbm_to_vmem [thread:$0]  %s5920_s6, 16, %s221_s28, [#allocation12]  }
  0x99   :  { %s5165_s13 = scalar_lea.vmem %s240_s2, 256  ;;  %p5170_p2 = scmp.lt.s32.totalorder %s240_s2, %s240_s2 }
  0x9a   :  { %p5166_p1 = scmp.ne.s32.totalorder %s240_s2, %s5165_s13  ;;  %p5171_p3 = scmp.lt.s32.totalorder %s5165_s13, %s5165_s13 }
  0x9c   :  { %p5172_p4 = por %p5171_p3, %p5170_p2 }
  0x9e   :  { %p5173_p5 = pnand %p5172_p4, %p5166_p1 }
  0xa0   :  { %5176 = shalt.err (!%p5173_p5)
}
  0xa1   :  { %245 = dma.hbm_to_vmem [thread:$0]  %s5930_s20, 256, %s240_s2, [#allocation15], %s5810_s16, %s5810_s16, %s5811_s18  }
  0xa2   :  { %s5814_s24 = smov [#allocation17]   ;;  %s5815_s11 = smov [#allocation20]  }
  0xa3   :  { %s262_s0 = sshll.u32 %s5814_s24, 4  ;;  %s284_s15 = sshll.u32 %s5815_s11, 4  ;;  %s263_s0 = int_to_ptr.vmem [resolvable:$true] %s262_s0  ;;  %s285_s15 = int_to_ptr.vmem [resolvable:$true] %s284_s15 }
  0xa4   :  { %s5185_s22 = scalar_lea.vmem %s263_s0, 128  ;;  %p5190_p7 = scmp.lt.s32.totalorder %s263_s0, %s263_s0 }
  0xa5   :  { %p5186_p6 = scmp.ne.s32.totalorder %s263_s0, %s5185_s22  ;;  %p5191_p8 = scmp.lt.s32.totalorder %s5185_s22, %s5185_s22 }
  0xa7   :  { %p5192_p9 = por %p5191_p8, %p5190_p7 }
  0xa9   :  { %p5193_p10 = pnand %p5192_p9, %p5186_p6 }
  0xab   :  { %5196 = shalt.err (!%p5193_p10)
}
  0xac   :  { %265 = dma.hbm_to_vmem [thread:$0]  %s5940_s4, 128, %s263_s0, [#allocation18]  }
  0xad   :  { %s5205_s6 = scalar_lea.vmem %s285_s15, 16  ;;  %s5209_s23 = scalar_lea.vmem %s285_s15, 32 }
  0xae   :  { %p5206_p11 = scmp.ne.s32.totalorder %s285_s15, %s5205_s6  ;;  %p5210_p12 = scmp.lt.s32.totalorder %s285_s15, %s285_s15 }
  0xaf   :  { %p5211_p13 = scmp.lt.s32.totalorder %s5209_s23, %s5205_s6 }
  0xb1   :  { %p5212_p0 = por %p5211_p13, %p5210_p12 }
  0xb3   :  { %p5213_p1 = pnand %p5212_p0, %p5206_p11 }
  0xb5   :  { %5216 = shalt.err (!%p5213_p1)
}
  0xb6   :  { %287 = dma.hbm_to_vmem [thread:$0]  %s5955_s29, 16, %s285_s15, [#allocation21]  }
  0xb7   :  { %s5816_s20 = smov [#allocation23]   ;;  %s5817_s28 = smov [#allocation26]  }
  0xb8   :  { %s308_s26 = sshll.u32 %s5816_s20, 4  ;;  %s332_s1 = sshll.u32 %s5817_s28, 4  ;;  %s309_s26 = int_to_ptr.vmem [resolvable:$true] %s308_s26  ;;  %s333_s1 = int_to_ptr.vmem [resolvable:$true] %s332_s1 }
  0xb9   :  { %s5225_s2 = scalar_lea.vmem %s309_s26, 16  ;;  %s5229_s7 = scalar_lea.vmem %s309_s26, 32 }
  0xba   :  { %p5226_p2 = scmp.ne.s32.totalorder %s309_s26, %s5225_s2  ;;  %p5230_p3 = scmp.lt.s32.totalorder %s309_s26, %s309_s26 }
  0xbb   :  { %p5231_p4 = scmp.lt.s32.totalorder %s5229_s7, %s5225_s2 }
  0xbd   :  { %p5232_p5 = por %p5231_p4, %p5230_p3 }
  0xbf   :  { %p5233_p6 = pnand %p5232_p5, %p5226_p2 }
  0xc1   :  { %5236 = shalt.err (!%p5233_p6)
}
  0xc2   :  { %311 = dma.hbm_to_vmem [thread:$0]  %s5975_s21, 16, %s309_s26, [#allocation24]  }
  0xc3   :  { %s5245_s4 = scalar_lea.vmem %s333_s1, 16  ;;  %s5249_s10 = scalar_lea.vmem %s333_s1, 32 }
  0xc4   :  { %p5246_p7 = scmp.ne.s32.totalorder %s333_s1, %s5245_s4  ;;  %p5250_p8 = scmp.lt.s32.totalorder %s333_s1, %s333_s1 }
  0xc5   :  { %p5251_p9 = scmp.lt.s32.totalorder %s5249_s10, %s5245_s4 }
  0xc7   :  { %p5252_p10 = por %p5251_p9, %p5250_p8 }
  0xc9   :  { %p5253_p11 = pnand %p5252_p10, %p5246_p7 }
  0xcb   :  { %5256 = shalt.err (!%p5253_p11)
}
  0xcc   :  { %335 = dma.hbm_to_vmem [thread:$0]  %s5995_s9, 16, %s333_s1, [#allocation27]  }
  0xcd   :  { %s5818_s29 = smov [#allocation29]   ;;  %s5819_s24 = smov [#allocation32]  }
  0xce   :  { %s356_s13 = sshll.u32 %s5818_s29, 4  ;;  %s380_s0 = sshll.u32 %s5819_s24, 4  ;;  %s357_s13 = int_to_ptr.vmem [resolvable:$true] %s356_s13  ;;  %s381_s0 = int_to_ptr.vmem [resolvable:$true] %s380_s0 }
  0xcf   :  { %s5265_s11 = scalar_lea.vmem %s357_s13, 16  ;;  %s5269_s15 = scalar_lea.vmem %s357_s13, 32 }
  0xd0   :  { %p5266_p12 = scmp.ne.s32.totalorder %s357_s13, %s5265_s11  ;;  %p5270_p13 = scmp.lt.s32.totalorder %s357_s13, %s357_s13 }
  0xd1   :  { %p5271_p0 = scmp.lt.s32.totalorder %s5269_s15, %s5265_s11 }
  0xd3   :  { %p5272_p1 = por %p5271_p0, %p5270_p13 }
  0xd5   :  { %p5273_p2 = pnand %p5272_p1, %p5266_p12 }
  0xd7   :  { %5276 = shalt.err (!%p5273_p2)
}
  0xd8   :  { %359 = dma.hbm_to_vmem [thread:$0]  %s6010_s25, 16, %s357_s13, [#allocation30]  }
  0xd9   :  { %s5285_s21 = scalar_lea.vmem %s381_s0, 16  ;;  %s5289_s22 = scalar_lea.vmem %s381_s0, 32 }
  0xda   :  { %p5286_p3 = scmp.ne.s32.totalorder %s381_s0, %s5285_s21  ;;  %p5290_p4 = scmp.lt.s32.totalorder %s381_s0, %s381_s0 }
  0xdb   :  { %p5291_p5 = scmp.lt.s32.totalorder %s5289_s22, %s5285_s21 }
  0xdd   :  { %p5292_p6 = por %p5291_p5, %p5290_p4 }
  0xdf   :  { %p5293_p7 = pnand %p5292_p6, %p5286_p3 }
  0xe1   :  { %5296 = shalt.err (!%p5293_p7)
}
  0xe2   :  { %383 = dma.hbm_to_vmem [thread:$0]  %s6025_s3, 16, %s381_s0, [#allocation33]  }
  0xe3   :  { %s5820_s9 = smov [#allocation35]   ;;  %s5821_s23 = smov [#allocation38]  }
  0xe4   :  { %s404_s6 = sshll.u32 %s5820_s9, 4  ;;  %s429_s20 = sshll.u32 %s5821_s23, 4  ;;  %s405_s6 = int_to_ptr.vmem [resolvable:$true] %s404_s6  ;;  %s430_s20 = int_to_ptr.vmem [resolvable:$true] %s429_s20 }
  0xe5   :  { %s5305_s26 = scalar_lea.vmem %s405_s6, 16  ;;  %s5309_s28 = scalar_lea.vmem %s405_s6, 32 }
  0xe6   :  { %p5306_p8 = scmp.ne.s32.totalorder %s405_s6, %s5305_s26  ;;  %p5310_p9 = scmp.lt.s32.totalorder %s405_s6, %s405_s6 }
  0xe7   :  { %p5311_p10 = scmp.lt.s32.totalorder %s5309_s28, %s5305_s26 }
  0xe9   :  { %p5312_p11 = por %p5311_p10, %p5310_p9 }
  0xeb   :  { %p5313_p12 = pnand %p5312_p11, %p5306_p8 }
  0xed   :  { %5316 = shalt.err (!%p5313_p12)
}
  0xee   :  { %407 = dma.hbm_to_vmem [thread:$0]  %s6045_s27, 16, %s405_s6, [#allocation36]  }
  0xef   :  { %s5325_s25 = scalar_lea.vmem %s430_s20, 512  ;;  %p5330_p0 = scmp.lt.s32.totalorder %s430_s20, %s430_s20 }
  0xf0   :  { %p5326_p13 = scmp.ne.s32.totalorder %s430_s20, %s5325_s25  ;;  %p5331_p1 = scmp.lt.s32.totalorder %s5325_s25, %s5325_s25 }
  0xf2   :  { %p5332_p2 = por %p5331_p1, %p5330_p0 }
  0xf4   :  { %p5333_p3 = pnand %p5332_p2, %p5326_p13 }
  0xf6   :  { %5336 = shalt.err (!%p5333_p3)
}
  0xf7   :  { %435 = dma.hbm_to_vmem [thread:$0]  %s6070_s8, 512, %s430_s20, [#allocation39], %s5810_s16, %s5810_s16, %s5811_s18  }
  0xf8   :  { %s5822_s3 = smov [#allocation2]   ;;  %s5823_s2 = smov [#allocation7]  }
  0xf9   :  { %s147_s1 = sshll.u32 %s5822_s3, 4  ;;  %s173_s7 = sshll.u32 %s5823_s2, 4  ;;  %s148_s1 = int_to_ptr.vmem [resolvable:$true] %s147_s1  ;;  %s174_s7 = int_to_ptr.vmem [resolvable:$true] %s173_s7 }
  0xfa   :  { %s5345_s4 = scalar_lea.vmem %s148_s1, 256  ;;  %p5350_p5 = scmp.lt.s32.totalorder %s148_s1, %s148_s1 }
  0xfb   :  { %p5346_p4 = scmp.ne.s32.totalorder %s148_s1, %s5345_s4  ;;  %p5351_p6 = scmp.lt.s32.totalorder %s5345_s4, %s5345_s4 }
  0xfd   :  { %p5352_p7 = por %p5351_p6, %p5350_p5 }
  0xff   :  { %p5353_p8 = pnand %p5352_p7, %p5346_p4 }
 0x101   :  { %5356 = shalt.err (!%p5353_p8)
}
 0x102   :  { %153 = dma.hbm_to_vmem [thread:$0]  %s5855_s5, 256, %s148_s1, [#allocation3], %s5810_s16, %s5810_s16, %s5811_s18  }
 0x103   :  { %s5365_s27 = scalar_lea.vmem %s174_s7, 256  ;;  %p5370_p10 = scmp.lt.s32.totalorder %s174_s7, %s174_s7 }
 0x104   :  { %p5366_p9 = scmp.ne.s32.totalorder %s174_s7, %s5365_s27  ;;  %p5371_p11 = scmp.lt.s32.totalorder %s5365_s27, %s5365_s27 }
 0x106   :  { %p5372_p12 = por %p5371_p11, %p5370_p10 }
 0x108   :  { %p5373_p13 = pnand %p5372_p12, %p5366_p9 }
 0x10a   :  { %5376 = shalt.err (!%p5373_p13)
}
 0x10b   :  { %179 = dma.hbm_to_vmem [thread:$0]  %s5870_s17, 256, %s174_s7, [#allocation6], %s5810_s16, %s5810_s16, %s5811_s18  }
 0x10c   :  { %s5824_s8 = smov [#allocation10]   ;;  %s5825_s29 = smov [#allocation13]  }
 0x10d   :  { %s210_s10 = sshll.u32 %s5824_s8, 4  ;;  %s230_s13 = sshll.u32 %s5825_s29, 4  ;;  %s211_s10 = int_to_ptr.vmem [resolvable:$true] %s210_s10  ;;  %s231_s13 = int_to_ptr.vmem [resolvable:$true] %s230_s13 }
 0x10e   :  { %s5385_s24 = scalar_lea.vmem %s211_s10, 16  ;;  %s5389_s5 = scalar_lea.vmem %s211_s10, 32 }
 0x10f   :  { %p5386_p0 = scmp.ne.s32.totalorder %s211_s10, %s5385_s24  ;;  %p5390_p1 = scmp.lt.s32.totalorder %s211_s10, %s211_s10 }
 0x110   :  { %p5391_p2 = scmp.lt.s32.totalorder %s5389_s5, %s5385_s24 }
 0x112   :  { %p5392_p3 = por %p5391_p2, %p5390_p1 }
 0x114   :  { %p5393_p4 = pnand %p5392_p3, %p5386_p0 }
 0x116   :  { %5396 = shalt.err (!%p5393_p4)
}
 0x117   :  { %s6611_s0 = sld [smem:[#allocation75_spill]]  ;;  %s5405_s11 = scalar_lea.vmem %s231_s13, 16 }
 0x118   :  { %p5406_p5 = scmp.ne.s32.totalorder %s231_s13, %s5405_s11  ;;  %s5409_s15 = scalar_lea.vmem %s231_s13, 32 }
 0x119   :  { %p5410_p6 = scmp.lt.s32.totalorder %s231_s13, %s231_s13  ;;  %p5411_p7 = scmp.lt.s32.totalorder %s5409_s15, %s5405_s11 }
 0x11b   :  { %p5412_p8 = por %p5411_p7, %p5410_p6 }
 0x11d   :  { %213 = dma.hbm_to_vmem [thread:$0]  %s6611_s0, 16, %s211_s10, [#allocation9]  }
 0x11e   :  { %p5413_p9 = pnand %p5412_p8, %p5406_p5 }
 0x120   :  { %5416 = shalt.err (!%p5413_p9)
}
 0x121   :  { %s6612_s17 = sld [smem:[#allocation76_spill]]  ;;  %s5826_s21 = smov [#allocation16]  }
 0x122   :  { %s252_s22 = sshll.u32 %s5826_s21, 4  ;;  %s5827_s9 = smov [#allocation19]   ;;  %s253_s22 = int_to_ptr.vmem [resolvable:$true] %s252_s22 }
 0x123   :  { %s272_s6 = sshll.u32 %s5827_s9, 4  ;;  %s5425_s23 = scalar_lea.vmem %s253_s22, 16  ;;  %s273_s6 = int_to_ptr.vmem [resolvable:$true] %s272_s6 }
 0x124   :  { %p5426_p10 = scmp.ne.s32.totalorder %s253_s22, %s5425_s23  ;;  %s5429_s20 = scalar_lea.vmem %s253_s22, 32 }
 0x125   :  { %p5430_p11 = scmp.lt.s32.totalorder %s253_s22, %s253_s22  ;;  %p5431_p12 = scmp.lt.s32.totalorder %s5429_s20, %s5425_s23 }
 0x127   :  { %233 = dma.hbm_to_vmem [thread:$0]  %s6612_s17, 16, %s231_s13, [#allocation12]  }
 0x128   :  { %p5432_p13 = por %p5431_p12, %p5430_p11 }
 0x12a   :  { %p5433_p0 = pnand %p5432_p13, %p5426_p10 }
 0x12c   :  { %5436 = shalt.err (!%p5433_p0)
}
 0x12d   :  { %s6613_s26 = sld [smem:[#allocation77_spill]]  ;;  %s5445_s28 = scalar_lea.vmem %s273_s6, 16 }
 0x12e   :  { %p5446_p1 = scmp.ne.s32.totalorder %s273_s6, %s5445_s28  ;;  %s5449_s25 = scalar_lea.vmem %s273_s6, 32 }
 0x12f   :  { %p5450_p2 = scmp.lt.s32.totalorder %s273_s6, %s273_s6  ;;  %p5451_p3 = scmp.lt.s32.totalorder %s5449_s25, %s5445_s28 }
 0x131   :  { %p5452_p4 = por %p5451_p3, %p5450_p2 }
 0x133   :  { %255 = dma.hbm_to_vmem [thread:$0]  %s6613_s26, 16, %s253_s22, [#allocation15]  }
 0x134   :  { %p5453_p5 = pnand %p5452_p4, %p5446_p1 }
 0x136   :  { %5456 = shalt.err (!%p5453_p5)
}
 0x137   :  { %s6614_s3 = sld [smem:[#allocation78_spill]]  ;;  %s5828_s1 = smov [#allocation22]  }
 0x138   :  { %s296_s2 = sshll.u32 %s5828_s1, 4  ;;  %s5829_s7 = smov [#allocation25]   ;;  %s297_s2 = int_to_ptr.vmem [resolvable:$true] %s296_s2 }
 0x139   :  { %s320_s4 = sshll.u32 %s5829_s7, 4  ;;  %s5465_s27 = scalar_lea.vmem %s297_s2, 16  ;;  %s321_s4 = int_to_ptr.vmem [resolvable:$true] %s320_s4 }
 0x13a   :  { %p5466_p6 = scmp.ne.s32.totalorder %s297_s2, %s5465_s27  ;;  %s5469_s8 = scalar_lea.vmem %s297_s2, 32 }
 0x13b   :  { %p5470_p7 = scmp.lt.s32.totalorder %s297_s2, %s297_s2  ;;  %p5471_p8 = scmp.lt.s32.totalorder %s5469_s8, %s5465_s27 }
 0x13d   :  { %275 = dma.hbm_to_vmem [thread:$0]  %s6614_s3, 16, %s273_s6, [#allocation18]  }
 0x13e   :  { %p5472_p9 = por %p5471_p8, %p5470_p7 }
 0x140   :  { %p5473_p10 = pnand %p5472_p9, %p5466_p6 }
 0x142   :  { %5476 = shalt.err (!%p5473_p10)
}
 0x143   :  { %s6615_s10 = sld [smem:[#allocation81_spill]]  ;;  %s5485_s29 = scalar_lea.vmem %s321_s4, 16 }
 0x144   :  { %p5486_p11 = scmp.ne.s32.totalorder %s321_s4, %s5485_s29  ;;  %s5489_s13 = scalar_lea.vmem %s321_s4, 32 }
 0x145   :  { %p5490_p12 = scmp.lt.s32.totalorder %s321_s4, %s321_s4  ;;  %p5491_p13 = scmp.lt.s32.totalorder %s5489_s13, %s5485_s29 }
 0x147   :  { %p5492_p0 = por %p5491_p13, %p5490_p12 }
 0x149   :  { %299 = dma.hbm_to_vmem [thread:$0]  %s6615_s10, 16, %s297_s2, [#allocation21]  }
 0x14a   :  { %p5493_p1 = pnand %p5492_p0, %p5486_p11 }
 0x14c   :  { %5496 = shalt.err (!%p5493_p1)
}
 0x14d   :  { %s6616_s24 = sld [smem:[#allocation84_spill]]  ;;  %s5830_s5 = smov [#allocation28]  }
 0x14e   :  { %s344_s0 = sshll.u32 %s5830_s5, 4  ;;  %s5831_s11 = smov [#allocation31]   ;;  %s345_s0 = int_to_ptr.vmem [resolvable:$true] %s344_s0 }
 0x14f   :  { %s368_s15 = sshll.u32 %s5831_s11, 4  ;;  %s5505_s17 = scalar_lea.vmem %s345_s0, 16  ;;  %s369_s15 = int_to_ptr.vmem [resolvable:$true] %s368_s15 }
 0x150   :  { %p5506_p2 = scmp.ne.s32.totalorder %s345_s0, %s5505_s17  ;;  %s5509_s21 = scalar_lea.vmem %s345_s0, 32 }
 0x151   :  { %p5510_p3 = scmp.lt.s32.totalorder %s345_s0, %s345_s0  ;;  %p5511_p4 = scmp.lt.s32.totalorder %s5509_s21, %s5505_s17 }
 0x153   :  { %323 = dma.hbm_to_vmem [thread:$0]  %s6616_s24, 16, %s321_s4, [#allocation24]  }
 0x154   :  { %p5512_p5 = por %p5511_p4, %p5510_p3 }
 0x156   :  { %p5513_p6 = pnand %p5512_p5, %p5506_p2 }
 0x158   :  { %5516 = shalt.err (!%p5513_p6)
}
 0x159   :  { %s6617_s22 = sld [smem:[#allocation87_spill]]  ;;  %s5525_s9 = scalar_lea.vmem %s369_s15, 16 }
 0x15a   :  { %p5526_p7 = scmp.ne.s32.totalorder %s369_s15, %s5525_s9  ;;  %s5529_s6 = scalar_lea.vmem %s369_s15, 32 }
 0x15b   :  { %p5530_p8 = scmp.lt.s32.totalorder %s369_s15, %s369_s15  ;;  %p5531_p9 = scmp.lt.s32.totalorder %s5529_s6, %s5525_s9 }
 0x15d   :  { %p5532_p10 = por %p5531_p9, %p5530_p8 }
 0x15f   :  { %347 = dma.hbm_to_vmem [thread:$0]  %s6617_s22, 16, %s345_s0, [#allocation27]  }
 0x160   :  { %p5533_p11 = pnand %p5532_p10, %p5526_p7 }
 0x162   :  { %5536 = shalt.err (!%p5533_p11)
}
 0x163   :  { %s6618_s23 = sld [smem:[#allocation88_spill]]  ;;  %s5832_s20 = smov [#allocation34]  }
 0x164   :  { %s392_s26 = sshll.u32 %s5832_s20, 4  ;;  %s5833_s28 = smov [#allocation37]   ;;  %s393_s26 = int_to_ptr.vmem [resolvable:$true] %s392_s26 }
 0x165   :  { %s416_s25 = sshll.u32 %s5833_s28, 4  ;;  %s5545_s3 = scalar_lea.vmem %s393_s26, 16  ;;  %s417_s25 = int_to_ptr.vmem [resolvable:$true] %s416_s25 }
 0x166   :  { %p5546_p12 = scmp.ne.s32.totalorder %s393_s26, %s5545_s3  ;;  %s5549_s1 = scalar_lea.vmem %s393_s26, 32 }
 0x167   :  { %p5550_p13 = scmp.lt.s32.totalorder %s393_s26, %s393_s26  ;;  %p5551_p0 = scmp.lt.s32.totalorder %s5549_s1, %s5545_s3 }
 0x169   :  { %371 = dma.hbm_to_vmem [thread:$0]  %s6618_s23, 16, %s369_s15, [#allocation30]  }
 0x16a   :  { %p5552_p1 = por %p5551_p0, %p5550_p13 }
 0x16c   :  { %p5553_p2 = pnand %p5552_p1, %p5546_p12 }
 0x16e   :  { %5556 = shalt.err (!%p5553_p2)
}
 0x16f   :  { %s6619_s2 = sld [smem:[#allocation91_spill]]  ;;  %s5565_s7 = scalar_lea.vmem %s417_s25, 16 }
 0x170   :  { %p5566_p3 = scmp.ne.s32.totalorder %s417_s25, %s5565_s7  ;;  %s5569_s4 = scalar_lea.vmem %s417_s25, 32 }
 0x171   :  { %p5570_p4 = scmp.lt.s32.totalorder %s417_s25, %s417_s25  ;;  %p5571_p5 = scmp.lt.s32.totalorder %s5569_s4, %s5565_s7 }
 0x173   :  { %p5572_p6 = por %p5571_p5, %p5570_p4 }
 0x175   :  { %395 = dma.hbm_to_vmem [thread:$0]  %s6619_s2, 16, %s393_s26, [#allocation33]  }
 0x176   :  { %p5573_p7 = pnand %p5572_p6, %p5566_p3 }
 0x178   :  { %5576 = shalt.err (!%p5573_p7)
}
 0x179   :  { %s6620_s27 = sld [smem:[#allocation94_spill]]  ;;  %s5834_s8 = smov [#allocation40]  }
 0x17a   :  { %s447_s10 = sshll.u32 %s5834_s8, 4  ;;  %s5835_s29 = smov [#allocation41]   ;;  %s448_s10 = int_to_ptr.vmem [resolvable:$true] %s447_s10 }
 0x17b   :  { %s465_s13 = sshll.u32 %s5835_s29, 4  ;;  %s5585_s24 = scalar_lea.vmem %s448_s10, 512  ;;  %s466_s13 = int_to_ptr.vmem [resolvable:$true] %s465_s13 }
 0x17c   :  { %p5586_p8 = scmp.ne.s32.totalorder %s448_s10, %s5585_s24  ;;  %p5590_p9 = scmp.lt.s32.totalorder %s448_s10, %s448_s10 }
 0x17d   :  { %p5591_p10 = scmp.lt.s32.totalorder %s5585_s24, %s5585_s24 }
 0x17f   :  { %419 = dma.hbm_to_vmem [thread:$0]  %s6620_s27, 16, %s417_s25, [#allocation36]  }
 0x180   :  { %p5592_p11 = por %p5591_p10, %p5590_p9 }
 0x182   :  { %p5593_p12 = pnand %p5592_p11, %p5586_p8 }
 0x184   :  { %5596 = shalt.err (!%p5593_p12)
}
 0x185   :  { %s6621_s5 = sld [smem:[#allocation100_spill]]  ;;  %s5605_s0 = scalar_lea.vmem %s466_s13, 512 }
 0x186   :  { %p5606_p13 = scmp.ne.s32.totalorder %s466_s13, %s5605_s0  ;;  %p5610_p0 = scmp.lt.s32.totalorder %s466_s13, %s466_s13 }
 0x187   :  { %p5611_p1 = scmp.lt.s32.totalorder %s5605_s0, %s5605_s0 }
 0x189   :  { %p5612_p2 = por %p5611_p1, %p5610_p0 }
 0x18b   :  { %453 = dma.hbm_to_vmem [thread:$0]  %s6621_s5, 512, %s448_s10, [#allocation39], %s5810_s16, %s5810_s16, %s5811_s18  }
 0x18c   :  { %p5613_p3 = pnand %p5612_p2, %p5606_p13 }
 0x18e   :  { %5616 = shalt.err (!%p5613_p3)
}
 0x18f   :  { %s6622_s11 = sld [smem:[#allocation104_spill]] }
 0x195   :  { %471 = dma.hbm_to_vmem [thread:$0]  %s6622_s11, 512, %s466_s13, [#allocation42], %s5810_s16, %s5810_s16, %s5811_s18  }
 0x196   :  { %5717 = dma.done.wait [#allocation3], 256  }
 0x197   :  { %5718 = vsyncadd [#allocation3], 4294967040 }
 0x198   :  { %5719 = dma.done.wait [#allocation6], 512  }
 0x199   :  { %5720 = vsyncadd [#allocation6], 4294966784 }
 0x19a   :  { %5721 = dma.done.wait [#allocation9], 32  }
 0x19b   :  { %5722 = vsyncadd [#allocation9], 4294967264 }
 0x19c   :  { %5723 = dma.done.wait [#allocation12], 32  }
 0x19d   :  { %5724 = vsyncadd [#allocation12], 4294967264 }
 0x19e   :  { %5725 = dma.done.wait [#allocation15], 272  }
 0x19f   :  { %5726 = vsyncadd [#allocation15], 4294967024 }
 0x1a0   :  { %5727 = dma.done.wait [#allocation18], 144  }
 0x1a1   :  { %5728 = vsyncadd [#allocation18], 4294967152 }
 0x1a2   :  { %5729 = dma.done.wait [#allocation21], 32  }
 0x1a3   :  { %5730 = vsyncadd [#allocation21], 4294967264 }
 0x1a4   :  { %5731 = dma.done.wait [#allocation24], 32  }
 0x1a5   :  { %5732 = vsyncadd [#allocation24], 4294967264 }
 0x1a6   :  { %5733 = dma.done.wait [#allocation27], 32  }
 0x1a7   :  { %5734 = vsyncadd [#allocation27], 4294967264 }
 0x1a8   :  { %5735 = dma.done.wait [#allocation30], 32  }
 0x1a9   :  { %5736 = vsyncadd [#allocation30], 4294967264 }
 0x1aa   :  { %5737 = dma.done.wait [#allocation33], 32  }
 0x1ab   :  { %5738 = vsyncadd [#allocation33], 4294967264 }
 0x1ac   :  { %5739 = dma.done.wait [#allocation36], 32  }
 0x1ad   :  { %5740 = vsyncadd [#allocation36], 4294967264 }
 0x1ae   :  { %5741 = dma.done.wait [#allocation39], 1024  }
 0x1af   :  { %5742 = vsyncadd [#allocation39], 4294966272 }
 0x1b0   :  { %5743 = dma.done.wait [#allocation42], 512  }
 0x1b1   :  { %5744 = vsyncadd [#allocation42], 4294966784  ;;  %s6623_s15 = sld [smem:[#allocation67_spill]]  ;;  %v555_v0 = vld [vmem:[#allocation14 + $0x8] sm:$0xff]  ;;  %v649_v1 = vld [vmem:[#allocation17] sm:$0xff]  ;;  %vm657_vm0 = vcmask 64512  }
 0x1b2   :  { %4555 = vmatprep.subr.mxu0 %v555_v0  ;;  %4562 = vmatprep.subr.mxu1 %v649_v1  ;;  %v554_v3 = vld [vmem:[#allocation14] sm:$0xff]  ;;  %v552_v5 = vld [vmem:[#allocation2] sm:$0xff]  ;;  %vm563_vm1 = vcmask 130048   ;;  %v553_v6 = vld [vmem:[#allocation2 + $0x8] sm:$0xff]  ;;  %vm745_vm2 = vcmask 121856   ;;  %s6624_s17 = sld [smem:[#allocation79_spill]] }
 0x1b3   :  { %4556 = vmatpush3.msra.mxu0 %v555_v0  ;;  %4563 = vmatpush3.msra.mxu1 %v649_v1  ;;  %v6193_v7 = vld [vmem:[#allocation7] sm:$0xff]  ;;  %v6198_v8 = vld [vmem:[#allocation5] sm:$0xff]  ;;  %v6200_v9 = vld [vmem:[#allocation7 + $0x8] sm:$0xff]  ;;  %vm752_vm3 = vcmask 1046528   ;;  %s6625_s21 = sld [smem:[#allocation80_spill]]  ;;  %vm932_vm4 = vcmask 261120  }
 0x1b4   :  { %4557 = vmatprep.subr.mxu0 %v554_v3  ;;  %4559 = vmatprep.mubr.msk.f32.mxu0 %vm563_vm1, %v552_v5  ;;  %v4222_v10 = vld [vmem:[#allocation19] ss:$0 sm:$0xff]  ;;  %v4219_v12 = vld [vmem:[#allocation16] ss:$0 sm:$0xff]  ;;  %v6216_v25 = vld [vmem:[#allocation5 + $0x8] sm:$0xff]  ;;  %s6626_s22 = sld [smem:[#allocation82_spill]] }
 0x1b5   :  { %4558 = vmatpush3.msra.mxu0 %v554_v3  ;;  %1103 = vxpose.xlu0.b32.start [1/2] (short) (narrow) %v6193_v7, 16  ;;  %s6627_s9 = sld [smem:[#allocation83_spill]]  ;;  %v4230_v49 = vld [vmem:[#allocation20] ss:$0 sm:$0xff]  ;;  %v4233_v0 = vld [vmem:[#allocation22] ss:$0 sm:$0xff] }
 0x1b6   :  { %4560 = vmatmul.mubr.msk.f32.vlgmr.msra.gmra.mxu0 %vm563_vm1, %v553_v6  ;;  %s6628_s6 = sld [smem:[#allocation85_spill]]  ;;  %s5836_s3 = smov 32   ;;  %vm2160_vm5 = vcmask 523264   ;;  %vm2694_vm6 = vcmask 785408   ;;  %vm5840_vm7 = vmmov 0  }
 0x1b7   :  { %v647_v2 = vld [vmem:[%s6623_s15] sm:$0xff]  ;;  %v648_v4 = vld [vmem:[%s6623_s15 + $0x8] sm:$0x7f]  ;;  %4578 = vmatprep.mubr.msk.f32.mxu0 %vm563_vm1, %v6198_v8  ;;  %s6629_s23 = sld [smem:[#allocation86_spill]]  ;;  %s5837_s8 = smov 64  }
 0x1b8   :  { %4564 = vmatprep.mubr.msk.f32.mxu1 %vm657_vm0, %v647_v2  ;;  %v919_v24 = vld [vmem:[%s6624_s17 + $0x18] sm:$0xff]  ;;  %v918_v26 = vld [vmem:[%s6624_s17 + $0x10] sm:$0xff]  ;;  %v917_v27 = vld [vmem:[%s6624_s17 + $0x8] sm:$0xff]  ;;  %s6630_s20 = sld [smem:[#allocation89_spill]]  ;;  %s5838_s5 = smov 96  }
 0x1b9   :  { %4565 = vmatmul.mubr.msk.f32.vlgmr.msra.gmra.mxu1 %vm657_vm0, %v648_v4  ;;  %1104 = vxpose.xlu0.b32.end [2/2] (short) (narrow) %v6200_v9, 16  ;;  %v916_v28 = vld [vmem:[%s6624_s17] sm:$0xff]  ;;  %v924_v29 = vld [vmem:[%s6625_s21 + $0x18] sm:$0xff]  ;;  %v923_v42 = vld [vmem:[%s6625_s21 + $0x10] sm:$0xff]  ;;  %s6631_s26 = sld [smem:[#allocation90_spill]] }
 0x1ba   :  { %4571 = vmatprep.mubr.msk.f32.mxu1 %vm745_vm2, %v6193_v7  ;;  %v922_v43 = vld [vmem:[%s6625_s21 + $0x8] sm:$0xff]  ;;  %v921_v44 = vld [vmem:[%s6625_s21] sm:$0xff]  ;;  %v1221_v45 = vld [vmem:[%s6626_s22 + $0x18] sm:$0xff]  ;;  %s6632_s28 = sld [smem:[#allocation68_spill]] }
 0x1bb   :  { %v1226_v46 = vld [vmem:[%s6627_s9 + $0x18] sm:$0xff]  ;;  %v1225_v47 = vld [vmem:[%s6627_s9 + $0x10] sm:$0xff]  ;;  %v1224_v48 = vld [vmem:[%s6627_s9 + $0x8] sm:$0xff]  ;;  %s6633_s25 = sld [smem:[#allocation69_spill]] }
 0x1bc   :  { %v1220_v59 = vld [vmem:[%s6626_s22 + $0x10] sm:$0xff]  ;;  %v1219_v60 = vld [vmem:[%s6626_s22 + $0x8] sm:$0xff]  ;;  %v1218_v61 = vld [vmem:[%s6626_s22] sm:$0xff]  ;;  %s6634_s1 = sld [smem:[#allocation92_spill]] }
 0x1bd   :  { %v1223_v63 = vld [vmem:[%s6627_s9] sm:$0xff]  ;;  %v4238_v4 = vld [vmem:[#allocation23] ss:$0 sm:$0xff]  ;;  %s6635_s2 = sld [smem:[#allocation93_spill]]  ;;  %s5842_s9 = smov [#allocation44]  }
 0x1be   :  { %s6636_s7 = sld [smem:[#allocation73_spill]] }
 0x1bf   :  { %s6637_s4 = sld [smem:[#allocation74_spill]] }
 0x1c0   :  { %s6638_s27 = sld [smem:[#allocation95_spill]] }
 0x1c1   :  { %s6639_s10 = sld [smem:[#allocation96_spill]] }
 0x1c2   :  { %s6640_s29 = sld [smem:[#allocation70_spill]] }
 0x1c3   :  { %s6641_s13 = sld [smem:[#allocation98_spill]] }
 0x1c4   :  { %s6642_s24 = sld [smem:[#allocation97_spill]] }
 0x1c5   :  { %s6643_s0 = sld [smem:[#allocation99_spill]] }
 0x1c6   :  { %s6644_s11 = sld [smem:[#allocation71_spill]] }
 0x1c7   :  { %s6645_s15 = sld [smem:[#allocation102_spill]] }
 0x1c8   :  { %s6646_s17 = sld [smem:[#allocation101_spill]] }
 0x1c9   :  { %s6647_s21 = sld [smem:[#allocation72_spill]] }
 0x1ca   :  { %s6648_s22 = sld [smem:[#allocation103_spill]] }
 0x231   :  { %v1119_v37 = vpop.trf.xlu0 }
 0x235   :  { %v1120_v41 = vpop.trf.xlu0 }
 0x276   :  { %v4561_v14 = vpop.f32.mrf.mxu0 }
 0x277   :  { %v642_v17 = vadd.f32 %v4561_v14, %v4219_v12 }
 0x278   :  { %v636_v19 = vpop.f32.mrf.mxu0 }
 0x279   :  { %v4566_v11 = vpop.f32.mrf.mxu1  ;;  %v646_v20 = vmax.f32 %v642_v17, 0.0  ;;  %v637_v22 = vadd.f32 %v4219_v12, %v636_v19  ;;  %v1563_v19 = vld [vmem:[%s6628_s6 + $0x10] sm:$0xff] }
 0x27a   :  { %v736_v13 = vadd.f32 %v4566_v11, %v4222_v10 }
 0x27b   :  { %v730_v15 = vpop.f32.mrf.mxu1  ;;  %v645_v23 = vmax.f32 %v637_v22, 0.0  ;;  %4574 = vmatprep.subr.mxu0 %v646_v20  ;;  %v913_v38 = vmul.f32 1.1, %v646_v20 }
 0x27c   :  { %v6205_v16 = vmax.f32 %v736_v13, 0.0  ;;  %v731_v18 = vadd.f32 %v4222_v10, %v730_v15  ;;  %4575 = vmatpush3.msra.mxu0 %v646_v20 }
 0x27d   :  { %4576 = vmatprep.subr.mxu0 %v645_v23  ;;  %v912_v36 = vmul.f32 1.1, %v645_v23 }
 0x27e   :  { %v6207_v21 = vmax.f32 %v731_v18, 0.0  ;;  %4567 = vmatprep.subr.msk.mxu1 %vm752_vm3, %v6205_v16  ;;  %4577 = vmatpush3.msra.mxu0 %v645_v23 }
 0x27f   :  { %4568 = vmatpush3.msk.msra.mxu1 %vm752_vm3, %v6205_v16  ;;  %4579 = vmatmul.mubr.msk.f32.vlgmr.msra.gmra.mxu0 %vm563_vm1, %v6216_v25 }
 0x280   :  { %4569 = vmatprep.subr.mxu1 %v6207_v21  ;;  %4592 = vmatprep.subr.mxu0 %v924_v29 }
 0x281   :  { %4570 = vmatpush3.msra.mxu1 %v6207_v21  ;;  %4593 = vmatpush3.msra.mxu0 %v924_v29 }
 0x282   :  { %4572 = vmatmul.mubr.msk.f32.vlgmr.msra.gmra.mxu1 %vm745_vm2, %v6200_v9  ;;  %4581 = vmatprep.subr.mxu1 %v919_v24 }
 0x283   :  { %4582 = vmatpush3.msra.mxu1 %v919_v24  ;;  %4594 = vmatprep.subr.mxu0 %v923_v42 }
 0x284   :  { %4583 = vmatprep.subr.mxu1 %v918_v26  ;;  %4595 = vmatpush3.msra.mxu0 %v923_v42 }
 0x285   :  { %4584 = vmatpush3.msra.mxu1 %v918_v26  ;;  %4596 = vmatprep.subr.mxu0 %v922_v43 }
 0x286   :  { %4585 = vmatprep.subr.mxu1 %v917_v27  ;;  %4597 = vmatpush3.msra.mxu0 %v922_v43 }
 0x287   :  { %4586 = vmatpush3.msra.mxu1 %v917_v27  ;;  %4598 = vmatprep.subr.mxu0 %v921_v44 }
 0x288   :  { %4587 = vmatprep.subr.mxu1 %v916_v28  ;;  %4599 = vmatpush3.msra.mxu0 %v921_v44 }
 0x289   :  { %4588 = vmatpush3.msra.mxu1 %v916_v28  ;;  %4610 = vmatprep.subr.mxu0 %v1221_v45 }
 0x28a   :  { %4603 = vmatprep.subr.mxu1 %v646_v20 }
 0x33f   :  { %v4580_v31 = vpop.f32.mrf.mxu0 }
 0x341   :  { %v903_v34 = vpop.f32.mrf.mxu0 }
 0x342   :  { %v4573_v30 = vpop.f32.mrf.mxu1 }
 0x343   :  { %v909_v33 = vadd.f32 %v4580_v31, %v4573_v30  ;;  %v1569_v31 = vld [vmem:[%s6629_s23 + $0x18] sm:$0xff] }
 0x344   :  { %v822_v32 = vpop.f32.mrf.mxu1 }
 0x345   :  { %v904_v35 = vadd.f32 %v903_v34, %v822_v32  ;;  %v915_v40 = vadd.f32 %v913_v38, %v909_v33  ;;  %v1568_v32 = vld [vmem:[%s6629_s23 + $0x10] sm:$0xff]  ;;  %v1567_v33 = vld [vmem:[%s6629_s23 + $0x8] sm:$0xff]  ;;  %v1566_v34 = vld [vmem:[%s6629_s23] sm:$0xff]  ;;  %s5843_s23 = smov [#allocation47]  }
 0x346   :  { %v1748_v38 = vld [vmem:[%s6630_s20 + $0x8] sm:$0xff] }
 0x347   :  { %v914_v39 = vadd.f32 %v912_v36, %v904_v35  ;;  %v1750_v35 = vld [vmem:[%s6630_s20 + $0x18] sm:$0xff] }
 0x348   :  { %v1755_v36 = vld [vmem:[%s6631_s26 + $0x18] sm:$0xff] }
 0x349   :  { %4589 = vmatprep.mubr.msk.f32.mxu1 %vm932_vm4, %v914_v39  ;;  %v4249_v39 = vld [vmem:[#allocation26] ss:$0 sm:$0xff] }
 0x34a   :  { %4590 = vmatmul.mubr.msk.f32.vlgmr.msra.gmra.mxu1 %vm932_vm4, %v915_v40 }
 0x34b   :  { %4604 = vmatpush3.msra.mxu1 %v646_v20  ;;  %4607 = vmatprep.mubr.msk.f32.mxu1 %vm563_vm1, %v1119_v37  ;;  %v1562_v20 = vld [vmem:[%s6628_s6 + $0x8] sm:$0xff]  ;;  %v1749_v37 = vld [vmem:[%s6630_s20 + $0x10] sm:$0xff] }
 0x34c   :  { %4605 = vmatprep.subr.mxu1 %v645_v23 }
 0x34d   :  { %4606 = vmatpush3.msra.mxu1 %v645_v23 }
 0x34e   :  { %4608 = vmatmul.mubr.msk.f32.vlgmr.msra.gmra.mxu1 %vm563_vm1, %v1120_v41  ;;  %4621 = vmatprep.subr.mxu1 %v1226_v46 }
 0x34f   :  { %4622 = vmatpush3.msra.mxu1 %v1226_v46  ;;  %v1754_v46 = vld [vmem:[%s6631_s26 + $0x10] sm:$0xff] }
 0x350   :  { %4623 = vmatprep.subr.mxu1 %v1225_v47 }
 0x351   :  { %4624 = vmatpush3.msra.mxu1 %v1225_v47  ;;  %v1753_v47 = vld [vmem:[%s6631_s26 + $0x8] sm:$0xff] }
 0x352   :  { %4625 = vmatprep.subr.mxu1 %v1224_v48 }
 0x353   :  { %4626 = vmatpush3.msra.mxu1 %v1224_v48  ;;  %v1747_v48 = vld [vmem:[%s6630_s20] sm:$0xff]  ;;  %s4113_s20 = sshll.u32 %s5843_s23, 4  ;;  %s4114_s20 = int_to_ptr.vmem [resolvable:$true] %s4113_s20 }
 0x354   :  { %4627 = vmatprep.subr.mxu1 %v1223_v63 }
 0x355   :  { %4628 = vmatpush3.msra.mxu1 %v1223_v63 }
 0x40a   :  { %v4591_v50 = vpop.f32.mrf.mxu1 }
 0x40b   :  { %v1011_v51 = vadd.f32 %v4591_v50, %v4230_v49  ;;  %v4252_v50 = vld [vmem:[#allocation28] ss:$0 sm:$0xff] }
 0x40c   :  { %v1005_v52 = vpop.f32.mrf.mxu1 }
 0x40d   :  { %v1006_v53 = vadd.f32 %v4230_v49, %v1005_v52  ;;  %v1015_v56 = vmax.f32 %v1011_v51, 0.0  ;;  %v1752_v49 = vld [vmem:[%s6631_s26] sm:$0xff] }
 0x40e   :  { %v4609_v54 = vpop.f32.mrf.mxu1 }
 0x40f   :  { %v1014_v55 = vmax.f32 %v1006_v53, 0.0  ;;  %v1217_v62 = vadd.f32 %v4609_v54, %v6205_v16 }
 0x410   :  { %v1207_v57 = vpop.f32.mrf.mxu1 }
 0x411   :  { %v1216_v58 = vadd.f32 %v1207_v57, %v6207_v21  ;;  %4600 = vmatprep.mubr.msk.f32.mxu0 %vm932_vm4, %v1014_v55  ;;  %v1561_v21 = vld [vmem:[%s6628_s6] sm:$0xff] }
 0x412   :  { %4601 = vmatmul.mubr.msk.f32.vlgmr.msra.gmra.mxu0 %vm932_vm4, %v1015_v56  ;;  %v1967_v55 = vld [vmem:[%s6632_s28] sm:$0xff]  ;;  %v1968_v56 = vld [vmem:[%s6632_s28 + $0x8] sm:$0xff] }
 0x413   :  { %4611 = vmatpush3.msra.mxu0 %v1221_v45  ;;  %4618 = vmatprep.mubr.msk.f32.mxu0 %vm932_vm4, %v1216_v58  ;;  %v4255_v57 = vld [vmem:[#allocation32] ss:$0 sm:$0xff] }
 0x414   :  { %4612 = vmatprep.subr.mxu0 %v1220_v59 }
 0x415   :  { %4613 = vmatpush3.msra.mxu0 %v1220_v59 }
 0x416   :  { %4614 = vmatprep.subr.mxu0 %v1219_v60 }
 0x417   :  { %4615 = vmatpush3.msra.mxu0 %v1219_v60 }
 0x418   :  { %4616 = vmatprep.subr.mxu0 %v1218_v61 }
 0x419   :  { %4617 = vmatpush3.msra.mxu0 %v1218_v61 }
 0x41a   :  { %4619 = vmatmul.mubr.msk.f32.vlgmr.msra.gmra.mxu0 %vm932_vm4, %v1217_v62 }
 0x41b   :  { %4636 = vmatprep.mubr.msk.f32.mxu0 %vm745_vm2, %v6193_v7  ;;  %v4241_v7 = vld [vmem:[#allocation25] ss:$0 sm:$0xff] }
 0x4d2   :  { %v4602_v1 = vpop.f32.mrf.mxu0 }
 0x4d3   :  { %v1100_v2 = vadd.f32 %v4602_v1, %v4233_v0  ;;  %v4265_v1 = vld [vmem:[%s6632_s28 + $0x10] sm:$0xff] }
 0x4d4   :  { %v1094_v3 = vpop.f32.mrf.mxu0 }
 0x4d5   :  { %4639 = vmatprep.subr.mxu1 %v1100_v2  ;;  %v1095_v14 = vadd.f32 %v4233_v0, %v1094_v3  ;;  %v1558_v28 = vmul.f32 1.1, %v1100_v2  ;;  %v4266_v3 = vld [vmem:[%s6632_s28 + $0x18] sm:$0xff] }
 0x4d7   :  { %v1557_v27 = vmul.f32 1.1, %v1095_v14 }
 0x4da   :  { %v4620_v5 = vpop.f32.mrf.mxu0 }
 0x4db   :  { %v1312_v6 = vadd.f32 %v4620_v5, %v4238_v4  ;;  %v2406_v5 = vld [vmem:[%s6633_s25 + $0x8] sm:$0xff] }
 0x4dc   :  { %v1306_v10 = vpop.f32.mrf.mxu0 }
 0x4dd   :  { %v1307_v11 = vadd.f32 %v4238_v4, %v1306_v10  ;;  %v1316_v13 = vmax.f32 %v1312_v6, 0.0  ;;  %v2405_v4 = vld [vmem:[%s6633_s25] sm:$0xff]  ;;  %v1960_v6 = vld [vmem:[%s6634_s1 + $0x38] sm:$0xff]  ;;  %v1959_v10 = vld [vmem:[%s6634_s1 + $0x30] sm:$0xff] }
 0x4df   :  { %v1315_v12 = vmax.f32 %v1307_v11, 0.0  ;;  %v1958_v11 = vld [vmem:[%s6634_s1 + $0x28] sm:$0xff] }
 0x4e1   :  { %4629 = vmatprep.mubr.msk.f32.mxu1 %vm932_vm4, %v1315_v12  ;;  %v1957_v12 = vld [vmem:[%s6634_s1 + $0x20] sm:$0xff] }
 0x4e2   :  { %4630 = vmatmul.mubr.msk.f32.vlgmr.msra.gmra.mxu1 %vm932_vm4, %v1316_v13  ;;  %v1956_v13 = vld [vmem:[%s6634_s1 + $0x18] sm:$0xff] }
 0x4e3   :  { %4640 = vmatpush3.msra.mxu1 %v1100_v2  ;;  %4643 = vmatprep.mubr.msk.f32.mxu1 %vm563_vm1, %v6198_v8  ;;  %v1564_v8 = vld [vmem:[%s6628_s6 + $0x18] sm:$0xff]  ;;  %s4089_s6 = sshll.u32 %s5842_s9, 4  ;;  %s4090_s6 = int_to_ptr.vmem [resolvable:$true] %s4089_s6 }
 0x4e4   :  { %4641 = vmatprep.subr.mxu1 %v1095_v14  ;;  %s5617_s26 = scalar_lea.vmem %s4090_s6, 256  ;;  %p5622_p5 = scmp.lt.s32.totalorder %s4090_s6, %s4090_s6 }
 0x4e5   :  { %4642 = vmatpush3.msra.mxu1 %v1095_v14  ;;  %v1955_v14 = vld [vmem:[%s6634_s1 + $0x10] sm:$0xff]  ;;  %p5618_p4 = scmp.ne.s32.totalorder %s4090_s6, %s5617_s26  ;;  %p5623_p6 = scmp.lt.s32.totalorder %s5617_s26, %s5617_s26 }
 0x4e6   :  { %4644 = vmatmul.mubr.msk.f32.vlgmr.msra.gmra.mxu1 %vm563_vm1, %v6216_v25  ;;  %4657 = vmatprep.subr.mxu1 %v1569_v31 }
 0x4e7   :  { %4658 = vmatpush3.msra.mxu1 %v1569_v31  ;;  %p5624_p7 = por %p5623_p6, %p5622_p5 }
 0x4e8   :  { %4659 = vmatprep.subr.mxu1 %v1568_v32 }
 0x4e9   :  { %4660 = vmatpush3.msra.mxu1 %v1568_v32  ;;  %p5625_p8 = pnand %p5624_p7, %p5618_p4 }
 0x4ea   :  { %4661 = vmatprep.subr.mxu1 %v1567_v33 }
 0x4eb   :  { %4662 = vmatpush3.msra.mxu1 %v1567_v33 }
 0x4ec   :  { %4663 = vmatprep.subr.mxu1 %v1566_v34 }
 0x4ed   :  { %4664 = vmatpush3.msra.mxu1 %v1566_v34 }
 0x4ee   :  { %4679 = vmatprep.subr.mxu1 %v1755_v36 }
 0x5a2   :  { %v4631_v15 = vpop.f32.mrf.mxu1 }
 0x5a3   :  { %v1401_v16 = vadd.f32 %v4631_v15, %v4241_v7  ;;  %v1953_v15 = vld [vmem:[%s6634_s1] sm:$0xff] }
 0x5a4   :  { %v1395_v17 = vpop.f32.mrf.mxu1 }
 0x5a5   :  { %v1396_v18 = vadd.f32 %v4241_v7, %v1395_v17  ;;  %4632 = vmatprep.subr.msk.mxu0 %vm752_vm3, %v1401_v16  ;;  %v1954_v7 = vld [vmem:[%s6634_s1 + $0x8] sm:$0xff]  ;;  %v1965_v17 = vld [vmem:[%s6635_s2 + $0x18] sm:$0xff] }
 0x5a6   :  { %4633 = vmatpush3.msk.msra.mxu0 %vm752_vm3, %v1401_v16  ;;  %v4645_v22 = vpop.f32.mrf.mxu1  ;;  %v4258_v16 = vld [vmem:[#allocation34] ss:$0 sm:$0xff] }
 0x5a7   :  { %4634 = vmatprep.subr.mxu0 %v1396_v18 }
 0x5a8   :  { %4635 = vmatpush3.msra.mxu0 %v1396_v18  ;;  %v1548_v25 = vpop.f32.mrf.mxu1 }
 0x5a9   :  { %4637 = vmatmul.mubr.msk.f32.vlgmr.msra.gmra.mxu0 %vm745_vm2, %v6200_v9  ;;  %4646 = vmatprep.subr.mxu0 %v1564_v8 }
 0x5aa   :  { %4647 = vmatpush3.msra.mxu0 %v1564_v8  ;;  %v4261_v8 = vld [vmem:[%s6636_s7] ss:$0 sm:$0xff] }
 0x5ab   :  { %4648 = vmatprep.subr.mxu0 %v1563_v19 }
 0x5ac   :  { %4649 = vmatpush3.msra.mxu0 %v1563_v19 }
 0x5ad   :  { %4650 = vmatprep.subr.mxu0 %v1562_v20 }
 0x5ae   :  { %4651 = vmatpush3.msra.mxu0 %v1562_v20  ;;  %v4262_v20 = vld [vmem:[%s6637_s4] ss:$0 sm:$0xff] }
 0x5af   :  { %4652 = vmatprep.subr.mxu0 %v1561_v21 }
 0x5b0   :  { %4653 = vmatpush3.msra.mxu0 %v1561_v21 }
 0x5b1   :  { %4668 = vmatprep.subr.mxu0 %v1750_v35 }
 0x669   :  { %v4638_v23 = vpop.f32.mrf.mxu0 }
 0x66a   :  { %v1554_v24 = vadd.f32 %v4645_v22, %v4638_v23 }
 0x66b   :  { %v1473_v9 = vpop.f32.mrf.mxu0 }
 0x66c   :  { %v1549_v26 = vadd.f32 %v1548_v25, %v1473_v9  ;;  %v1560_v30 = vadd.f32 %v1558_v28, %v1554_v24  ;;  %v4283_v28 = vld [vmem:[%s6633_s25 + $0x10] sm:$0xff] }
 0x66e   :  { %v1559_v29 = vadd.f32 %v1557_v27, %v1549_v26 }
 0x670   :  { %4654 = vmatprep.mubr.msk.f32.mxu0 %vm932_vm4, %v1559_v29  ;;  %v4284_v29 = vld [vmem:[%s6633_s25 + $0x18] sm:$0xff] }
 0x671   :  { %4655 = vmatmul.mubr.msk.f32.vlgmr.msra.gmra.mxu0 %vm932_vm4, %v1560_v30 }
 0x672   :  { %4669 = vmatpush3.msra.mxu0 %v1750_v35  ;;  %v1964_v35 = vld [vmem:[%s6635_s2 + $0x10] sm:$0xff] }
 0x673   :  { %4670 = vmatprep.subr.mxu0 %v1749_v37 }
 0x674   :  { %4671 = vmatpush3.msra.mxu0 %v1749_v37  ;;  %v1963_v37 = vld [vmem:[%s6635_s2 + $0x8] sm:$0xff] }
 0x675   :  { %4672 = vmatprep.subr.mxu0 %v1748_v38 }
 0x676   :  { %4673 = vmatpush3.msra.mxu0 %v1748_v38 }
 0x677   :  { %4674 = vmatprep.subr.mxu0 %v1747_v48 }
 0x678   :  { %4675 = vmatpush3.msra.mxu0 %v1747_v48 }
 0x731   :  { %v4656_v40 = vpop.f32.mrf.mxu0 }
 0x732   :  { %v1655_v41 = vadd.f32 %v4656_v40, %v4249_v39  ;;  %v1962_v40 = vld [vmem:[%s6635_s2] sm:$0xff] }
 0x733   :  { %v1649_v42 = vpop.f32.mrf.mxu0 }
 0x734   :  { %v1650_v43 = vadd.f32 %v4249_v39, %v1649_v42  ;;  %v1659_v45 = vmax.f32 %v1655_v41, 0.0 }
 0x736   :  { %v1658_v44 = vmax.f32 %v1650_v43, 0.0 }
 0x738   :  { %4665 = vmatprep.mubr.msk.f32.mxu1 %vm932_vm4, %v1658_v44 }
 0x739   :  { %4666 = vmatmul.mubr.msk.f32.vlgmr.msra.gmra.mxu1 %vm932_vm4, %v1659_v45  ;;  %v4269_v45 = vld [vmem:[#allocation35] ss:$0 sm:$0xff] }
 0x73a   :  { %4680 = vmatpush3.msra.mxu1 %v1755_v36 }
 0x73b   :  { %4681 = vmatprep.subr.mxu1 %v1754_v46 }
 0x73c   :  { %4682 = vmatpush3.msra.mxu1 %v1754_v46 }
 0x73d   :  { %4683 = vmatprep.subr.mxu1 %v1753_v47 }
 0x73e   :  { %4684 = vmatpush3.msra.mxu1 %v1753_v47 }
 0x73f   :  { %4685 = vmatprep.subr.mxu1 %v1752_v49 }
 0x740   :  { %4686 = vmatpush3.msra.mxu1 %v1752_v49 }
 0x7f9   :  { %v4667_v51 = vpop.f32.mrf.mxu1 }
 0x7fa   :  { %v6279_v52 = vadd.f32 %v4667_v51, %v4252_v50 }
 0x7fb   :  { %v1738_v53 = vpop.f32.mrf.mxu1 }
 0x7fc   :  { %v6281_v54 = vadd.f32 %v4252_v50, %v1738_v53  ;;  %4690 = vmatprep.subr.mxu0 %v6279_v52  ;;  %4697 = vmatprep.subr.mxu1 %v6279_v52 }
 0x7fe   :  { %4676 = vmatprep.mubr.msk.f32.mxu0 %vm932_vm4, %v6281_v54 }
 0x7ff   :  { %4677 = vmatmul.mubr.msk.f32.vlgmr.msra.gmra.mxu0 %vm932_vm4, %v6279_v52 }
 0x800   :  { %4691 = vmatpush3.msra.mxu0 %v6279_v52  ;;  %4694 = vmatprep.mubr.msk.f32.mxu0 %vm563_vm1, %v1967_v55 }
 0x801   :  { %4692 = vmatprep.subr.mxu0 %v6281_v54 }
 0x802   :  { %4693 = vmatpush3.msra.mxu0 %v6281_v54 }
 0x803   :  { %4695 = vmatmul.mubr.msk.f32.vlgmr.msra.gmra.mxu0 %vm563_vm1, %v1968_v56  ;;  %4704 = vmatprep.subr.mxu0 %v1960_v6 }
 0x804   :  { %4705 = vmatpush3.msra.mxu0 %v1960_v6  ;;  %v2394_v6 = vld [vmem:[%s6638_s27 + $0x38] sm:$0xff] }
 0x805   :  { %4706 = vmatprep.subr.mxu0 %v1959_v10 }
 0x806   :  { %4707 = vmatpush3.msra.mxu0 %v1959_v10  ;;  %v2393_v10 = vld [vmem:[%s6638_s27 + $0x30] sm:$0xff] }
 0x807   :  { %4708 = vmatprep.subr.mxu0 %v1958_v11 }
 0x808   :  { %4709 = vmatpush3.msra.mxu0 %v1958_v11  ;;  %v2392_v11 = vld [vmem:[%s6638_s27 + $0x28] sm:$0xff] }
 0x809   :  { %4710 = vmatprep.subr.mxu0 %v1957_v12 }
 0x80a   :  { %4711 = vmatpush3.msra.mxu0 %v1957_v12  ;;  %v2391_v12 = vld [vmem:[%s6638_s27 + $0x20] sm:$0xff] }
 0x80b   :  { %4712 = vmatprep.subr.mxu0 %v1956_v13 }
 0x80c   :  { %4713 = vmatpush3.msra.mxu0 %v1956_v13  ;;  %v2390_v13 = vld [vmem:[%s6638_s27 + $0x18] sm:$0xff] }
 0x80d   :  { %4714 = vmatprep.subr.mxu0 %v1955_v14 }
 0x80e   :  { %4715 = vmatpush3.msra.mxu0 %v1955_v14  ;;  %v2389_v14 = vld [vmem:[%s6638_s27 + $0x10] sm:$0xff] }
 0x80f   :  { %4716 = vmatprep.subr.mxu0 %v1954_v7 }
 0x810   :  { %4717 = vmatpush3.msra.mxu0 %v1954_v7  ;;  %v2388_v7 = vld [vmem:[%s6638_s27 + $0x8] sm:$0xff] }
 0x811   :  { %4718 = vmatprep.subr.mxu0 %v1953_v15 }
 0x812   :  { %4719 = vmatpush3.msra.mxu0 %v1953_v15 }
 0x813   :  { %4726 = vmatprep.subr.mxu0 %v1965_v17 }
 0x8bf   :  { %v4678_v58 = vpop.f32.mrf.mxu0 }
 0x8c0   :  { %v1841_v59 = vadd.f32 %v4678_v58, %v4255_v57 }
 0x8c1   :  { %v1835_v60 = vpop.f32.mrf.mxu0 }
 0x8c2   :  { %v1836_v61 = vadd.f32 %v4255_v57, %v1835_v60  ;;  %v1845_v0 = vmax.f32 %v1841_v59, 0.0  ;;  %v2403_v59 = vld [vmem:[#allocation38 + $0x18] sm:$0xff] }
 0x8c3   :  { %v6296_v62 = vpop.f32.mrf.mxu0 }
 0x8c4   :  { %v1844_v63 = vmax.f32 %v1836_v61, 0.0  ;;  %v4287_v61 = vld [vmem:[%s6633_s25 + $0x20] sm:$0xff] }
 0x8c5   :  { %v6299_v2 = vpop.f32.mrf.mxu0 }
 0x8c6   :  { %4687 = vmatprep.mubr.msk.f32.mxu1 %vm932_vm4, %v1844_v63  ;;  %2146 = vrot.lane.b32.xlu0 %v6299_v2, %s5836_s3  ;;  %v2402_v63 = vld [vmem:[#allocation38 + $0x10] sm:$0xff] }
 0x8c7   :  { %4688 = vmatmul.mubr.msk.f32.vlgmr.msra.gmra.mxu1 %vm932_vm4, %v1845_v0  ;;  %v2401_v0 = vld [vmem:[#allocation38 + $0x8] sm:$0xff] }
 0x8c8   :  { %4698 = vmatpush3.msra.mxu1 %v6279_v52  ;;  %4701 = vmatprep.mubr.msk.f32.mxu1 %vm563_vm1, %v4265_v1  ;;  %v2400_v1 = vld [vmem:[#allocation38] sm:$0xff] }
 0x8c9   :  { %4699 = vmatprep.subr.mxu1 %v6281_v54 }
 0x8ca   :  { %4700 = vmatpush3.msra.mxu1 %v6281_v54 }
 0x8cb   :  { %4740 = vmatprep.subr.mxu1 %v6279_v52  ;;  %4702 = vmatmul.mubr.msk.f32.vlgmr.msra.gmra.mxu1 %vm563_vm1, %v4266_v3  ;;  %v2397_v3 = vld [vmem:[%s6638_s27 + $0x50] sm:$0xff] }
 0x8cc   :  { %4741 = vmatpush3.msra.mxu1 %v6279_v52  ;;  %4744 = vmatprep.mubr.msk.f32.mxu1 %vm563_vm1, %v2405_v4  ;;  %v2396_v4 = vld [vmem:[%s6638_s27 + $0x48] sm:$0xff] }
 0x8cd   :  { %4742 = vmatprep.subr.mxu1 %v6281_v54 }
 0x8ce   :  { %4743 = vmatpush3.msra.mxu1 %v6281_v54 }
 0x8cf   :  { %4747 = vmatprep.subr.mxu1 %v6279_v52  ;;  %4745 = vmatmul.mubr.msk.f32.vlgmr.msra.gmra.mxu1 %vm563_vm1, %v2406_v5  ;;  %v2395_v5 = vld [vmem:[%s6638_s27 + $0x40] sm:$0xff] }
 0x8d0   :  { %4748 = vmatpush3.msra.mxu1 %v6279_v52  ;;  %4751 = vmatprep.mubr.msk.f32.mxu1 %vm563_vm1, %v4283_v28 }
 0x8d1   :  { %4749 = vmatprep.subr.mxu1 %v6281_v54 }
 0x8d2   :  { %4750 = vmatpush3.msra.mxu1 %v6281_v54 }
 0x8d3   :  { %4752 = vmatmul.mubr.msk.f32.vlgmr.msra.gmra.mxu1 %vm563_vm1, %v4284_v29 }
 0x938   :  { %v2147_v32 = vpop.permute.xlu0 %2146 }
 0x987   :  { %v4689_v18 = vpop.f32.mrf.mxu1 }
 0x988   :  { %v1930_v19 = vadd.f32 %v4689_v18, %v4258_v16 }
 0x989   :  { %v1924_v21 = vpop.f32.mrf.mxu1 }
 0x98a   :  { %v1941_v22 = vmax.f32 %v1930_v19, %v4261_v8  ;;  %v1925_v23 = vadd.f32 %v4258_v16, %v1924_v21  ;;  %v2387_v16 = vld [vmem:[%s6638_s27] sm:$0xff]  ;;  %v4279_v21 = vld [vmem:[#allocation8] ss:$0 sm:$0xff] }
 0x98b   :  { %v4703_v24 = vpop.f32.mrf.mxu1 }
 0x98c   :  { %v1950_v25 = vmin.f32 %v1941_v22, %v4262_v20  ;;  %v1940_v9 = vmax.f32 %v1925_v23, %v4261_v8 }
 0x98d   :  { %v2125_v26 = vpop.f32.mrf.mxu1 }
 0x98e   :  { %1952 = vst [vmem:[#allocation43 + $0x8] sm:$0xff] %v1950_v25  ;;  %v1949_v27 = vmin.f32 %v1940_v9, %v4262_v20  ;;  %2136 = vrot.lane.b32.xlu1 %v2125_v26, %s5836_s3  ;;  %v2152_v36 = vsel %vm932_vm4, %v2125_v26, %v2147_v32  ;;  %v4280_v26 = vld [vmem:[#allocation10] ss:$0 sm:$0xff] }
 0x98f   :  { %v6356_v41 = vpop.f32.mrf.mxu1 }
 0x990   :  { %1951 = vst [vmem:[#allocation43] sm:$0xff] %v1949_v27 }
 0x991   :  { %v6358_v42 = vpop.f32.mrf.mxu1 }
 0x992   :  { %2138 = vrot.lane.b32.xlu1 %v4703_v24, %s5836_s3 }
 0x993   :  { %v4753_v43 = vpop.f32.mrf.mxu1 }
 0x995   :  { %v2563_v44 = vpop.f32.mrf.mxu1 }
 0x996   :  { %2148 = vrot.lane.b32.xlu1 %v6296_v62, %s5836_s3 }
 0x99a   :  { %2660 = vrot.lane.b32.xlu1 %v4753_v43, %s5836_s3 }
 0x99e   :  { %2658 = vrot.lane.b32.xlu1 %v2563_v44, %s5836_s3 }
 0xa00   :  { %v2137_v30 = vpop.permute.xlu1 %2136 }
 0xa01   :  { %v2142_v31 = vsel %vm932_vm4, %v6299_v2, %v2137_v30  ;;  %v2398_v2 = vld [vmem:[%s6638_s27 + $0x58] sm:$0xff] }
 0xa02   :  { %4720 = vmatprep.mubr.msk.f32.mxu0 %vm2160_vm5, %v2142_v31  ;;  %4761 = vmatprep.subr.mxu1 %v2398_v2 }
 0xa03   :  { %4762 = vmatpush3.msra.mxu1 %v2398_v2  ;;  %v4309_v2 = vld [vmem:[%s6640_s29 + $0x20] sm:$0xff] }
 0xa04   :  { %v2139_v33 = vpop.permute.xlu1 %2138  ;;  %4763 = vmatprep.subr.mxu1 %v2397_v3 }
 0xa05   :  { %v2143_v34 = vsel %vm932_vm4, %v6296_v62, %v2139_v33  ;;  %v4288_v62 = vld [vmem:[%s6633_s25 + $0x28] sm:$0xff]  ;;  %4764 = vmatpush3.msra.mxu1 %v2397_v3 }
 0xa06   :  { %4721 = vmatmul.mubr.msk.f32.vlgmr.msra.gmra.mxu0 %vm2160_vm5, %v2143_v34  ;;  %4765 = vmatprep.subr.mxu1 %v2396_v4  ;;  %v4310_v3 = vld [vmem:[%s6640_s29 + $0x28] sm:$0xff] }
 0xa07   :  { %4727 = vmatpush3.msra.mxu0 %v1965_v17  ;;  %4723 = vmatprep.mubr.msk.f32.mxu0 %vm2160_vm5, %v2152_v36  ;;  %v4274_v17 = vld [vmem:[#allocation37] ss:$0 sm:$0xff] }
 0xa08   :  { %4728 = vmatprep.subr.mxu0 %v1964_v35  ;;  %v2149_v38 = vpop.permute.xlu1 %2148  ;;  %4766 = vmatpush3.msra.mxu1 %v2396_v4  ;;  %v4313_v4 = vld [vmem:[%s6640_s29 + $0x30] sm:$0xff] }
 0xa09   :  { %4729 = vmatpush3.msra.mxu0 %v1964_v35  ;;  %v2153_v39 = vsel %vm932_vm4, %v4703_v24, %v2149_v38  ;;  %4767 = vmatprep.subr.mxu1 %v2395_v5 }
 0xa0a   :  { %4730 = vmatprep.subr.mxu0 %v1963_v37  ;;  %4724 = vmatmul.mubr.msk.f32.gmra.mxu0 %vm2160_vm5, %v2153_v39 }
 0xa0b   :  { %4731 = vmatpush3.msra.mxu0 %v1963_v37  ;;  %4768 = vmatpush3.msra.mxu1 %v2395_v5  ;;  %v4314_v5 = vld [vmem:[%s6640_s29 + $0x38] sm:$0xff] }
 0xa0c   :  { %4732 = vmatprep.subr.mxu0 %v1962_v40  ;;  %4769 = vmatprep.subr.mxu1 %v2394_v6  ;;  %v2661_v33 = vpop.permute.xlu1 %2660 }
 0xa0d   :  { %4733 = vmatpush3.msra.mxu0 %v1962_v40  ;;  %4770 = vmatpush3.msra.mxu1 %v2394_v6  ;;  %v2673_v38 = vsel %vm932_vm4, %v6356_v41, %v2661_v33  ;;  %v2936_v6 = vld [vmem:[%s6641_s13 + $0x78] sm:$0xff] }
 0xa0e   :  { %4754 = vmatprep.subr.mxu0 %v6279_v52  ;;  %4771 = vmatprep.subr.mxu1 %v2393_v10 }
 0xa0f   :  { %4772 = vmatpush3.msra.mxu1 %v2393_v10  ;;  %v2935_v10 = vld [vmem:[%s6641_s13 + $0x70] sm:$0xff] }
 0xa10   :  { %4773 = vmatprep.subr.mxu1 %v2392_v11  ;;  %v2659_v34 = vpop.permute.xlu1 %2658 }
 0xa11   :  { %4774 = vmatpush3.msra.mxu1 %v2392_v11  ;;  %v2672_v36 = vsel %vm932_vm4, %v6358_v42, %v2659_v34  ;;  %v2934_v11 = vld [vmem:[%s6641_s13 + $0x68] sm:$0xff] }
 0xa12   :  { %4775 = vmatprep.subr.mxu1 %v2391_v12 }
 0xa13   :  { %4776 = vmatpush3.msra.mxu1 %v2391_v12  ;;  %v2933_v12 = vld [vmem:[%s6641_s13 + $0x60] sm:$0xff] }
 0xa14   :  { %4777 = vmatprep.subr.mxu1 %v2390_v13 }
 0xa15   :  { %4778 = vmatpush3.msra.mxu1 %v2390_v13  ;;  %v2932_v13 = vld [vmem:[%s6641_s13 + $0x58] sm:$0xff] }
 0xa16   :  { %4779 = vmatprep.subr.mxu1 %v2389_v14 }
 0xa17   :  { %4780 = vmatpush3.msra.mxu1 %v2389_v14  ;;  %v2931_v14 = vld [vmem:[%s6641_s13 + $0x50] sm:$0xff] }
 0xa18   :  { %4781 = vmatprep.subr.mxu1 %v2388_v7 }
 0xa19   :  { %4782 = vmatpush3.msra.mxu1 %v2388_v7  ;;  %v2930_v7 = vld [vmem:[%s6641_s13 + $0x48] sm:$0xff] }
 0xa1a   :  { %4783 = vmatprep.subr.mxu1 %v2387_v16 }
 0xa1b   :  { %4784 = vmatpush3.msra.mxu1 %v2387_v16 }
 0xa1c   :  { %4833 = vmatprep.subr.mxu1 %v2936_v6 }
 0xac6   :  { %v4722_v46 = vpop.f32.mrf.mxu0 }
 0xac7   :  { %v2245_v47 = vadd.f32 %v4722_v46, %v4269_v45 }
 0xac8   :  { %v2239_v48 = vpop.f32.mrf.mxu0 }
 0xac9   :  { %v2240_v49 = vadd.f32 %v4269_v45, %v2239_v48  ;;  %v2259_v53 = vmax.f32 %v2245_v47, 0.0  ;;  %v4291_v47 = vld [vmem:[%s6639_s10] ss:$0 sm:$0xff] }
 0xaca   :  { %v4725_v50 = vpop.f32.mrf.mxu0 }
 0xacb   :  { %v2258_v51 = vmax.f32 %v2240_v49, 0.0  ;;  %v2255_v55 = vadd.f32 %v4725_v50, %v4269_v45 }
 0xacc   :  { %v2249_v56 = vpop.f32.mrf.mxu0 }
 0xacd   :  { %v2250_v57 = vadd.f32 %v4269_v45, %v2249_v56  ;;  %4734 = vmatprep.mubr.msk.f32.mxu0 %vm932_vm4, %v2258_v51  ;;  %v2261_v60 = vmax.f32 %v2255_v55, 0.0 }
 0xace   :  { %4735 = vmatmul.mubr.msk.f32.vlgmr.msra.gmra.mxu0 %vm932_vm4, %v2259_v53 }
 0xacf   :  { %v2260_v58 = vmax.f32 %v2250_v57, 0.0  ;;  %4755 = vmatpush3.msra.mxu0 %v6279_v52 }
 0xad0   :  { %4756 = vmatprep.subr.mxu0 %v6281_v54 }
 0xad1   :  { %4757 = vmatpush3.msra.mxu0 %v6281_v54  ;;  %4737 = vmatprep.mubr.msk.f32.mxu0 %vm932_vm4, %v2260_v58 }
 0xad2   :  { %4738 = vmatmul.mubr.msk.f32.gmra.mxu0 %vm932_vm4, %v2261_v60  ;;  %4791 = vmatprep.subr.mxu0 %v2403_v59 }
 0xad3   :  { %4758 = vmatprep.mubr.msk.f32.mxu0 %vm563_vm1, %v4287_v61 }
 0xad6   :  { %4759 = vmatmul.mubr.msk.f32.vlgmr.msra.gmra.mxu0 %vm563_vm1, %v4288_v62  ;;  %v2943_v62 = vld [vmem:[%s6640_s29] sm:$0xff] }
 0xad7   :  { %4792 = vmatpush3.msra.mxu0 %v2403_v59 }
 0xad8   :  { %4793 = vmatprep.subr.mxu0 %v2402_v63 }
 0xad9   :  { %4794 = vmatpush3.msra.mxu0 %v2402_v63  ;;  %v2944_v63 = vld [vmem:[%s6640_s29 + $0x8] sm:$0xff] }
 0xada   :  { %4795 = vmatprep.subr.mxu0 %v2401_v0 }
 0xadb   :  { %4796 = vmatpush3.msra.mxu0 %v2401_v0  ;;  %v4305_v0 = vld [vmem:[%s6640_s29 + $0x10] sm:$0xff] }
 0xadc   :  { %4797 = vmatprep.subr.mxu0 %v2400_v1 }
 0xadd   :  { %4798 = vmatpush3.msra.mxu0 %v2400_v1  ;;  %v4306_v1 = vld [vmem:[%s6640_s29 + $0x18] sm:$0xff] }
 0xade   :  { %4805 = vmatprep.subr.mxu0 %v6279_v52 }
 0xb8e   :  { %v4736_v15 = vpop.f32.mrf.mxu0 }
 0xb8f   :  { %v2352_v19 = vadd.f32 %v4736_v15, %v4274_v17  ;;  %v2929_v15 = vld [vmem:[%s6641_s13 + $0x40] sm:$0xff] }
 0xb90   :  { %v2346_v18 = vpop.f32.mrf.mxu0 }
 0xb91   :  { %v2347_v23 = vadd.f32 %v4274_v17, %v2346_v18 }
 0xb92   :  { %v4739_v8 = vpop.f32.mrf.mxu0 }
 0xb93   :  { %v2362_v20 = vadd.f32 %v4739_v8, %v4274_v17 }
 0xb94   :  { %v2356_v22 = vpop.f32.mrf.mxu0 }
 0xb95   :  { %v2366_v24 = vadd.f32 %v2362_v20, %v2352_v19  ;;  %v2357_v25 = vadd.f32 %v4274_v17, %v2356_v22  ;;  %v4296_v17 = vld [vmem:[%s6642_s24] ss:$0 sm:$0xff]  ;;  %v2928_v19 = vld [vmem:[%s6641_s13 + $0x38] sm:$0xff]  ;;  %v4301_v22 = vld [vmem:[#allocation11] ss:$0 sm:$0xff] }
 0xb96   :  { %v4760_v9 = vpop.f32.mrf.mxu0 }
 0xb97   :  { %v2375_v27 = vmax.f32 %v2366_v24, %v4279_v21  ;;  %v2365_v28 = vadd.f32 %v2357_v25, %v2347_v23  ;;  %2668 = vrot.lane.b32.xlu1 %v4760_v9, %s5837_s8  ;;  %v2927_v24 = vld [vmem:[%s6641_s13 + $0x30] sm:$0xff] }
 0xb98   :  { %v2647_v31 = vpop.f32.mrf.mxu0 }
 0xb99   :  { %v2374_v29 = vmax.f32 %v2365_v28, %v4279_v21  ;;  %v2384_v30 = vmin.f32 %v2375_v27, %v4280_v26  ;;  %v2684_v43 = vsel %vm932_vm4, %v2647_v31, %v2659_v34  ;;  %v4302_v27 = vld [vmem:[#allocation13] ss:$0 sm:$0xff] }
 0xb9b   :  { %2666 = vrot.lane.b32.xlu1 %v2647_v31, %s5837_s8  ;;  %v2383_v32 = vmin.f32 %v2374_v29, %v4280_v26  ;;  %2386 = vst [vmem:[#allocation44 + $0x8] sm:$0xff] %v2384_v30  ;;  %v2926_v29 = vld [vmem:[%s6641_s13 + $0x28] sm:$0xff] }
 0xb9d   :  { %2385 = vst [vmem:[#allocation44] sm:$0xff] %v2383_v32 }
 0xb9f   :  { %2678 = vrot.lane.b32.xlu1 %v6358_v42, %s5837_s8  ;;  %v2685_v42 = vsel %vm932_vm4, %v4760_v9, %v2661_v33  ;;  %v2925_v33 = vld [vmem:[%s6641_s13 + $0x20] sm:$0xff] }
 0xba3   :  { %2680 = vrot.lane.b32.xlu1 %v6356_v41, %s5837_s8 }
 0xc09   :  { %v2669_v35 = vpop.permute.xlu1 %2668 }
 0xc0a   :  { %v2675_v40 = vsel %vm2160_vm5, %v2673_v38, %v2669_v35  ;;  %v2923_v38 = vld [vmem:[%s6641_s13 + $0x10] sm:$0xff] }
 0xc0d   :  { %v2667_v37 = vpop.permute.xlu1 %2666 }
 0xc0e   :  { %v2674_v39 = vsel %vm2160_vm5, %v2672_v36, %v2667_v37  ;;  %v2924_v37 = vld [vmem:[%s6641_s13 + $0x18] sm:$0xff] }
 0xc0f   :  { %4785 = vmatprep.mubr.msk.f32.mxu1 %vm2694_vm6, %v2674_v39 }
 0xc10   :  { %4786 = vmatmul.mubr.msk.f32.vlgmr.msra.gmra.mxu1 %vm2694_vm6, %v2675_v40 }
 0xc11   :  { %v2679_v44 = vpop.permute.xlu1 %2678  ;;  %4834 = vmatpush3.msra.mxu1 %v2936_v6 }
 0xc12   :  { %v2686_v45 = vsel %vm2160_vm5, %v2684_v43, %v2679_v44  ;;  %4835 = vmatprep.subr.mxu1 %v2935_v10 }
 0xc13   :  { %4788 = vmatprep.mubr.msk.f32.mxu1 %vm2694_vm6, %v2686_v45  ;;  %4836 = vmatpush3.msra.mxu1 %v2935_v10  ;;  %v2922_v45 = vld [vmem:[%s6641_s13 + $0x8] sm:$0xff] }
 0xc14   :  { %4837 = vmatprep.subr.mxu1 %v2934_v11 }
 0xc15   :  { %v2681_v46 = vpop.permute.xlu1 %2680  ;;  %4838 = vmatpush3.msra.mxu1 %v2934_v11 }
 0xc16   :  { %v2687_v41 = vsel %vm2160_vm5, %v2685_v42, %v2681_v46  ;;  %4839 = vmatprep.subr.mxu1 %v2933_v12  ;;  %v2921_v42 = vld [vmem:[%s6641_s13] sm:$0xff] }
 0xc17   :  { %4789 = vmatmul.mubr.msk.f32.gmra.mxu1 %vm2694_vm6, %v2687_v41 }
 0xc18   :  { %4840 = vmatpush3.msra.mxu1 %v2933_v12 }
 0xc19   :  { %4841 = vmatprep.subr.mxu1 %v2932_v13 }
 0xc1a   :  { %4842 = vmatpush3.msra.mxu1 %v2932_v13 }
 0xc1b   :  { %4843 = vmatprep.subr.mxu1 %v2931_v14 }
 0xc1c   :  { %4844 = vmatpush3.msra.mxu1 %v2931_v14 }
 0xc1d   :  { %4845 = vmatprep.subr.mxu1 %v2930_v7 }
 0xc1e   :  { %4846 = vmatpush3.msra.mxu1 %v2930_v7 }
 0xc1f   :  { %4847 = vmatprep.subr.mxu1 %v2929_v15 }
 0xc20   :  { %4848 = vmatpush3.msra.mxu1 %v2929_v15 }
 0xc21   :  { %4849 = vmatprep.subr.mxu1 %v2928_v19 }
 0xc22   :  { %4850 = vmatpush3.msra.mxu1 %v2928_v19 }
 0xc23   :  { %4851 = vmatprep.subr.mxu1 %v2927_v24 }
 0xc24   :  { %4852 = vmatpush3.msra.mxu1 %v2927_v24  ;;  %v5839_v24 = vmov 0.0  }
 0xc25   :  { %4853 = vmatprep.subr.mxu1 %v2926_v29 }
 0xc26   :  { %4854 = vmatpush3.msra.mxu1 %v2926_v29 }
 0xc27   :  { %4855 = vmatprep.subr.mxu1 %v2925_v33 }
 0xc28   :  { %4856 = vmatpush3.msra.mxu1 %v2925_v33 }
 0xc29   :  { %4857 = vmatprep.subr.mxu1 %v2924_v37 }
 0xc2a   :  { %4858 = vmatpush3.msra.mxu1 %v2924_v37  ;;  %v3576_v37 = vld [vmem:[%s6644_s11] sm:$0xff] }
 0xc2b   :  { %4859 = vmatprep.subr.mxu1 %v2923_v38 }
 0xc2c   :  { %4860 = vmatpush3.msra.mxu1 %v2923_v38  ;;  %v4326_v38 = vld [vmem:[%s6644_s11 + $0x8] sm:$0xff] }
 0xc2d   :  { %4861 = vmatprep.subr.mxu1 %v2922_v45 }
 0xc2e   :  { %4862 = vmatpush3.msra.mxu1 %v2922_v45  ;;  %v3568_v45 = vld [vmem:[%s6645_s15 + $0x70] sm:$0xff] }
 0xc2f   :  { %4863 = vmatprep.subr.mxu1 %v2921_v42 }
 0xc30   :  { %4864 = vmatpush3.msra.mxu1 %v2921_v42  ;;  %v3566_v42 = vld [vmem:[%s6645_s15 + $0x60] sm:$0xff] }
 0xcd0   :  { %v4787_v48 = vpop.f32.mrf.mxu1 }
 0xcd1   :  { %v2779_v49 = vadd.f32 %v4787_v48, %v4291_v47 }
 0xcd2   :  { %v2773_v50 = vpop.f32.mrf.mxu1 }
 0xcd3   :  { %v2774_v51 = vadd.f32 %v4291_v47, %v2773_v50  ;;  %v2793_v55 = vmax.f32 %v2779_v49, 0.0  ;;  %v2941_v49 = vld [vmem:[#allocation40 + $0x18] sm:$0xff] }
 0xcd5   :  { %v2792_v53 = vmax.f32 %v2774_v51, 0.0 }
 0xcd7   :  { %v4790_v56 = vpop.f32.mrf.mxu1  ;;  %4799 = vmatprep.mubr.msk.f32.mxu0 %vm932_vm4, %v2792_v53 }
 0xcd8   :  { %4800 = vmatmul.mubr.msk.f32.vlgmr.msra.gmra.mxu0 %vm932_vm4, %v2793_v55  ;;  %v2789_v57 = vadd.f32 %v4790_v56, %v4291_v47 }
 0xcd9   :  { %4806 = vmatpush3.msra.mxu0 %v6279_v52  ;;  %v2783_v58 = vpop.f32.mrf.mxu1 }
 0xcda   :  { %v2784_v59 = vadd.f32 %v4291_v47, %v2783_v58  ;;  %4807 = vmatprep.subr.mxu0 %v6281_v54  ;;  %v2795_v61 = vmax.f32 %v2789_v57, 0.0 }
 0xcdb   :  { %4808 = vmatpush3.msra.mxu0 %v6281_v54 }
 0xcdc   :  { %v2794_v60 = vmax.f32 %v2784_v59, 0.0  ;;  %4812 = vmatprep.subr.mxu0 %v6279_v52 }
 0xcde   :  { %4802 = vmatprep.mubr.msk.f32.mxu0 %vm932_vm4, %v2794_v60 }
 0xcdf   :  { %4803 = vmatmul.mubr.msk.f32.gmra.mxu0 %vm932_vm4, %v2795_v61 }
 0xce0   :  { %4809 = vmatprep.mubr.msk.f32.mxu0 %vm563_vm1, %v2943_v62 }
 0xce3   :  { %4810 = vmatmul.mubr.msk.f32.vlgmr.msra.gmra.mxu0 %vm563_vm1, %v2944_v63 }
 0xce4   :  { %4813 = vmatpush3.msra.mxu0 %v6279_v52  ;;  %4816 = vmatprep.mubr.msk.f32.mxu0 %vm563_vm1, %v4305_v0 }
 0xce5   :  { %4814 = vmatprep.subr.mxu0 %v6281_v54 }
 0xce6   :  { %4815 = vmatpush3.msra.mxu0 %v6281_v54 }
 0xce7   :  { %4819 = vmatprep.subr.mxu0 %v6279_v52  ;;  %4817 = vmatmul.mubr.msk.f32.vlgmr.msra.gmra.mxu0 %vm563_vm1, %v4306_v1 }
 0xce8   :  { %4820 = vmatpush3.msra.mxu0 %v6279_v52  ;;  %4823 = vmatprep.mubr.msk.f32.mxu0 %vm563_vm1, %v4309_v2 }
 0xce9   :  { %4821 = vmatprep.subr.mxu0 %v6281_v54 }
 0xcea   :  { %4822 = vmatpush3.msra.mxu0 %v6281_v54 }
 0xceb   :  { %4826 = vmatprep.subr.mxu0 %v6279_v52  ;;  %4824 = vmatmul.mubr.msk.f32.vlgmr.msra.gmra.mxu0 %vm563_vm1, %v4310_v3 }
 0xcec   :  { %4827 = vmatpush3.msra.mxu0 %v6279_v52  ;;  %4830 = vmatprep.mubr.msk.f32.mxu0 %vm563_vm1, %v4313_v4 }
 0xced   :  { %4828 = vmatprep.subr.mxu0 %v6281_v54 }
 0xcee   :  { %4829 = vmatpush3.msra.mxu0 %v6281_v54 }
 0xcef   :  { %4831 = vmatmul.mubr.msk.f32.vlgmr.msra.gmra.mxu0 %vm563_vm1, %v4314_v5  ;;  %4871 = vmatprep.subr.mxu0 %v2941_v49 }
 0xcf0   :  { %4872 = vmatpush3.msra.mxu0 %v2941_v49  ;;  %v3560_v49 = vld [vmem:[%s6645_s15 + $0x30] sm:$0xff] }
 0xd98   :  { %v4801_v16 = vpop.f32.mrf.mxu0 }
 0xd99   :  { %v2886_v20 = vadd.f32 %v4801_v16, %v4296_v17 }
 0xd9a   :  { %v2880_v18 = vpop.f32.mrf.mxu0 }
 0xd9b   :  { %v2881_v25 = vadd.f32 %v4296_v17, %v2880_v18 }
 0xd9f   :  { %v4804_v8 = vpop.f32.mrf.mxu0 }
 0xda0   :  { %v2896_v21 = vadd.f32 %v4804_v8, %v4296_v17 }
 0xda1   :  { %v2890_v23 = vpop.f32.mrf.mxu0 }
 0xda2   :  { %v2900_v9 = vadd.f32 %v2896_v21, %v2886_v20  ;;  %v2891_v26 = vadd.f32 %v4296_v17, %v2890_v23  ;;  %v2940_v21 = vld [vmem:[#allocation40 + $0x10] sm:$0xff]  ;;  %v2938_v23 = vld [vmem:[#allocation40] sm:$0xff] }
 0xda3   :  { %v4811_v28 = vpop.f32.mrf.mxu0  ;;  %4873 = vmatprep.subr.mxu0 %v2940_v21 }
 0xda4   :  { %v2909_v30 = vmax.f32 %v2900_v9, %v4301_v22  ;;  %v2899_v31 = vadd.f32 %v2891_v26, %v2881_v25  ;;  %4874 = vmatpush3.msra.mxu0 %v2940_v21  ;;  %v4317_v25 = vld [vmem:[%s6643_s0] ss:$0 sm:$0xff] }
 0xda5   :  { %v3017_v32 = vpop.f32.mrf.mxu0 }
 0xda6   :  { %v2918_v34 = vmin.f32 %v2909_v30, %v4302_v27  ;;  %v2908_v35 = vmax.f32 %v2899_v31, %v4301_v22  ;;  %v5080_v51 = vpack.i.bf16 %v4811_v28, %v3017_v32  ;;  %v2939_v22 = vld [vmem:[#allocation40 + $0x8] sm:$0xff] }
 0xda7   :  { %v4818_v36 = vpop.f32.mrf.mxu0  ;;  %4875 = vmatprep.subr.mxu0 %v2939_v22 }
 0xda8   :  { %2920 = vst [vmem:[#allocation46 + $0x8] sm:$0xff] %v2918_v34  ;;  %v2917_v39 = vmin.f32 %v2908_v35, %v4302_v27  ;;  %4876 = vmatpush3.msra.mxu0 %v2939_v22 }
 0xda9   :  { %v3101_v40 = vpop.f32.mrf.mxu0  ;;  %4877 = vmatprep.subr.mxu0 %v2938_v23 }
 0xdaa   :  { %2919 = vst [vmem:[#allocation46] sm:$0xff] %v2917_v39  ;;  %v5060_v43 = vpack.i.bf16 %v4818_v36, %v3101_v40  ;;  %4878 = vmatpush3.msra.mxu0 %v2938_v23  ;;  %v4328_v39 = vld [vmem:[%s6644_s11 + $0x10] sm:$0xff]  ;;  %v4330_v40 = vld [vmem:[%s6644_s11 + $0x18] sm:$0xff] }
 0xdab   :  { %v4825_v44 = vpop.f32.mrf.mxu0  ;;  %4885 = vmatprep.subr.mxu0 %v5839_v24 }
 0xdac   :  { %5061 = vrot.lane.b32.xlu0 %v5060_v43, %s5837_s8  ;;  %5056 = vrot.lane.b32.xlu1 %v5060_v43, %s5836_s3  ;;  %v5841_v43 = vmov 0  }
 0xdad   :  { %v3185_v46 = vpop.f32.mrf.mxu0  ;;  %5095 = vset.pattern.permute.xlu1 %v5841_v43  ;;  %5096 = vset.pattern.permute.xlu0 %v5841_v43 }
 0xdae   :  { %v5065_v41 = vpack.i.bf16 %v4825_v44, %v3185_v46  ;;  %v3569_v44 = vld [vmem:[%s6645_s15 + $0x78] sm:$0xff]  ;;  %v3564_v46 = vld [vmem:[%s6645_s15 + $0x50] sm:$0xff] }
 0xdaf   :  { %v4832_v47 = vpop.f32.mrf.mxu0  ;;  %4913 = vmatprep.subr.mxu1 %v3569_v44 }
 0xdb0   :  { %5066 = vrot.lane.b32.xlu1 %v5065_v41, %s5837_s8 }
 0xdb1   :  { %v3269_v48 = vpop.f32.mrf.mxu0 }
 0xdb2   :  { %v5075_v50 = vpack.i.bf16 %v4832_v47, %v3269_v48 }
 0xdb4   :  { %5071 = vrot.lane.b32.xlu1 %v5065_v41, %s5836_s3  ;;  %v3563_v41 = vld [vmem:[%s6645_s15 + $0x48] sm:$0xff] }
 0xdb8   :  { %5076 = vrot.lane.b32.xlu1 %v5075_v50, %s5838_s5 }
 0xdbc   :  { %5081 = vrot.lane.b32.xlu1 %v5080_v51, %s5838_s5  ;;  %v4318_v51 = vld [vmem:[%s6646_s17] ss:$0 sm:$0xff] }
 0xe1e   :  { %v5057_v53 = vpop.permute.xlu1 %5056  ;;  %v5062_v0 = vpop.permute.xlu0 %5061 }
 0xe1f   :  { %v5059_v57 = vunpack.i.h.bf16 %v5057_v53  ;;  %v5058_v58 = vunpack.i.l.bf16 %v5057_v53  ;;  %v5064_v14 = vunpack.i.h.bf16 %v5062_v0  ;;  %v5063_v7 = vunpack.i.l.bf16 %v5062_v0 }
 0xe21   :  { %v3303_v1 = vsel %vm932_vm4, %v4811_v28, %v5059_v57  ;;  %v3302_v4 = vsel %vm932_vm4, %v3017_v32, %v5058_v58 }
 0xe22   :  { %v5067_v55 = vpop.permute.xlu1 %5066 }
 0xe23   :  { %v5069_v59 = vunpack.i.h.bf16 %v5067_v55  ;;  %v5068_v60 = vunpack.i.l.bf16 %v5067_v55  ;;  %v3559_v55 = vld [vmem:[%s6645_s15 + $0x28] sm:$0xff] }
 0xe25   :  { %v3305_v5 = vsel %vm2160_vm5, %v3303_v1, %v5069_v59  ;;  %v3304_v6 = vsel %vm2160_vm5, %v3302_v4, %v5068_v60 }
 0xe26   :  { %v5072_v56 = vpop.permute.xlu1 %5071 }
 0xe27   :  { %v5074_v61 = vunpack.i.h.bf16 %v5072_v56  ;;  %v5073_v62 = vunpack.i.l.bf16 %v5072_v56  ;;  %v3558_v56 = vld [vmem:[%s6645_s15 + $0x20] sm:$0xff] }
 0xe29   :  { %v3328_v12 = vsel %vm932_vm4, %v3269_v48, %v5073_v62  ;;  %v3329_v13 = vsel %vm932_vm4, %v4832_v47, %v5074_v61  ;;  %v3562_v47 = vld [vmem:[%s6645_s15 + $0x40] sm:$0xff]  ;;  %v3561_v48 = vld [vmem:[%s6645_s15 + $0x38] sm:$0xff] }
 0xe2a   :  { %v5077_v63 = vpop.permute.xlu1 %5076  ;;  %v3330_v18 = vsel %vm2160_vm5, %v3328_v12, %v5063_v7  ;;  %v3331_v8 = vsel %vm2160_vm5, %v3329_v13, %v5064_v14  ;;  %v3538_v14 = vld [vmem:[%s6647_s21] sm:$0xff] }
 0xe2b   :  { %v5079_v2 = vunpack.i.h.bf16 %v5077_v63  ;;  %v5078_v3 = vunpack.i.l.bf16 %v5077_v63 }
 0xe2d   :  { %v3306_v10 = vsel %vm2694_vm6, %v3304_v6, %v5078_v3  ;;  %v3307_v11 = vsel %vm2694_vm6, %v3305_v5, %v5079_v2  ;;  %v3557_v3 = vld [vmem:[%s6645_s15 + $0x18] sm:$0xff]  ;;  %v3556_v5 = vld [vmem:[%s6645_s15 + $0x10] sm:$0xff] }
 0xe2e   :  { %v5082_v15 = vpop.permute.xlu1 %5081  ;;  %4865 = vmatprep.mubr.f32.mxu1 %v3306_v10  ;;  %v3555_v10 = vld [vmem:[%s6645_s15 + $0x8] sm:$0xff] }
 0xe2f   :  { %v5084_v16 = vunpack.i.h.bf16 %v5082_v15  ;;  %v5083_v17 = vunpack.i.l.bf16 %v5082_v15  ;;  %4866 = vmatmul.mubr.f32.vlgmr.msra.gmra.mxu1 %v3307_v11  ;;  %v3554_v11 = vld [vmem:[%s6645_s15] sm:$0xff] }
 0xe30   :  { %4914 = vmatpush3.msra.mxu1 %v3569_v44 }
 0xe31   :  { %v3332_v19 = vsel %vm2694_vm6, %v3330_v18, %v5083_v17  ;;  %v3333_v20 = vsel %vm2694_vm6, %v3331_v8, %v5084_v16  ;;  %4915 = vmatprep.subr.mxu1 %v3568_v45  ;;  %v3539_v18 = vld [vmem:[%s6647_s21 + $0x8] sm:$0xff] }
 0xe32   :  { %4868 = vmatprep.mubr.f32.mxu1 %v3332_v19  ;;  %4916 = vmatpush3.msra.mxu1 %v3568_v45 }
 0xe33   :  { %4869 = vmatmul.mubr.f32.gmra.mxu1 %v3333_v20 }
 0xeef   :  { %v4867_v9 = vpop.f32.mrf.mxu1 }
 0xef0   :  { %v3412_v26 = vadd.f32 %v4867_v9, %v4317_v25 }
 0xef1   :  { %v3406_v27 = vpop.f32.mrf.mxu1 }
 0xef2   :  { %v3407_v28 = vadd.f32 %v4317_v25, %v3406_v27  ;;  %v3426_v31 = vmax.f32 %v3412_v26, 0.0 }
 0xef3   :  { %v4870_v29 = vpop.f32.mrf.mxu1 }
 0xef4   :  { %v3425_v30 = vmax.f32 %v3407_v28, 0.0  ;;  %v3422_v32 = vadd.f32 %v4870_v29, %v4317_v25 }
 0xef5   :  { %v3416_v33 = vpop.f32.mrf.mxu1 }
 0xef6   :  { %v3417_v34 = vadd.f32 %v4317_v25, %v3416_v33  ;;  %4879 = vmatprep.mubr.msk.f32.mxu0 %vm932_vm4, %v3425_v30  ;;  %v3428_v36 = vmax.f32 %v3422_v32, 0.0 }
 0xef7   :  { %4880 = vmatmul.mubr.msk.f32.vlgmr.msra.gmra.mxu0 %vm932_vm4, %v3426_v31 }
 0xef8   :  { %v3427_v35 = vmax.f32 %v3417_v34, 0.0  ;;  %4886 = vmatpush3.msra.mxu0 %v6279_v52 }
 0xef9   :  { %4887 = vmatprep.subr.mxu0 %v5839_v24 }
 0xefa   :  { %4888 = vmatpush3.msra.mxu0 %v6281_v54  ;;  %4882 = vmatprep.mubr.msk.f32.mxu0 %vm932_vm4, %v3427_v35 }
 0xefb   :  { %4883 = vmatmul.mubr.msk.f32.gmra.mxu0 %vm932_vm4, %v3428_v36  ;;  %4892 = vmatprep.subr.mxu0 %v5839_v24  ;;  %v3574_v36 = vld [vmem:[#allocation41 + $0x18] sm:$0xff] }
 0xefc   :  { %4889 = vmatprep.mubr.msk.f32.mxu0 %vm5840_vm7, %v5839_v24 }
 0xeff   :  { %4890 = vmatmul.mubr.msk.f32.vlgmr.msra.gmra.mxu0 %vm563_vm1, %v3576_v37  ;;  %v3573_v37 = vld [vmem:[#allocation41 + $0x10] sm:$0xff] }
 0xf00   :  { %4893 = vmatpush3.msra.mxu0 %v6279_v52  ;;  %4896 = vmatprep.mubr.msk.f32.mxu0 %vm5840_vm7, %v5839_v24 }
 0xf01   :  { %4894 = vmatprep.subr.mxu0 %v5839_v24 }
 0xf02   :  { %4895 = vmatpush3.msra.mxu0 %v6281_v54 }
 0xf03   :  { %4899 = vmatprep.subr.mxu0 %v5839_v24  ;;  %4897 = vmatmul.mubr.msk.f32.vlgmr.msra.gmra.mxu0 %vm563_vm1, %v4326_v38  ;;  %v3572_v38 = vld [vmem:[#allocation41 + $0x8] sm:$0xff] }
 0xf04   :  { %4900 = vmatpush3.msra.mxu0 %v6279_v52  ;;  %4903 = vmatprep.mubr.msk.f32.mxu0 %vm5840_vm7, %v5839_v24 }
 0xf05   :  { %4901 = vmatprep.subr.mxu0 %v5839_v24 }
 0xf06   :  { %4902 = vmatpush3.msra.mxu0 %v6281_v54 }
 0xf07   :  { %4906 = vmatprep.subr.mxu0 %v5839_v24  ;;  %4904 = vmatmul.mubr.msk.f32.vlgmr.msra.gmra.mxu0 %vm563_vm1, %v4328_v39  ;;  %v3571_v39 = vld [vmem:[#allocation41] sm:$0xff] }
 0xf08   :  { %4907 = vmatpush3.msra.mxu0 %v6279_v52  ;;  %4910 = vmatprep.mubr.msk.f32.mxu0 %vm5840_vm7, %v5839_v24  ;;  %v3567_v52 = vld [vmem:[%s6645_s15 + $0x68] sm:$0xff] }
 0xf09   :  { %4908 = vmatprep.subr.mxu0 %v5839_v24  ;;  %4917 = vmatprep.subr.mxu1 %v3567_v52 }
 0xf0a   :  { %4909 = vmatpush3.msra.mxu0 %v6281_v54  ;;  %4918 = vmatpush3.msra.mxu1 %v3567_v52  ;;  %v3565_v54 = vld [vmem:[%s6645_s15 + $0x58] sm:$0xff] }
 0xf0b   :  { %4911 = vmatmul.mubr.msk.f32.vlgmr.msra.gmra.mxu0 %vm563_vm1, %v4330_v40  ;;  %4919 = vmatprep.subr.mxu1 %v3566_v42  ;;  %v4332_v40 = vld [vmem:[%s6648_s22] ss:$0 sm:$0xff] }
 0xf0c   :  { %4920 = vmatpush3.msra.mxu1 %v3566_v42  ;;  %4948 = vmatprep.subr.mxu0 %v3574_v36 }
 0xf0d   :  { %4921 = vmatprep.subr.mxu1 %v3565_v54  ;;  %4949 = vmatpush3.msra.mxu0 %v3574_v36 }
 0xf0e   :  { %4922 = vmatpush3.msra.mxu1 %v3565_v54  ;;  %4950 = vmatprep.subr.mxu0 %v3573_v37 }
 0xf0f   :  { %4923 = vmatprep.subr.mxu1 %v3564_v46  ;;  %4951 = vmatpush3.msra.mxu0 %v3573_v37 }
 0xf10   :  { %4924 = vmatpush3.msra.mxu1 %v3564_v46  ;;  %4952 = vmatprep.subr.mxu0 %v3572_v38 }
 0xf11   :  { %4925 = vmatprep.subr.mxu1 %v3563_v41  ;;  %4953 = vmatpush3.msra.mxu0 %v3572_v38 }
 0xf12   :  { %4926 = vmatpush3.msra.mxu1 %v3563_v41  ;;  %4954 = vmatprep.subr.mxu0 %v3571_v39 }
 0xf13   :  { %4927 = vmatprep.subr.mxu1 %v3562_v47  ;;  %4955 = vmatpush3.msra.mxu0 %v3571_v39 }
 0xf14   :  { %4928 = vmatpush3.msra.mxu1 %v3562_v47 }
 0xf15   :  { %4929 = vmatprep.subr.mxu1 %v3561_v48 }
 0xf16   :  { %4930 = vmatpush3.msra.mxu1 %v3561_v48 }
 0xf17   :  { %4931 = vmatprep.subr.mxu1 %v3560_v49 }
 0xf18   :  { %4932 = vmatpush3.msra.mxu1 %v3560_v49 }
 0xf19   :  { %4933 = vmatprep.subr.mxu1 %v3559_v55 }
 0xf1a   :  { %4934 = vmatpush3.msra.mxu1 %v3559_v55 }
 0xf1b   :  { %4935 = vmatprep.subr.mxu1 %v3558_v56 }
 0xf1c   :  { %4936 = vmatpush3.msra.mxu1 %v3558_v56 }
 0xf1d   :  { %4937 = vmatprep.subr.mxu1 %v3557_v3 }
 0xf1e   :  { %4938 = vmatpush3.msra.mxu1 %v3557_v3 }
 0xf1f   :  { %4939 = vmatprep.subr.mxu1 %v3556_v5 }
 0xf20   :  { %4940 = vmatpush3.msra.mxu1 %v3556_v5 }
 0xf21   :  { %4941 = vmatprep.subr.mxu1 %v3555_v10 }
 0xf22   :  { %4942 = vmatpush3.msra.mxu1 %v3555_v10 }
 0xf23   :  { %4943 = vmatprep.subr.mxu1 %v3554_v11 }
 0xf24   :  { %4944 = vmatpush3.msra.mxu1 %v3554_v11 }
 0xfb7   :  { %v4881_v50 = vpop.f32.mrf.mxu0 }
 0xfb8   :  { %v3519_v58 = vadd.f32 %v4881_v50, %v4318_v51 }
 0xfb9   :  { %v3513_v53 = vpop.f32.mrf.mxu0 }
 0xfba   :  { %v3514_v61 = vadd.f32 %v4318_v51, %v3513_v53 }
 0xfbb   :  { %v4884_v57 = vpop.f32.mrf.mxu0 }
 0xfbc   :  { %v3529_v59 = vadd.f32 %v4884_v57, %v4318_v51 }
 0xfbd   :  { %v3523_v60 = vpop.f32.mrf.mxu0 }
 0xfbe   :  { %v3533_v62 = vadd.f32 %v3529_v59, %v3519_v58  ;;  %v3524_v63 = vadd.f32 %v4318_v51, %v3523_v60 }
 0xfbf   :  { %v3646_v0 = vpop.f32.mrf.mxu0 }
 0xfc0   :  { %v3532_v1 = vadd.f32 %v3524_v63, %v3514_v61  ;;  %v4324_v33 = vclamps-f32 %v3533_v62, 20.0 }
 0xfc1   :  { %v4891_v2 = vpop.f32.mrf.mxu0 }
 0xfc2   :  { %v4323_v26 = vclamps-f32 %v3532_v1, 20.0 }
 0xfc3   :  { %v3721_v4 = vpop.f32.mrf.mxu0 }
 0xfc5   :  { %v4898_v6 = vpop.f32.mrf.mxu0 }
 0xfc7   :  { %v3796_v12 = vpop.f32.mrf.mxu0 }
 0xfc8   :  { %3880 = vrot.lane.b32.xlu1 %v3796_v12, %s5837_s8 }
 0xfc9   :  { %v4905_v13 = vpop.f32.mrf.mxu0 }
 0xfcb   :  { %v3871_v7 = vpop.f32.mrf.mxu0 }
 0xfcc   :  { %v5085_v15 = vpack.i.bf16 %v3871_v7, %v3721_v4  ;;  %3542 = vperm.xlu1 %5095, %v3538_v14   ;;  %v5090_v17 = vpack.i.bf16 %v3721_v4, %v3871_v7 }
 0xfcd   :  { %v4912_v16 = vpop.f32.mrf.mxu0 }
 0xfce   :  { %5086 = vrot.lane.b32.xlu0 %v5085_v15, %s5836_s3 }
 0xfd2   :  { %5091 = vrot.lane.b32.xlu0 %v5090_v17, %s5838_s5 }
 0xfd6   :  { %3547 = vperm.xlu0 %5096, %v3539_v18  }
0x103a   :  { %v3881_v21 = vpop.permute.xlu1 %3880 }
0x1040   :  { %v5087_v8 = vpop.permute.xlu0 %5086 }
0x1041   :  { %v5089_v19 = vunpack.i.h.bf16 %v5087_v8  ;;  %v5088_v20 = vunpack.i.l.bf16 %v5087_v8 }
0x1043   :  { %v3896_v22 = vsel %vm932_vm4, %v3646_v0, %v5089_v19  ;;  %v3887_v23 = vsel %vm932_vm4, %v3646_v0, %v5088_v20 }
0x1044   :  { %v5092_v24 = vpop.permute.xlu0 %5091  ;;  %v3888_v27 = vsel %vm2160_vm5, %v3887_v23, %v3881_v21  ;;  %v3897_v28 = vsel %vm2160_vm5, %v3896_v22, %v3881_v21 }
0x1045   :  { %v5094_v25 = vunpack.i.h.bf16 %v5092_v24  ;;  %v5093_v9 = vunpack.i.l.bf16 %v5092_v24 }
0x1047   :  { %v3543_v29 = vpop.permute.xlu1 %3542  ;;  %v3889_v30 = vsel %vm2694_vm6, %v3888_v27, %v5093_v9  ;;  %v3898_v31 = vsel %vm2694_vm6, %v3897_v28, %v5094_v25 }
0x1048   :  { %v3550_v32 = vmul.f32 %v4323_v26, %v3543_v29  ;;  %4945 = vmatprep.mubr.f32.mxu1 %v3889_v30 }
0x1049   :  { %4946 = vmatmul.mubr.f32.vlgmr.msra.gmra.mxu1 %v3898_v31 }
0x104a   :  { %3552 = vst [vmem:[#allocation47] sm:$0xff] %v3550_v32 }
0x1051   :  { %v3548_v34 = vpop.permute.xlu0 %3547 }
0x1052   :  { %v3551_v35 = vmul.f32 %v4324_v33, %v3548_v34 }
0x1054   :  { %3553 = vst [vmem:[#allocation47 + $0x8] sm:$0xff] %v3551_v35 }
0x1109   :  { %v4947_v43 = vpop.f32.mrf.mxu1 }
0x110a   :  { %v3977_v44 = vadd.f32 %v4947_v43, %v4332_v40 }
0x110b   :  { %v3971_v45 = vpop.f32.mrf.mxu1 }
0x110c   :  { %v3972_v52 = vadd.f32 %v4332_v40, %v3971_v45  ;;  %v3981_v54 = vmax.f32 %v3977_v44, 0.0 }
0x110e   :  { %v3980_v42 = vmax.f32 %v3972_v52, 0.0 }
0x1110   :  { %4956 = vmatprep.mubr.msk.f32.mxu0 %vm932_vm4, %v3980_v42 }
0x1111   :  { %4957 = vmatmul.mubr.msk.f32.vlgmr.msra.gmra.mxu0 %vm932_vm4, %v3981_v54 }
0x1112   :  { %5628 = shalt.err (!%p5625_p8)
}
0x1113   :  { %4095 = dma.vmem_to_hbm [thread:$0]  %s4090_s6, 256, %s6125_s12, [#allocation45], %s5810_s16, %s5810_s16, %s5811_s18  }
0x1114   :  { %s5637_s28 = scalar_lea.vmem %s4114_s20, 256  ;;  %p5642_p10 = scmp.lt.s32.totalorder %s4114_s20, %s4114_s20 }
0x1115   :  { %p5638_p9 = scmp.ne.s32.totalorder %s4114_s20, %s5637_s28  ;;  %p5643_p11 = scmp.lt.s32.totalorder %s5637_s28, %s5637_s28 }
0x1117   :  { %p5644_p12 = por %p5643_p11, %p5642_p10 }
0x1119   :  { %p5645_p13 = pnand %p5644_p12, %p5638_p9 }
0x111b   :  { %5648 = shalt.err (!%p5645_p13)
}
0x111c   :  { %4119 = dma.vmem_to_hbm [thread:$0]  %s4114_s20, 256, %s6135_s14, [#allocation48], %s5810_s16, %s5810_s16, %s5811_s18  }
0x111d   :  { %s5844_s25 = smov [#allocation43]   ;;  %s5845_s1 = smov [#allocation46]  }
0x111e   :  { %s4077_s3 = sshll.u32 %s5844_s25, 4  ;;  %s4101_s2 = sshll.u32 %s5845_s1, 4  ;;  %s4078_s3 = int_to_ptr.vmem [resolvable:$true] %s4077_s3  ;;  %s4102_s2 = int_to_ptr.vmem [resolvable:$true] %s4101_s2 }
0x111f   :  { %s5657_s7 = scalar_lea.vmem %s4078_s3, 256  ;;  %p5662_p1 = scmp.lt.s32.totalorder %s4078_s3, %s4078_s3 }
0x1120   :  { %p5658_p0 = scmp.ne.s32.totalorder %s4078_s3, %s5657_s7  ;;  %p5663_p2 = scmp.lt.s32.totalorder %s5657_s7, %s5657_s7 }
0x1122   :  { %p5664_p3 = por %p5663_p2, %p5662_p1 }
0x1124   :  { %p5665_p4 = pnand %p5664_p3, %p5658_p0 }
0x1126   :  { %5668 = shalt.err (!%p5665_p4)
}
0x1127   :  { %s6649_s12 = sld [smem:[#allocation106_spill]]  ;;  %s5677_s4 = scalar_lea.vmem %s4102_s2, 256 }
0x1128   :  { %p5678_p5 = scmp.ne.s32.totalorder %s4102_s2, %s5677_s4  ;;  %p5682_p6 = scmp.lt.s32.totalorder %s4102_s2, %s4102_s2 }
0x1129   :  { %p5683_p7 = scmp.lt.s32.totalorder %s5677_s4, %s5677_s4 }
0x112b   :  { %p5684_p8 = por %p5683_p7, %p5682_p6 }
0x112d   :  { %4083 = dma.vmem_to_hbm [thread:$0]  %s4078_s3, 256, %s6649_s12, [#allocation4], %s5810_s16, %s5810_s16, %s5811_s18  }
0x112e   :  { %p5685_p9 = pnand %p5684_p8, %p5678_p5 }
0x1130   :  { %5688 = shalt.err (!%p5685_p9)
}
0x1131   :  { %s6650_s14 = sld [smem:[#allocation105_spill]]  ;;  %s5846_s27 = smov [#allocation49]  }
0x1132   :  { %4107 = dma.vmem_to_hbm [thread:$0]  %s4102_s2, 256, %s6130_s30, [#allocation45], %s5810_s16, %s5810_s16, %s5811_s18  }
0x1133   :  { %s4126_s8 = sshll.u32 %s5846_s27, 4  ;;  %s4127_s8 = int_to_ptr.vmem [resolvable:$true] %s4126_s8 }
0x1134   :  { %s5697_s10 = scalar_lea.vmem %s4127_s8, 128  ;;  %p5702_p11 = scmp.lt.s32.totalorder %s4127_s8, %s4127_s8 }
0x1135   :  { %p5698_p10 = scmp.ne.s32.totalorder %s4127_s8, %s5697_s10  ;;  %p5703_p12 = scmp.lt.s32.totalorder %s5697_s10, %s5697_s10 }
0x1137   :  { %v4333_v41 = vld [vmem:[%s6650_s14] ss:$0 sm:$0xff]  ;;  %p5704_p13 = por %p5703_p12, %p5702_p11 }
0x1139   :  { %p5705_p0 = pnand %p5704_p13, %p5698_p10 }
0x11d1   :  { %v4958_v46 = vpop.f32.mrf.mxu0 }
0x11d2   :  { %v4066_v48 = vadd.f32 %v4958_v46, %v4333_v41 }
0x11d3   :  { %v4060_v47 = vpop.f32.mrf.mxu0 }
0x11d4   :  { %v4061_v49 = vadd.f32 %v4333_v41, %v4060_v47 }
0x11d6   :  { %v4069_v50 = vadd.f32 %v4066_v48, %v4061_v49 }
0x11d8   :  { %v4070_v51 = vmin.f32 %v4069_v50, 50.0 }
0x11da   :  { %4071 = vst [vmem:[#allocation49] sm:$0xff] %v4070_v51 }
0x11db   :  { %5708 = shalt.err (!%p5705_p0)
}
0x11dc   :  { %4129 = dma.vmem_to_hbm [thread:$0]  %s4127_s8, 128, %s6140_s19, [#allocation48]  }
0x11dd   :  { %5745 = dma.done.wait [#allocation4], 256  }
0x11de   :  { %5746 = vsyncadd [#allocation4], 4294967040 }
0x11df   :  { %5747 = dma.done.wait [#allocation45], 512  }
0x11e0   :  { %5748 = vsyncadd [#allocation45], 4294966784 }
0x11e1   :  { %5749 = dma.done.wait [#allocation48], 384  }
0x11e2   :  { %5750 = vsyncadd [#allocation48], 4294966912 }
0x11e3   :  { %4145 = vsyncpa [#allocation3], 1 }
0x11e4   :  { %4146 = vsyncpa [#allocation6], 1 }
0x11e5   :  { %4147 = vsyncpa [#allocation9], 1 }
0x11e6   :  { %4148 = vsyncpa [#allocation12], 1 }
0x11e7   :  { %4149 = vsyncpa [#allocation15], 1 }
0x11e8   :  { %4150 = vsyncpa [#allocation18], 1 }
0x11e9   :  { %4151 = vsyncpa [#allocation21], 1 }
0x11ea   :  { %4152 = vsyncpa [#allocation24], 1 }
0x11eb   :  { %4153 = vsyncpa [#allocation27], 1 }
0x11ec   :  { %4154 = vsyncpa [#allocation30], 1 }
0x11ed   :  { %4155 = vsyncpa [#allocation33], 1 }
0x11ee   :  { %4156 = vsyncpa [#allocation36], 1 }
0x11ef   :  { %4157 = vsyncpa [#allocation39], 1 }
0x11f0   :  { %4158 = vsyncpa [#allocation42], 1 }
0x11f1   :  { %4159 = vsyncpa [#allocation4], 1 }
0x11f2   :  { %4160 = vsyncpa [#allocation45], 1 }
0x11f3   :  { %4161 = vsyncpa [#allocation48], 1 }

</bundles_post_ra>
